<compile_context>
chip_gen: v7x
topology: tpu7x:2x2x1
jax: 0.10.0
libtpu: 0.0.40
codegen_flags: <defaults>
</compile_context>

<pallas_src>
import numpy as np

import jax
import jax.numpy as jnp
from jax.experimental import pallas as pl
from jax.experimental.pallas import tpu as pltpu


# ---------------------------------------------------------------------------
# helpers
# ---------------------------------------------------------------------------

def _row_tile(h, w):
    """Largest divisor of h keeping the in-kernel window (th+2, w+2, C) modest."""
    limit = max(1, 4096 // max(w, 1))
    for cand in range(min(h, limit), 0, -1):
        if h % cand == 0:
            return cand
    return h


def _erf_approx(x):
    # Abramowitz & Stegun 7.1.26 polynomial; |error| < 1.5e-7 -> exact GELU to
    # fp32 noise.  Uses only exp (EUP slot), guaranteed to lower in Mosaic.
    p = 0.3275911
    a1, a2, a3, a4, a5 = (0.254829592, -0.284496736, 1.421413741,
                          -1.453152027, 1.061405429)
    ax = jnp.abs(x)
    t = 1.0 / (1.0 + p * ax)
    poly = ((((a5 * t + a4) * t + a3) * t + a2) * t + a1) * t
    e = 1.0 - poly * jnp.exp(-ax * ax)
    return jnp.where(x >= 0, e, -e)


def _gelu_exact(x):
    return 0.5 * x * (1.0 + _erf_approx(x * 0.7071067811865476))


# ---------------------------------------------------------------------------
# Fused-im2col 3x3 conv kernel (padding=1, no bias), bf16 MXU / f32 accumulate
# ---------------------------------------------------------------------------

def _conv3x3_kernel(x_ref, w_ref, o_ref):
    # x_ref: (1, H+2, W+2, Cin) bf16 -- whole padded sample, resident per n
    # w_ref: (9, Cin, Cout)     bf16 -- whole weight, resident across the grid
    # o_ref: (1, th, W, Cout)   bf16
    th, W, Cout = o_ref.shape[1], o_ref.shape[2], o_ref.shape[3]
    Cin = x_ref.shape[3]
    row0 = pl.program_id(1) * th
    win = x_ref[0, pl.ds(row0, th + 2), :, :]            # (th+2, W+2, Cin)
    acc = jnp.zeros((th * W, Cout), jnp.float32)
    t = 0
    for kh in range(3):
        for kw in range(3):
            tap = win[kh:kh + th, kw:kw + W, :].reshape(th * W, Cin)
            acc = acc + jnp.dot(tap, w_ref[t],
                                preferred_element_type=jnp.float32)
            t += 1
    o_ref[0] = acc.reshape(th, W, Cout).astype(o_ref.dtype)


def conv3x3(x, wp):
    """3x3 conv, padding=1, no bias.  x: (N,H,W,Cin) bf16 NHWC."""
    N, H, W, Cin = x.shape
    Cout = wp["w_bf16"].shape[2]
    xp = jnp.pad(x.astype(jnp.bfloat16), ((0, 0), (1, 1), (1, 1), (0, 0)))
    th = _row_tile(H, W)
    return pl.pallas_call(
        _conv3x3_kernel,
        out_shape=jax.ShapeDtypeStruct((N, H, W, Cout), jnp.bfloat16),
        grid_spec=pltpu.PrefetchScalarGridSpec(
            num_scalar_prefetch=0,
            grid=(N, H // th),
            in_specs=[
                pl.BlockSpec((1, H + 2, W + 2, Cin), lambda n, i: (n, 0, 0, 0)),
                pl.BlockSpec((9, Cin, Cout), lambda n, i: (0, 0, 0)),
            ],
            out_specs=pl.BlockSpec((1, th, W, Cout), lambda n, i: (n, i, 0, 0)),
        ),
        compiler_params=pltpu.CompilerParams(
            dimension_semantics=("parallel", "arbitrary")),
    )(xp, wp["w_bf16"])


# ---------------------------------------------------------------------------
# GroupNorm(1, C) over NHWC with fused elementwise epilogue
#   mode: "plain" | "gelu" | "res_gelu" (gelu(extra + gn(x))) | "emb" (gn(x)+emb)
# ---------------------------------------------------------------------------

def _make_gn_kernel(mode):
    def kernel(*refs):
        if mode in ("plain", "gelu"):
            x_ref, g_ref, b_ref, o_ref = refs
            extra_ref = None
        else:
            x_ref, extra_ref, g_ref, b_ref, o_ref = refs
        x = x_ref[0].astype(jnp.float32)                  # (H*W, C)
        cnt = float(x.shape[0] * x.shape[1])
        mu = jnp.sum(x) / cnt
        xc = x - mu
        var = jnp.sum(xc * xc) / cnt                      # two-pass, f32
        y = xc * jax.lax.rsqrt(var + 1e-5)
        y = y * g_ref[...].astype(jnp.float32) + b_ref[...].astype(jnp.float32)
        if mode == "gelu":
            y = _gelu_exact(y)
        elif mode == "res_gelu":
            y = _gelu_exact(extra_ref[0].astype(jnp.float32) + y)
        elif mode == "emb":
            y = y + extra_ref[0].astype(jnp.float32)      # (1, C) broadcast
        o_ref[0] = y.astype(o_ref.dtype)
    return kernel


def group_norm_fused(x, gamma, beta, mode="plain", extra=None,
                     out_dtype=jnp.bfloat16):
    """x: (N,H,W,C) NHWC.  GroupNorm(1,C) per sample + fused epilogue."""
    N, H, W, C = x.shape
    xr = x.reshape(N, H * W, C)
    g = gamma.reshape(1, C).astype(jnp.float32)
    b = beta.reshape(1, C).astype(jnp.float32)

    operands = [xr]
    in_specs = [pl.BlockSpec((1, H * W, C), lambda n: (n, 0, 0))]
    if mode == "res_gelu":
        operands.append(extra.reshape(N, H * W, C))
        in_specs.append(pl.BlockSpec((1, H * W, C), lambda n: (n, 0, 0)))
    elif mode == "emb":
        operands.append(extra.reshape(N, 1, C).astype(jnp.float32))
        in_specs.append(pl.BlockSpec((1, 1, C), lambda n: (n, 0, 0)))
    operands += [g, b]
    in_specs += [pl.BlockSpec((1, C), lambda n: (0, 0)),
                 pl.BlockSpec((1, C), lambda n: (0, 0))]

    y = pl.pallas_call(
        _make_gn_kernel(mode),
        out_shape=jax.ShapeDtypeStruct((N, H * W, C), out_dtype),
        grid_spec=pltpu.PrefetchScalarGridSpec(
            num_scalar_prefetch=0,
            grid=(N,),
            in_specs=in_specs,
            out_specs=pl.BlockSpec((1, H * W, C), lambda n: (n, 0, 0))),
        compiler_params=pltpu.CompilerParams(
            dimension_semantics=("parallel",)),
    )(*operands)
    return y.reshape(N, H, W, C)


# ---------------------------------------------------------------------------
# Down block forward (NHWC bf16 inside; NCHW f32 at the boundary like PyTorch)
# ---------------------------------------------------------------------------

def maxpool2(x):                                    # NHWC
    N, H, W, C = x.shape
    return x.reshape(N, H // 2, 2, W // 2, 2, C).max(axis=(2, 4))


def down_forward(params, x_nchw, t):
    x = jnp.transpose(x_nchw.astype(jnp.float32), (0, 2, 3, 1))
    x = maxpool2(x.astype(jnp.bfloat16))                       # (N,H/2,W/2,Cin)

    dc1, dc2 = params["dc1"], params["dc2"]

    # DoubleConv(residual=True)
    h = conv3x3(x, dc1["w1"])
    h = group_norm_fused(h, dc1["gn1_w"], dc1["gn1_b"], mode="gelu")
    h = conv3x3(h, dc1["w2"])
    x1 = group_norm_fused(h, dc1["gn2_w"], dc1["gn2_b"],
                          mode="res_gelu", extra=x)

    # DoubleConv (plain)
    h = conv3x3(x1, dc2["w1"])
    h = group_norm_fused(h, dc2["gn1_w"], dc2["gn1_b"], mode="gelu")
    h = conv3x3(h, dc2["w2"])

    # time-embedding projection: tiny (batch x emb_dim) matmul, left to XLA.
    emb = jax.nn.silu(t.astype(jnp.float32)) @ params["emb_w"] + params["emb_b"]
    emb = emb[:h.shape[0]]                                     # (N, Cout) f32

    y = group_norm_fused(h, dc2["gn2_w"], dc2["gn2_b"],
                         mode="emb", extra=emb, out_dtype=jnp.float32)
    return jnp.transpose(y, (0, 3, 1, 2))                      # back to NCHW


# ---------------------------------------------------------------------------
# Parameter init (deterministic, synthetic)
# ---------------------------------------------------------------------------

class KeyGen:
    def __init__(self, key):
        self.key = key

    def __call__(self):
        self.key, k = jax.random.split(self.key)
        return k


def _conv_w(kg, cout, cin, k=3):
    fan_in = cin * k * k
    return jax.random.normal(kg(), (cout, cin, k, k), jnp.float32) / np.sqrt(fan_in)


def _prep_conv(w4d):
    cout, cin = w4d.shape[0], w4d.shape[1]
    # (Cout, Cin, 3, 3) -> (kh, kw, Cin, Cout) -> (9, Cin, Cout), kh-major taps.
    w = jnp.transpose(w4d, (2, 3, 1, 0)).reshape(9, cin, cout)
    return {"w_bf16": w.astype(jnp.bfloat16), "w_f32": w.astype(jnp.float32)}


def init_double_conv(kg, cin, cout, cmid=None):
    if cmid is None:
        cmid = cout
    return dict(
        w1=_prep_conv(_conv_w(kg, cmid, cin)),
        gn1_w=1.0 + 0.1 * jax.random.normal(kg(), (cmid,), jnp.float32),
        gn1_b=0.05 * jax.random.normal(kg(), (cmid,), jnp.float32),
        w2=_prep_conv(_conv_w(kg, cout, cmid)),
        gn2_w=1.0 + 0.1 * jax.random.normal(kg(), (cout,), jnp.float32),
        gn2_b=0.05 * jax.random.normal(kg(), (cout,), jnp.float32),
    )


def init_down(kg, cin, cout, emb_dim=256):
    w = jax.random.normal(kg(), (cout, emb_dim), jnp.float32) / np.sqrt(emb_dim)
    b = 0.02 * jax.random.normal(kg(), (cout,), jnp.float32)
    return dict(
        dc1=init_double_conv(kg, cin, cin),
        dc2=init_double_conv(kg, cin, cout),
        emb_w=jnp.transpose(w),     # (emb_dim, cout)
        emb_b=b,
    )


# ---------------------------------------------------------------------------
# Pure-JAX f32 reference (exact GELU) for a tolerance check of the bf16 path
# ---------------------------------------------------------------------------

def _ref_conv3x3(x, wp):
    w = wp["w_f32"]                                   # (9, Cin, Cout)
    N, H, W, C = x.shape
    xp = jnp.pad(x, ((0, 0), (1, 1), (1, 1), (0, 0)))
    out = jnp.zeros((N, H, W, w.shape[2]), jnp.float32)
    t = 0
    for kh in range(3):
        for kw in range(3):
            out = out + jnp.einsum('nhwc,co->nhwo',
                                   xp[:, kh:kh + H, kw:kw + W, :], w[t])
            t += 1
    return out


def _ref_gn(x, g, b):
    N, H, W, C = x.shape
    xr = x.reshape(N, -1)
    mu = xr.mean(axis=1, keepdims=True)
    var = ((xr - mu) ** 2).mean(axis=1, keepdims=True)
    y = ((xr - mu) / jnp.sqrt(var + 1e-5)).reshape(N, H, W, C)
    return y * g[None, None, None, :] + b[None, None, None, :]


def ref_down_forward(params, x_nchw, t):
    gelu = lambda v: jax.nn.gelu(v, approximate=False)
    x = jnp.transpose(x_nchw.astype(jnp.float32), (0, 2, 3, 1))
    x = maxpool2(x)
    dc1, dc2 = params["dc1"], params["dc2"]
    h = _ref_conv3x3(x, dc1["w1"])
    h = gelu(_ref_gn(h, dc1["gn1_w"], dc1["gn1_b"]))
    h = _ref_conv3x3(h, dc1["w2"])
    x1 = gelu(x + _ref_gn(h, dc1["gn2_w"], dc1["gn2_b"]))
    h = _ref_conv3x3(x1, dc2["w1"])
    h = gelu(_ref_gn(h, dc2["gn1_w"], dc2["gn1_b"]))
    h = _ref_conv3x3(h, dc2["w2"])
    h = _ref_gn(h, dc2["gn2_w"], dc2["gn2_b"])
    emb = jax.nn.silu(t.astype(jnp.float32)) @ params["emb_w"] + params["emb_b"]
    emb = emb[:h.shape[0]]
    return jnp.transpose(h + emb[:, None, None, :], (0, 3, 1, 2))


# ---------------------------------------------------------------------------
# Main
# ---------------------------------------------------------------------------

if __name__ == "__main__":
    key = jax.random.PRNGKey(0)
    pkey, xkey, tkey = jax.random.split(key, 3)

    in_ch, out_ch, emb_dim = 4, 8, 256
    params = init_down(KeyGen(pkey), in_ch, out_ch, emb_dim)

    x = jax.random.normal(xkey, (2, in_ch, 16, 16), jnp.float32)   # NCHW like torch
    t = jax.random.normal(tkey, (2, emb_dim), jnp.float32)

    fwd = jax.jit(down_forward)
    out = jax.block_until_ready(fwd(params, x, t))
    assert out.shape == (2, out_ch, 8, 8), out.shape
    assert bool(jnp.all(jnp.isfinite(out)))

    # Tolerance check vs pure-JAX f32 reference (bf16 activations => small drift).
    ref = jax.block_until_ready(jax.jit(ref_down_forward)(params, x, t))
    np.testing.assert_allclose(np.asarray(out), np.asarray(ref), rtol=5e-2, atol=5e-2)

    print("KERNEL_OK")
</pallas_src>

<mosaic_0001>
module attributes {stable_mosaic.version = 11 : i64} {
  func.func @_conv3x3_kernel(%arg0: i32, %arg1: i32, %arg2: memref<1x10x10x4xbf16, #tpu.memory_space<vmem>>, %arg3: memref<9x4x4xbf16, #tpu.memory_space<vmem>>, %arg4: memref<1x8x8x4xbf16, #tpu.memory_space<vmem>>) attributes {dimension_semantics = [#tpu.dimension_semantics<parallel>, #tpu.dimension_semantics<arbitrary>], iteration_bounds = array<i64: 2, 1>, scalar_prefetch = 0 : i64, scratch_operands = 0 : i64, tpu.core_type = #tpu.core_type<tc>, window_params = [{transform_indices = @transform_0, window_bounds = array<i64: 1, 10, 10, 4>}, {pipeline_mode = #tpu.pipeline_mode<synchronous>, transform_indices = @transform_1, window_bounds = array<i64: 9, 4, 4>}, {transform_indices = @transform_2, window_bounds = array<i64: 1, 8, 8, 4>}]} {
    %c8_i32 = arith.constant 8 : i32
    %0 = arith.muli %arg1, %c8_i32 : i32
    %c0 = arith.constant 0 : index
    %1 = arith.index_cast %0 : i32 to index
    %c0_0 = arith.constant 0 : index
    %c0_1 = arith.constant 0 : index
    %2 = vector.load %arg2[%c0, %1, %c0_0, %c0_1] : memref<1x10x10x4xbf16, #tpu.memory_space<vmem>>, vector<1x10x10x4xbf16>
    %3 = vector.shape_cast %2 : vector<1x10x10x4xbf16> to vector<10x10x4xbf16>
    %cst = arith.constant 0.000000e+00 : f32
    %4 = vector.broadcast %cst : f32 to vector<64x4xf32>
    %5 = vector.extract_strided_slice %3 {offsets = [0, 0, 0], sizes = [8, 8, 4], strides = [1, 1, 1]} : vector<10x10x4xbf16> to vector<8x8x4xbf16>
    %6 = vector.shape_cast %5 : vector<8x8x4xbf16> to vector<64x4xbf16>
    %c0_2 = arith.constant 0 : index
    %c0_3 = arith.constant 0 : index
    %c0_4 = arith.constant 0 : index
    %7 = vector.load %arg3[%c0_2, %c0_3, %c0_4] : memref<9x4x4xbf16, #tpu.memory_space<vmem>>, vector<1x4x4xbf16>
    %8 = vector.shape_cast %7 : vector<1x4x4xbf16> to vector<4x4xbf16>
    %cst_5 = arith.constant dense<0.000000e+00> : vector<64x4xf32>
    %9 = tpu.matmul %6, %8, %cst_5 {dimension_numbers = #tpu.dot_dimension_numbers<[1], [0], [0], [1], [0, 0, 1, 1], [], []>} : vector<64x4xbf16>, vector<4x4xbf16>, vector<64x4xf32> -> vector<64x4xf32>
    %10 = arith.addf %4, %9 : vector<64x4xf32>
    %11 = vector.extract_strided_slice %3 {offsets = [0, 1, 0], sizes = [8, 8, 4], strides = [1, 1, 1]} : vector<10x10x4xbf16> to vector<8x8x4xbf16>
    %12 = vector.shape_cast %11 : vector<8x8x4xbf16> to vector<64x4xbf16>
    %c1 = arith.constant 1 : index
    %c0_6 = arith.constant 0 : index
    %c0_7 = arith.constant 0 : index
    %13 = vector.load %arg3[%c1, %c0_6, %c0_7] : memref<9x4x4xbf16, #tpu.memory_space<vmem>>, vector<1x4x4xbf16>
    %14 = vector.shape_cast %13 : vector<1x4x4xbf16> to vector<4x4xbf16>
    %cst_8 = arith.constant dense<0.000000e+00> : vector<64x4xf32>
    %15 = tpu.matmul %12, %14, %cst_8 {dimension_numbers = #tpu.dot_dimension_numbers<[1], [0], [0], [1], [0, 0, 1, 1], [], []>} : vector<64x4xbf16>, vector<4x4xbf16>, vector<64x4xf32> -> vector<64x4xf32>
    %16 = arith.addf %10, %15 : vector<64x4xf32>
    %17 = vector.extract_strided_slice %3 {offsets = [0, 2, 0], sizes = [8, 8, 4], strides = [1, 1, 1]} : vector<10x10x4xbf16> to vector<8x8x4xbf16>
    %18 = vector.shape_cast %17 : vector<8x8x4xbf16> to vector<64x4xbf16>
    %c2 = arith.constant 2 : index
    %c0_9 = arith.constant 0 : index
    %c0_10 = arith.constant 0 : index
    %19 = vector.load %arg3[%c2, %c0_9, %c0_10] : memref<9x4x4xbf16, #tpu.memory_space<vmem>>, vector<1x4x4xbf16>
    %20 = vector.shape_cast %19 : vector<1x4x4xbf16> to vector<4x4xbf16>
    %cst_11 = arith.constant dense<0.000000e+00> : vector<64x4xf32>
    %21 = tpu.matmul %18, %20, %cst_11 {dimension_numbers = #tpu.dot_dimension_numbers<[1], [0], [0], [1], [0, 0, 1, 1], [], []>} : vector<64x4xbf16>, vector<4x4xbf16>, vector<64x4xf32> -> vector<64x4xf32>
    %22 = arith.addf %16, %21 : vector<64x4xf32>
    %23 = vector.extract_strided_slice %3 {offsets = [1, 0, 0], sizes = [8, 8, 4], strides = [1, 1, 1]} : vector<10x10x4xbf16> to vector<8x8x4xbf16>
    %24 = vector.shape_cast %23 : vector<8x8x4xbf16> to vector<64x4xbf16>
    %c3 = arith.constant 3 : index
    %c0_12 = arith.constant 0 : index
    %c0_13 = arith.constant 0 : index
    %25 = vector.load %arg3[%c3, %c0_12, %c0_13] : memref<9x4x4xbf16, #tpu.memory_space<vmem>>, vector<1x4x4xbf16>
    %26 = vector.shape_cast %25 : vector<1x4x4xbf16> to vector<4x4xbf16>
    %cst_14 = arith.constant dense<0.000000e+00> : vector<64x4xf32>
    %27 = tpu.matmul %24, %26, %cst_14 {dimension_numbers = #tpu.dot_dimension_numbers<[1], [0], [0], [1], [0, 0, 1, 1], [], []>} : vector<64x4xbf16>, vector<4x4xbf16>, vector<64x4xf32> -> vector<64x4xf32>
    %28 = arith.addf %22, %27 : vector<64x4xf32>
    %29 = vector.extract_strided_slice %3 {offsets = [1, 1, 0], sizes = [8, 8, 4], strides = [1, 1, 1]} : vector<10x10x4xbf16> to vector<8x8x4xbf16>
    %30 = vector.shape_cast %29 : vector<8x8x4xbf16> to vector<64x4xbf16>
    %c4 = arith.constant 4 : index
    %c0_15 = arith.constant 0 : index
    %c0_16 = arith.constant 0 : index
    %31 = vector.load %arg3[%c4, %c0_15, %c0_16] : memref<9x4x4xbf16, #tpu.memory_space<vmem>>, vector<1x4x4xbf16>
    %32 = vector.shape_cast %31 : vector<1x4x4xbf16> to vector<4x4xbf16>
    %cst_17 = arith.constant dense<0.000000e+00> : vector<64x4xf32>
    %33 = tpu.matmul %30, %32, %cst_17 {dimension_numbers = #tpu.dot_dimension_numbers<[1], [0], [0], [1], [0, 0, 1, 1], [], []>} : vector<64x4xbf16>, vector<4x4xbf16>, vector<64x4xf32> -> vector<64x4xf32>
    %34 = arith.addf %28, %33 : vector<64x4xf32>
    %35 = vector.extract_strided_slice %3 {offsets = [1, 2, 0], sizes = [8, 8, 4], strides = [1, 1, 1]} : vector<10x10x4xbf16> to vector<8x8x4xbf16>
    %36 = vector.shape_cast %35 : vector<8x8x4xbf16> to vector<64x4xbf16>
    %c5 = arith.constant 5 : index
    %c0_18 = arith.constant 0 : index
    %c0_19 = arith.constant 0 : index
    %37 = vector.load %arg3[%c5, %c0_18, %c0_19] : memref<9x4x4xbf16, #tpu.memory_space<vmem>>, vector<1x4x4xbf16>
    %38 = vector.shape_cast %37 : vector<1x4x4xbf16> to vector<4x4xbf16>
    %cst_20 = arith.constant dense<0.000000e+00> : vector<64x4xf32>
    %39 = tpu.matmul %36, %38, %cst_20 {dimension_numbers = #tpu.dot_dimension_numbers<[1], [0], [0], [1], [0, 0, 1, 1], [], []>} : vector<64x4xbf16>, vector<4x4xbf16>, vector<64x4xf32> -> vector<64x4xf32>
    %40 = arith.addf %34, %39 : vector<64x4xf32>
    %41 = vector.extract_strided_slice %3 {offsets = [2, 0, 0], sizes = [8, 8, 4], strides = [1, 1, 1]} : vector<10x10x4xbf16> to vector<8x8x4xbf16>
    %42 = vector.shape_cast %41 : vector<8x8x4xbf16> to vector<64x4xbf16>
    %c6 = arith.constant 6 : index
    %c0_21 = arith.constant 0 : index
    %c0_22 = arith.constant 0 : index
    %43 = vector.load %arg3[%c6, %c0_21, %c0_22] : memref<9x4x4xbf16, #tpu.memory_space<vmem>>, vector<1x4x4xbf16>
    %44 = vector.shape_cast %43 : vector<1x4x4xbf16> to vector<4x4xbf16>
    %cst_23 = arith.constant dense<0.000000e+00> : vector<64x4xf32>
    %45 = tpu.matmul %42, %44, %cst_23 {dimension_numbers = #tpu.dot_dimension_numbers<[1], [0], [0], [1], [0, 0, 1, 1], [], []>} : vector<64x4xbf16>, vector<4x4xbf16>, vector<64x4xf32> -> vector<64x4xf32>
    %46 = arith.addf %40, %45 : vector<64x4xf32>
    %47 = vector.extract_strided_slice %3 {offsets = [2, 1, 0], sizes = [8, 8, 4], strides = [1, 1, 1]} : vector<10x10x4xbf16> to vector<8x8x4xbf16>
    %48 = vector.shape_cast %47 : vector<8x8x4xbf16> to vector<64x4xbf16>
    %c7 = arith.constant 7 : index
    %c0_24 = arith.constant 0 : index
    %c0_25 = arith.constant 0 : index
    %49 = vector.load %arg3[%c7, %c0_24, %c0_25] : memref<9x4x4xbf16, #tpu.memory_space<vmem>>, vector<1x4x4xbf16>
    %50 = vector.shape_cast %49 : vector<1x4x4xbf16> to vector<4x4xbf16>
    %cst_26 = arith.constant dense<0.000000e+00> : vector<64x4xf32>
    %51 = tpu.matmul %48, %50, %cst_26 {dimension_numbers = #tpu.dot_dimension_numbers<[1], [0], [0], [1], [0, 0, 1, 1], [], []>} : vector<64x4xbf16>, vector<4x4xbf16>, vector<64x4xf32> -> vector<64x4xf32>
    %52 = arith.addf %46, %51 : vector<64x4xf32>
    %53 = vector.extract_strided_slice %3 {offsets = [2, 2, 0], sizes = [8, 8, 4], strides = [1, 1, 1]} : vector<10x10x4xbf16> to vector<8x8x4xbf16>
    %54 = vector.shape_cast %53 : vector<8x8x4xbf16> to vector<64x4xbf16>
    %c8 = arith.constant 8 : index
    %c0_27 = arith.constant 0 : index
    %c0_28 = arith.constant 0 : index
    %55 = vector.load %arg3[%c8, %c0_27, %c0_28] : memref<9x4x4xbf16, #tpu.memory_space<vmem>>, vector<1x4x4xbf16>
    %56 = vector.shape_cast %55 : vector<1x4x4xbf16> to vector<4x4xbf16>
    %cst_29 = arith.constant dense<0.000000e+00> : vector<64x4xf32>
    %57 = tpu.matmul %54, %56, %cst_29 {dimension_numbers = #tpu.dot_dimension_numbers<[1], [0], [0], [1], [0, 0, 1, 1], [], []>} : vector<64x4xbf16>, vector<4x4xbf16>, vector<64x4xf32> -> vector<64x4xf32>
    %58 = arith.addf %52, %57 : vector<64x4xf32>
    %59 = vector.shape_cast %58 : vector<64x4xf32> to vector<8x8x4xf32>
    %60 = arith.truncf %59 : vector<8x8x4xf32> to vector<8x8x4xbf16>
    %c0_30 = arith.constant 0 : index
    %c0_31 = arith.constant 0 : index
    %c0_32 = arith.constant 0 : index
    %c0_33 = arith.constant 0 : index
    %61 = vector.load %arg4[%c0_30, %c0_31, %c0_32, %c0_33] : memref<1x8x8x4xbf16, #tpu.memory_space<vmem>>, vector<1x8x8x4xbf16>
    %62 = vector.shape_cast %61 : vector<1x8x8x4xbf16> to vector<8x8x4xbf16>
    %63 = vector.shape_cast %60 : vector<8x8x4xbf16> to vector<1x8x8x4xbf16>
    tpu.vector_store %arg4[%c0_30, %c0_31, %c0_32, %c0_33], %63 {strides = array<i32>} : memref<1x8x8x4xbf16, #tpu.memory_space<vmem>>, vector<1x8x8x4xbf16>,
    return
  }
  func.func @transform_0(%arg0: i32, %arg1: i32) -> (i32, i32, i32, i32) {
    %c0_i32 = arith.constant 0 : i32
    %c0_i32_0 = arith.constant 0 : i32
    %c0_i32_1 = arith.constant 0 : i32
    %c0_i32_2 = arith.constant 0 : i32
    return %arg0, %c0_i32, %c0_i32_0, %c0_i32_1 : i32, i32, i32, i32
  }
  func.func @transform_1(%arg0: i32, %arg1: i32) -> (i32, i32, i32) {
    %c0_i32 = arith.constant 0 : i32
    %c0_i32_0 = arith.constant 0 : i32
    %c0_i32_1 = arith.constant 0 : i32
    %c0_i32_2 = arith.constant 0 : i32
    return %c0_i32, %c0_i32_0, %c0_i32_1 : i32, i32, i32
  }
  func.func @transform_2(%arg0: i32, %arg1: i32) -> (i32, i32, i32, i32) {
    %c0_i32 = arith.constant 0 : i32
    %c0_i32_0 = arith.constant 0 : i32
    %c0_i32_1 = arith.constant 0 : i32
    return %arg0, %arg1, %c0_i32, %c0_i32_0 : i32, i32, i32, i32
  }
}

module attributes {stable_mosaic.version = 11 : i64} {
  func.func @kernel(%arg0: i32, %arg1: memref<1x64x4xbf16, #tpu.memory_space<vmem>>, %arg2: memref<1x64x4xbf16, #tpu.memory_space<vmem>>, %arg3: memref<1x4xf32, #tpu.memory_space<vmem>>, %arg4: memref<1x4xf32, #tpu.memory_space<vmem>>, %arg5: memref<1x64x4xbf16, #tpu.memory_space<vmem>>) attributes {dimension_semantics = [#tpu.dimension_semantics<parallel>], iteration_bounds = array<i64: 2>, scalar_prefetch = 0 : i64, scratch_operands = 0 : i64, tpu.core_type = #tpu.core_type<tc>, window_params = [{transform_indices = @transform_0, window_bounds = array<i64: 1, 64, 4>}, {transform_indices = @transform_1, window_bounds = array<i64: 1, 64, 4>}, {pipeline_mode = #tpu.pipeline_mode<synchronous>, transform_indices = @transform_2, window_bounds = array<i64: 1, 4>}, {pipeline_mode = #tpu.pipeline_mode<synchronous>, transform_indices = @transform_3, window_bounds = array<i64: 1, 4>}, {transform_indices = @transform_4, window_bounds = array<i64: 1, 64, 4>}]} {
    %c0 = arith.constant 0 : index
    %c0_0 = arith.constant 0 : index
    %c0_1 = arith.constant 0 : index
    %0 = vector.load %arg1[%c0, %c0_0, %c0_1] : memref<1x64x4xbf16, #tpu.memory_space<vmem>>, vector<1x64x4xbf16>
    %1 = vector.shape_cast %0 : vector<1x64x4xbf16> to vector<64x4xbf16>
    %2 = arith.extf %1 : vector<64x4xbf16> to vector<64x4xf32>
    %3 = vector.shape_cast %2 : vector<64x4xf32> to vector<1x64x4xf32>
    %cst = arith.constant dense<0.000000e+00> : vector<1xf32>
    %4 = vector.multi_reduction <add>, %3, %cst [1, 2] : vector<1x64x4xf32> to vector<1xf32>
    %5 = vector.shape_cast %4 : vector<1xf32> to vector<1x1x1xf32>
    %6 = vector.extract %5[0, 0, 0] : f32 from vector<1x1x1xf32>
    %cst_2 = arith.constant 2.560000e+02 : f32
    %7 = arith.divf %6, %cst_2 : f32
    %8 = vector.broadcast %7 : f32 to vector<64x4xf32>
    %9 = arith.subf %2, %8 : vector<64x4xf32>
    %10 = arith.mulf %9, %9 : vector<64x4xf32>
    %11 = vector.shape_cast %10 : vector<64x4xf32> to vector<1x64x4xf32>
    %cst_3 = arith.constant dense<0.000000e+00> : vector<1xf32>
    %12 = vector.multi_reduction <add>, %11, %cst_3 [1, 2] : vector<1x64x4xf32> to vector<1xf32>
    %13 = vector.shape_cast %12 : vector<1xf32> to vector<1x1x1xf32>
    %14 = vector.extract %13[0, 0, 0] : f32 from vector<1x1x1xf32>
    %cst_4 = arith.constant 2.560000e+02 : f32
    %15 = arith.divf %14, %cst_4 : f32
    %cst_5 = arith.constant 9.99999974E-6 : f32
    %16 = arith.addf %15, %cst_5 : f32
    %17 = math.rsqrt %16 : f32
    %18 = vector.broadcast %17 : f32 to vector<64x4xf32>
    %19 = arith.mulf %9, %18 : vector<64x4xf32>
    %c0_6 = arith.constant 0 : index
    %c0_7 = arith.constant 0 : index
    %20 = vector.load %arg3[%c0_6, %c0_7] : memref<1x4xf32, #tpu.memory_space<vmem>>, vector<1x4xf32>
    %21 = vector.broadcast %20 : vector<1x4xf32> to vector<64x4xf32>
    %22 = arith.mulf %19, %21 : vector<64x4xf32>
    %c0_8 = arith.constant 0 : index
    %c0_9 = arith.constant 0 : index
    %23 = vector.load %arg4[%c0_8, %c0_9] : memref<1x4xf32, #tpu.memory_space<vmem>>, vector<1x4xf32>
    %24 = vector.broadcast %23 : vector<1x4xf32> to vector<64x4xf32>
    %25 = arith.addf %22, %24 : vector<64x4xf32>
    %c0_10 = arith.constant 0 : index
    %c0_11 = arith.constant 0 : index
    %c0_12 = arith.constant 0 : index
    %26 = vector.load %arg2[%c0_10, %c0_11, %c0_12] : memref<1x64x4xbf16, #tpu.memory_space<vmem>>, vector<1x64x4xbf16>
    %27 = vector.shape_cast %26 : vector<1x64x4xbf16> to vector<64x4xbf16>
    %28 = arith.extf %27 : vector<64x4xbf16> to vector<64x4xf32>
    %29 = arith.addf %28, %25 : vector<64x4xf32>
    %cst_13 = arith.constant 5.000000e-01 : f32
    %30 = vector.broadcast %cst_13 : f32 to vector<64x4xf32>
    %31 = arith.mulf %30, %29 : vector<64x4xf32>
    %cst_14 = arith.constant 0.707106769 : f32
    %32 = vector.broadcast %cst_14 : f32 to vector<64x4xf32>
    %33 = arith.mulf %29, %32 : vector<64x4xf32>
    %34 = math.absf %33 : vector<64x4xf32>
    %cst_15 = arith.constant 0.327591091 : f32
    %35 = vector.broadcast %cst_15 : f32 to vector<64x4xf32>
    %36 = arith.mulf %35, %34 : vector<64x4xf32>
    %cst_16 = arith.constant 1.000000e+00 : f32
    %37 = vector.broadcast %cst_16 : f32 to vector<64x4xf32>
    %38 = arith.addf %37, %36 : vector<64x4xf32>
    %cst_17 = arith.constant 1.000000e+00 : f32
    %39 = vector.broadcast %cst_17 : f32 to vector<64x4xf32>
    %40 = arith.divf %39, %38 : vector<64x4xf32>
    %cst_18 = arith.constant 1.06140542 : f32
    %41 = vector.broadcast %cst_18 : f32 to vector<64x4xf32>
    %42 = arith.mulf %41, %40 : vector<64x4xf32>
    %cst_19 = arith.constant -1.45315206 : f32
    %43 = vector.broadcast %cst_19 : f32 to vector<64x4xf32>
    %44 = arith.addf %42, %43 : vector<64x4xf32>
    %45 = arith.mulf %44, %40 : vector<64x4xf32>
    %cst_20 = arith.constant 1.42141378 : f32
    %46 = vector.broadcast %cst_20 : f32 to vector<64x4xf32>
    %47 = arith.addf %45, %46 : vector<64x4xf32>
    %48 = arith.mulf %47, %40 : vector<64x4xf32>
    %cst_21 = arith.constant -0.284496725 : f32
    %49 = vector.broadcast %cst_21 : f32 to vector<64x4xf32>
    %50 = arith.addf %48, %49 : vector<64x4xf32>
    %51 = arith.mulf %50, %40 : vector<64x4xf32>
    %cst_22 = arith.constant 0.254829586 : f32
    %52 = vector.broadcast %cst_22 : f32 to vector<64x4xf32>
    %53 = arith.addf %51, %52 : vector<64x4xf32>
    %54 = arith.mulf %53, %40 : vector<64x4xf32>
    %cst_23 = arith.constant 0.000000e+00 : f32
    %55 = vector.broadcast %cst_23 : f32 to vector<64x4xf32>
    %56 = arith.subf %55, %34 : vector<64x4xf32>
    %57 = arith.mulf %56, %34 : vector<64x4xf32>
    %58 = math.exp %57 : vector<64x4xf32>
    %59 = arith.mulf %54, %58 : vector<64x4xf32>
    %cst_24 = arith.constant 1.000000e+00 : f32
    %60 = vector.broadcast %cst_24 : f32 to vector<64x4xf32>
    %61 = arith.subf %60, %59 : vector<64x4xf32>
    %cst_25 = arith.constant 0.000000e+00 : f32
    %62 = vector.broadcast %cst_25 : f32 to vector<64x4xf32>
    %63 = arith.cmpf oge, %33, %62 : vector<64x4xf32>
    %cst_26 = arith.constant 0.000000e+00 : f32
    %64 = vector.broadcast %cst_26 : f32 to vector<64x4xf32>
    %65 = arith.subf %64, %61 : vector<64x4xf32>
    %66 = arith.select %63, %61, %65 : vector<64x4xi1>, vector<64x4xf32>
    %cst_27 = arith.constant 1.000000e+00 : f32
    %67 = vector.broadcast %cst_27 : f32 to vector<64x4xf32>
    %68 = arith.addf %67, %66 : vector<64x4xf32>
    %69 = arith.mulf %31, %68 : vector<64x4xf32>
    %70 = arith.truncf %69 : vector<64x4xf32> to vector<64x4xbf16>
    %c0_28 = arith.constant 0 : index
    %c0_29 = arith.constant 0 : index
    %c0_30 = arith.constant 0 : index
    %71 = vector.load %arg5[%c0_28, %c0_29, %c0_30] : memref<1x64x4xbf16, #tpu.memory_space<vmem>>, vector<1x64x4xbf16>
    %72 = vector.shape_cast %71 : vector<1x64x4xbf16> to vector<64x4xbf16>
    %73 = vector.shape_cast %70 : vector<64x4xbf16> to vector<1x64x4xbf16>
    tpu.vector_store %arg5[%c0_28, %c0_29, %c0_30], %73 {strides = array<i32>} : memref<1x64x4xbf16, #tpu.memory_space<vmem>>, vector<1x64x4xbf16>,
    return
  }
  func.func @transform_0(%arg0: i32) -> (i32, i32, i32) {
    %c0_i32 = arith.constant 0 : i32
    %c0_i32_0 = arith.constant 0 : i32
    %c0_i32_1 = arith.constant 0 : i32
    return %arg0, %c0_i32, %c0_i32_0 : i32, i32, i32
  }
  func.func @transform_1(%arg0: i32) -> (i32, i32, i32) {
    %c0_i32 = arith.constant 0 : i32
    %c0_i32_0 = arith.constant 0 : i32
    %c0_i32_1 = arith.constant 0 : i32
    return %arg0, %c0_i32, %c0_i32_0 : i32, i32, i32
  }
  func.func @transform_2(%arg0: i32) -> (i32, i32) {
    %c0_i32 = arith.constant 0 : i32
    %c0_i32_0 = arith.constant 0 : i32
    %c0_i32_1 = arith.constant 0 : i32
    return %c0_i32, %c0_i32_0 : i32, i32
  }
  func.func @transform_3(%arg0: i32) -> (i32, i32) {
    %c0_i32 = arith.constant 0 : i32
    %c0_i32_0 = arith.constant 0 : i32
    %c0_i32_1 = arith.constant 0 : i32
    return %c0_i32, %c0_i32_0 : i32, i32
  }
  func.func @transform_4(%arg0: i32) -> (i32, i32, i32) {
    %c0_i32 = arith.constant 0 : i32
    %c0_i32_0 = arith.constant 0 : i32
    %c0_i32_1 = arith.constant 0 : i32
    return %arg0, %c0_i32, %c0_i32_0 : i32, i32, i32
  }
}

module attributes {stable_mosaic.version = 11 : i64} {
  func.func @kernel(%arg0: i32, %arg1: memref<1x64x4xbf16, #tpu.memory_space<vmem>>, %arg2: memref<1x4xf32, #tpu.memory_space<vmem>>, %arg3: memref<1x4xf32, #tpu.memory_space<vmem>>, %arg4: memref<1x64x4xbf16, #tpu.memory_space<vmem>>) attributes {dimension_semantics = [#tpu.dimension_semantics<parallel>], iteration_bounds = array<i64: 2>, scalar_prefetch = 0 : i64, scratch_operands = 0 : i64, tpu.core_type = #tpu.core_type<tc>, window_params = [{transform_indices = @transform_0, window_bounds = array<i64: 1, 64, 4>}, {pipeline_mode = #tpu.pipeline_mode<synchronous>, transform_indices = @transform_1, window_bounds = array<i64: 1, 4>}, {pipeline_mode = #tpu.pipeline_mode<synchronous>, transform_indices = @transform_2, window_bounds = array<i64: 1, 4>}, {transform_indices = @transform_3, window_bounds = array<i64: 1, 64, 4>}]} {
    %c0 = arith.constant 0 : index
    %c0_0 = arith.constant 0 : index
    %c0_1 = arith.constant 0 : index
    %0 = vector.load %arg1[%c0, %c0_0, %c0_1] : memref<1x64x4xbf16, #tpu.memory_space<vmem>>, vector<1x64x4xbf16>
    %1 = vector.shape_cast %0 : vector<1x64x4xbf16> to vector<64x4xbf16>
    %2 = arith.extf %1 : vector<64x4xbf16> to vector<64x4xf32>
    %3 = vector.shape_cast %2 : vector<64x4xf32> to vector<1x64x4xf32>
    %cst = arith.constant dense<0.000000e+00> : vector<1xf32>
    %4 = vector.multi_reduction <add>, %3, %cst [1, 2] : vector<1x64x4xf32> to vector<1xf32>
    %5 = vector.shape_cast %4 : vector<1xf32> to vector<1x1x1xf32>
    %6 = vector.extract %5[0, 0, 0] : f32 from vector<1x1x1xf32>
    %cst_2 = arith.constant 2.560000e+02 : f32
    %7 = arith.divf %6, %cst_2 : f32
    %8 = vector.broadcast %7 : f32 to vector<64x4xf32>
    %9 = arith.subf %2, %8 : vector<64x4xf32>
    %10 = arith.mulf %9, %9 : vector<64x4xf32>
    %11 = vector.shape_cast %10 : vector<64x4xf32> to vector<1x64x4xf32>
    %cst_3 = arith.constant dense<0.000000e+00> : vector<1xf32>
    %12 = vector.multi_reduction <add>, %11, %cst_3 [1, 2] : vector<1x64x4xf32> to vector<1xf32>
    %13 = vector.shape_cast %12 : vector<1xf32> to vector<1x1x1xf32>
    %14 = vector.extract %13[0, 0, 0] : f32 from vector<1x1x1xf32>
    %cst_4 = arith.constant 2.560000e+02 : f32
    %15 = arith.divf %14, %cst_4 : f32
    %cst_5 = arith.constant 9.99999974E-6 : f32
    %16 = arith.addf %15, %cst_5 : f32
    %17 = math.rsqrt %16 : f32
    %18 = vector.broadcast %17 : f32 to vector<64x4xf32>
    %19 = arith.mulf %9, %18 : vector<64x4xf32>
    %c0_6 = arith.constant 0 : index
    %c0_7 = arith.constant 0 : index
    %20 = vector.load %arg2[%c0_6, %c0_7] : memref<1x4xf32, #tpu.memory_space<vmem>>, vector<1x4xf32>
    %21 = vector.broadcast %20 : vector<1x4xf32> to vector<64x4xf32>
    %22 = arith.mulf %19, %21 : vector<64x4xf32>
    %c0_8 = arith.constant 0 : index
    %c0_9 = arith.constant 0 : index
    %23 = vector.load %arg3[%c0_8, %c0_9] : memref<1x4xf32, #tpu.memory_space<vmem>>, vector<1x4xf32>
    %24 = vector.broadcast %23 : vector<1x4xf32> to vector<64x4xf32>
    %25 = arith.addf %22, %24 : vector<64x4xf32>
    %cst_10 = arith.constant 5.000000e-01 : f32
    %26 = vector.broadcast %cst_10 : f32 to vector<64x4xf32>
    %27 = arith.mulf %26, %25 : vector<64x4xf32>
    %cst_11 = arith.constant 0.707106769 : f32
    %28 = vector.broadcast %cst_11 : f32 to vector<64x4xf32>
    %29 = arith.mulf %25, %28 : vector<64x4xf32>
    %30 = math.absf %29 : vector<64x4xf32>
    %cst_12 = arith.constant 0.327591091 : f32
    %31 = vector.broadcast %cst_12 : f32 to vector<64x4xf32>
    %32 = arith.mulf %31, %30 : vector<64x4xf32>
    %cst_13 = arith.constant 1.000000e+00 : f32
    %33 = vector.broadcast %cst_13 : f32 to vector<64x4xf32>
    %34 = arith.addf %33, %32 : vector<64x4xf32>
    %cst_14 = arith.constant 1.000000e+00 : f32
    %35 = vector.broadcast %cst_14 : f32 to vector<64x4xf32>
    %36 = arith.divf %35, %34 : vector<64x4xf32>
    %cst_15 = arith.constant 1.06140542 : f32
    %37 = vector.broadcast %cst_15 : f32 to vector<64x4xf32>
    %38 = arith.mulf %37, %36 : vector<64x4xf32>
    %cst_16 = arith.constant -1.45315206 : f32
    %39 = vector.broadcast %cst_16 : f32 to vector<64x4xf32>
    %40 = arith.addf %38, %39 : vector<64x4xf32>
    %41 = arith.mulf %40, %36 : vector<64x4xf32>
    %cst_17 = arith.constant 1.42141378 : f32
    %42 = vector.broadcast %cst_17 : f32 to vector<64x4xf32>
    %43 = arith.addf %41, %42 : vector<64x4xf32>
    %44 = arith.mulf %43, %36 : vector<64x4xf32>
    %cst_18 = arith.constant -0.284496725 : f32
    %45 = vector.broadcast %cst_18 : f32 to vector<64x4xf32>
    %46 = arith.addf %44, %45 : vector<64x4xf32>
    %47 = arith.mulf %46, %36 : vector<64x4xf32>
    %cst_19 = arith.constant 0.254829586 : f32
    %48 = vector.broadcast %cst_19 : f32 to vector<64x4xf32>
    %49 = arith.addf %47, %48 : vector<64x4xf32>
    %50 = arith.mulf %49, %36 : vector<64x4xf32>
    %cst_20 = arith.constant 0.000000e+00 : f32
    %51 = vector.broadcast %cst_20 : f32 to vector<64x4xf32>
    %52 = arith.subf %51, %30 : vector<64x4xf32>
    %53 = arith.mulf %52, %30 : vector<64x4xf32>
    %54 = math.exp %53 : vector<64x4xf32>
    %55 = arith.mulf %50, %54 : vector<64x4xf32>
    %cst_21 = arith.constant 1.000000e+00 : f32
    %56 = vector.broadcast %cst_21 : f32 to vector<64x4xf32>
    %57 = arith.subf %56, %55 : vector<64x4xf32>
    %cst_22 = arith.constant 0.000000e+00 : f32
    %58 = vector.broadcast %cst_22 : f32 to vector<64x4xf32>
    %59 = arith.cmpf oge, %29, %58 : vector<64x4xf32>
    %cst_23 = arith.constant 0.000000e+00 : f32
    %60 = vector.broadcast %cst_23 : f32 to vector<64x4xf32>
    %61 = arith.subf %60, %57 : vector<64x4xf32>
    %62 = arith.select %59, %57, %61 : vector<64x4xi1>, vector<64x4xf32>
    %cst_24 = arith.constant 1.000000e+00 : f32
    %63 = vector.broadcast %cst_24 : f32 to vector<64x4xf32>
    %64 = arith.addf %63, %62 : vector<64x4xf32>
    %65 = arith.mulf %27, %64 : vector<64x4xf32>
    %66 = arith.truncf %65 : vector<64x4xf32> to vector<64x4xbf16>
    %c0_25 = arith.constant 0 : index
    %c0_26 = arith.constant 0 : index
    %c0_27 = arith.constant 0 : index
    %67 = vector.load %arg4[%c0_25, %c0_26, %c0_27] : memref<1x64x4xbf16, #tpu.memory_space<vmem>>, vector<1x64x4xbf16>
    %68 = vector.shape_cast %67 : vector<1x64x4xbf16> to vector<64x4xbf16>
    %69 = vector.shape_cast %66 : vector<64x4xbf16> to vector<1x64x4xbf16>
    tpu.vector_store %arg4[%c0_25, %c0_26, %c0_27], %69 {strides = array<i32>} : memref<1x64x4xbf16, #tpu.memory_space<vmem>>, vector<1x64x4xbf16>,
    return
  }
  func.func @transform_0(%arg0: i32) -> (i32, i32, i32) {
    %c0_i32 = arith.constant 0 : i32
    %c0_i32_0 = arith.constant 0 : i32
    %c0_i32_1 = arith.constant 0 : i32
    return %arg0, %c0_i32, %c0_i32_0 : i32, i32, i32
  }
  func.func @transform_1(%arg0: i32) -> (i32, i32) {
    %c0_i32 = arith.constant 0 : i32
    %c0_i32_0 = arith.constant 0 : i32
    %c0_i32_1 = arith.constant 0 : i32
    return %c0_i32, %c0_i32_0 : i32, i32
  }
  func.func @transform_2(%arg0: i32) -> (i32, i32) {
    %c0_i32 = arith.constant 0 : i32
    %c0_i32_0 = arith.constant 0 : i32
    %c0_i32_1 = arith.constant 0 : i32
    return %c0_i32, %c0_i32_0 : i32, i32
  }
  func.func @transform_3(%arg0: i32) -> (i32, i32, i32) {
    %c0_i32 = arith.constant 0 : i32
    %c0_i32_0 = arith.constant 0 : i32
    %c0_i32_1 = arith.constant 0 : i32
    return %arg0, %c0_i32, %c0_i32_0 : i32, i32, i32
  }
}

module attributes {stable_mosaic.version = 11 : i64} {
  func.func @_conv3x3_kernel(%arg0: i32, %arg1: i32, %arg2: memref<1x10x10x4xbf16, #tpu.memory_space<vmem>>, %arg3: memref<9x4x8xbf16, #tpu.memory_space<vmem>>, %arg4: memref<1x8x8x8xbf16, #tpu.memory_space<vmem>>) attributes {dimension_semantics = [#tpu.dimension_semantics<parallel>, #tpu.dimension_semantics<arbitrary>], iteration_bounds = array<i64: 2, 1>, scalar_prefetch = 0 : i64, scratch_operands = 0 : i64, tpu.core_type = #tpu.core_type<tc>, window_params = [{transform_indices = @transform_0, window_bounds = array<i64: 1, 10, 10, 4>}, {pipeline_mode = #tpu.pipeline_mode<synchronous>, transform_indices = @transform_1, window_bounds = array<i64: 9, 4, 8>}, {transform_indices = @transform_2, window_bounds = array<i64: 1, 8, 8, 8>}]} {
    %c8_i32 = arith.constant 8 : i32
    %0 = arith.muli %arg1, %c8_i32 : i32
    %c0 = arith.constant 0 : index
    %1 = arith.index_cast %0 : i32 to index
    %c0_0 = arith.constant 0 : index
    %c0_1 = arith.constant 0 : index
    %2 = vector.load %arg2[%c0, %1, %c0_0, %c0_1] : memref<1x10x10x4xbf16, #tpu.memory_space<vmem>>, vector<1x10x10x4xbf16>
    %3 = vector.shape_cast %2 : vector<1x10x10x4xbf16> to vector<10x10x4xbf16>
    %cst = arith.constant 0.000000e+00 : f32
    %4 = vector.broadcast %cst : f32 to vector<64x8xf32>
    %5 = vector.extract_strided_slice %3 {offsets = [0, 0, 0], sizes = [8, 8, 4], strides = [1, 1, 1]} : vector<10x10x4xbf16> to vector<8x8x4xbf16>
    %6 = vector.shape_cast %5 : vector<8x8x4xbf16> to vector<64x4xbf16>
    %c0_2 = arith.constant 0 : index
    %c0_3 = arith.constant 0 : index
    %c0_4 = arith.constant 0 : index
    %7 = vector.load %arg3[%c0_2, %c0_3, %c0_4] : memref<9x4x8xbf16, #tpu.memory_space<vmem>>, vector<1x4x8xbf16>
    %8 = vector.shape_cast %7 : vector<1x4x8xbf16> to vector<4x8xbf16>
    %cst_5 = arith.constant dense<0.000000e+00> : vector<64x8xf32>
    %9 = tpu.matmul %6, %8, %cst_5 {dimension_numbers = #tpu.dot_dimension_numbers<[1], [0], [0], [1], [0, 0, 1, 1], [], []>} : vector<64x4xbf16>, vector<4x8xbf16>, vector<64x8xf32> -> vector<64x8xf32>
    %10 = arith.addf %4, %9 : vector<64x8xf32>
    %11 = vector.extract_strided_slice %3 {offsets = [0, 1, 0], sizes = [8, 8, 4], strides = [1, 1, 1]} : vector<10x10x4xbf16> to vector<8x8x4xbf16>
    %12 = vector.shape_cast %11 : vector<8x8x4xbf16> to vector<64x4xbf16>
    %c1 = arith.constant 1 : index
    %c0_6 = arith.constant 0 : index
    %c0_7 = arith.constant 0 : index
    %13 = vector.load %arg3[%c1, %c0_6, %c0_7] : memref<9x4x8xbf16, #tpu.memory_space<vmem>>, vector<1x4x8xbf16>
    %14 = vector.shape_cast %13 : vector<1x4x8xbf16> to vector<4x8xbf16>
    %cst_8 = arith.constant dense<0.000000e+00> : vector<64x8xf32>
    %15 = tpu.matmul %12, %14, %cst_8 {dimension_numbers = #tpu.dot_dimension_numbers<[1], [0], [0], [1], [0, 0, 1, 1], [], []>} : vector<64x4xbf16>, vector<4x8xbf16>, vector<64x8xf32> -> vector<64x8xf32>
    %16 = arith.addf %10, %15 : vector<64x8xf32>
    %17 = vector.extract_strided_slice %3 {offsets = [0, 2, 0], sizes = [8, 8, 4], strides = [1, 1, 1]} : vector<10x10x4xbf16> to vector<8x8x4xbf16>
    %18 = vector.shape_cast %17 : vector<8x8x4xbf16> to vector<64x4xbf16>
    %c2 = arith.constant 2 : index
    %c0_9 = arith.constant 0 : index
    %c0_10 = arith.constant 0 : index
    %19 = vector.load %arg3[%c2, %c0_9, %c0_10] : memref<9x4x8xbf16, #tpu.memory_space<vmem>>, vector<1x4x8xbf16>
    %20 = vector.shape_cast %19 : vector<1x4x8xbf16> to vector<4x8xbf16>
    %cst_11 = arith.constant dense<0.000000e+00> : vector<64x8xf32>
    %21 = tpu.matmul %18, %20, %cst_11 {dimension_numbers = #tpu.dot_dimension_numbers<[1], [0], [0], [1], [0, 0, 1, 1], [], []>} : vector<64x4xbf16>, vector<4x8xbf16>, vector<64x8xf32> -> vector<64x8xf32>
    %22 = arith.addf %16, %21 : vector<64x8xf32>
    %23 = vector.extract_strided_slice %3 {offsets = [1, 0, 0], sizes = [8, 8, 4], strides = [1, 1, 1]} : vector<10x10x4xbf16> to vector<8x8x4xbf16>
    %24 = vector.shape_cast %23 : vector<8x8x4xbf16> to vector<64x4xbf16>
    %c3 = arith.constant 3 : index
    %c0_12 = arith.constant 0 : index
    %c0_13 = arith.constant 0 : index
    %25 = vector.load %arg3[%c3, %c0_12, %c0_13] : memref<9x4x8xbf16, #tpu.memory_space<vmem>>, vector<1x4x8xbf16>
    %26 = vector.shape_cast %25 : vector<1x4x8xbf16> to vector<4x8xbf16>
    %cst_14 = arith.constant dense<0.000000e+00> : vector<64x8xf32>
    %27 = tpu.matmul %24, %26, %cst_14 {dimension_numbers = #tpu.dot_dimension_numbers<[1], [0], [0], [1], [0, 0, 1, 1], [], []>} : vector<64x4xbf16>, vector<4x8xbf16>, vector<64x8xf32> -> vector<64x8xf32>
    %28 = arith.addf %22, %27 : vector<64x8xf32>
    %29 = vector.extract_strided_slice %3 {offsets = [1, 1, 0], sizes = [8, 8, 4], strides = [1, 1, 1]} : vector<10x10x4xbf16> to vector<8x8x4xbf16>
    %30 = vector.shape_cast %29 : vector<8x8x4xbf16> to vector<64x4xbf16>
    %c4 = arith.constant 4 : index
    %c0_15 = arith.constant 0 : index
    %c0_16 = arith.constant 0 : index
    %31 = vector.load %arg3[%c4, %c0_15, %c0_16] : memref<9x4x8xbf16, #tpu.memory_space<vmem>>, vector<1x4x8xbf16>
    %32 = vector.shape_cast %31 : vector<1x4x8xbf16> to vector<4x8xbf16>
    %cst_17 = arith.constant dense<0.000000e+00> : vector<64x8xf32>
    %33 = tpu.matmul %30, %32, %cst_17 {dimension_numbers = #tpu.dot_dimension_numbers<[1], [0], [0], [1], [0, 0, 1, 1], [], []>} : vector<64x4xbf16>, vector<4x8xbf16>, vector<64x8xf32> -> vector<64x8xf32>
    %34 = arith.addf %28, %33 : vector<64x8xf32>
    %35 = vector.extract_strided_slice %3 {offsets = [1, 2, 0], sizes = [8, 8, 4], strides = [1, 1, 1]} : vector<10x10x4xbf16> to vector<8x8x4xbf16>
    %36 = vector.shape_cast %35 : vector<8x8x4xbf16> to vector<64x4xbf16>
    %c5 = arith.constant 5 : index
    %c0_18 = arith.constant 0 : index
    %c0_19 = arith.constant 0 : index
    %37 = vector.load %arg3[%c5, %c0_18, %c0_19] : memref<9x4x8xbf16, #tpu.memory_space<vmem>>, vector<1x4x8xbf16>
    %38 = vector.shape_cast %37 : vector<1x4x8xbf16> to vector<4x8xbf16>
    %cst_20 = arith.constant dense<0.000000e+00> : vector<64x8xf32>
    %39 = tpu.matmul %36, %38, %cst_20 {dimension_numbers = #tpu.dot_dimension_numbers<[1], [0], [0], [1], [0, 0, 1, 1], [], []>} : vector<64x4xbf16>, vector<4x8xbf16>, vector<64x8xf32> -> vector<64x8xf32>
    %40 = arith.addf %34, %39 : vector<64x8xf32>
    %41 = vector.extract_strided_slice %3 {offsets = [2, 0, 0], sizes = [8, 8, 4], strides = [1, 1, 1]} : vector<10x10x4xbf16> to vector<8x8x4xbf16>
    %42 = vector.shape_cast %41 : vector<8x8x4xbf16> to vector<64x4xbf16>
    %c6 = arith.constant 6 : index
    %c0_21 = arith.constant 0 : index
    %c0_22 = arith.constant 0 : index
    %43 = vector.load %arg3[%c6, %c0_21, %c0_22] : memref<9x4x8xbf16, #tpu.memory_space<vmem>>, vector<1x4x8xbf16>
    %44 = vector.shape_cast %43 : vector<1x4x8xbf16> to vector<4x8xbf16>
    %cst_23 = arith.constant dense<0.000000e+00> : vector<64x8xf32>
    %45 = tpu.matmul %42, %44, %cst_23 {dimension_numbers = #tpu.dot_dimension_numbers<[1], [0], [0], [1], [0, 0, 1, 1], [], []>} : vector<64x4xbf16>, vector<4x8xbf16>, vector<64x8xf32> -> vector<64x8xf32>
    %46 = arith.addf %40, %45 : vector<64x8xf32>
    %47 = vector.extract_strided_slice %3 {offsets = [2, 1, 0], sizes = [8, 8, 4], strides = [1, 1, 1]} : vector<10x10x4xbf16> to vector<8x8x4xbf16>
    %48 = vector.shape_cast %47 : vector<8x8x4xbf16> to vector<64x4xbf16>
    %c7 = arith.constant 7 : index
    %c0_24 = arith.constant 0 : index
    %c0_25 = arith.constant 0 : index
    %49 = vector.load %arg3[%c7, %c0_24, %c0_25] : memref<9x4x8xbf16, #tpu.memory_space<vmem>>, vector<1x4x8xbf16>
    %50 = vector.shape_cast %49 : vector<1x4x8xbf16> to vector<4x8xbf16>
    %cst_26 = arith.constant dense<0.000000e+00> : vector<64x8xf32>
    %51 = tpu.matmul %48, %50, %cst_26 {dimension_numbers = #tpu.dot_dimension_numbers<[1], [0], [0], [1], [0, 0, 1, 1], [], []>} : vector<64x4xbf16>, vector<4x8xbf16>, vector<64x8xf32> -> vector<64x8xf32>
    %52 = arith.addf %46, %51 : vector<64x8xf32>
    %53 = vector.extract_strided_slice %3 {offsets = [2, 2, 0], sizes = [8, 8, 4], strides = [1, 1, 1]} : vector<10x10x4xbf16> to vector<8x8x4xbf16>
    %54 = vector.shape_cast %53 : vector<8x8x4xbf16> to vector<64x4xbf16>
    %c8 = arith.constant 8 : index
    %c0_27 = arith.constant 0 : index
    %c0_28 = arith.constant 0 : index
    %55 = vector.load %arg3[%c8, %c0_27, %c0_28] : memref<9x4x8xbf16, #tpu.memory_space<vmem>>, vector<1x4x8xbf16>
    %56 = vector.shape_cast %55 : vector<1x4x8xbf16> to vector<4x8xbf16>
    %cst_29 = arith.constant dense<0.000000e+00> : vector<64x8xf32>
    %57 = tpu.matmul %54, %56, %cst_29 {dimension_numbers = #tpu.dot_dimension_numbers<[1], [0], [0], [1], [0, 0, 1, 1], [], []>} : vector<64x4xbf16>, vector<4x8xbf16>, vector<64x8xf32> -> vector<64x8xf32>
    %58 = arith.addf %52, %57 : vector<64x8xf32>
    %59 = vector.shape_cast %58 : vector<64x8xf32> to vector<8x8x8xf32>
    %60 = arith.truncf %59 : vector<8x8x8xf32> to vector<8x8x8xbf16>
    %c0_30 = arith.constant 0 : index
    %c0_31 = arith.constant 0 : index
    %c0_32 = arith.constant 0 : index
    %c0_33 = arith.constant 0 : index
    %61 = vector.load %arg4[%c0_30, %c0_31, %c0_32, %c0_33] : memref<1x8x8x8xbf16, #tpu.memory_space<vmem>>, vector<1x8x8x8xbf16>
    %62 = vector.shape_cast %61 : vector<1x8x8x8xbf16> to vector<8x8x8xbf16>
    %63 = vector.shape_cast %60 : vector<8x8x8xbf16> to vector<1x8x8x8xbf16>
    tpu.vector_store %arg4[%c0_30, %c0_31, %c0_32, %c0_33], %63 {strides = array<i32>} : memref<1x8x8x8xbf16, #tpu.memory_space<vmem>>, vector<1x8x8x8xbf16>,
    return
  }
  func.func @transform_0(%arg0: i32, %arg1: i32) -> (i32, i32, i32, i32) {
    %c0_i32 = arith.constant 0 : i32
    %c0_i32_0 = arith.constant 0 : i32
    %c0_i32_1 = arith.constant 0 : i32
    %c0_i32_2 = arith.constant 0 : i32
    return %arg0, %c0_i32, %c0_i32_0, %c0_i32_1 : i32, i32, i32, i32
  }
  func.func @transform_1(%arg0: i32, %arg1: i32) -> (i32, i32, i32) {
    %c0_i32 = arith.constant 0 : i32
    %c0_i32_0 = arith.constant 0 : i32
    %c0_i32_1 = arith.constant 0 : i32
    %c0_i32_2 = arith.constant 0 : i32
    return %c0_i32, %c0_i32_0, %c0_i32_1 : i32, i32, i32
  }
  func.func @transform_2(%arg0: i32, %arg1: i32) -> (i32, i32, i32, i32) {
    %c0_i32 = arith.constant 0 : i32
    %c0_i32_0 = arith.constant 0 : i32
    %c0_i32_1 = arith.constant 0 : i32
    return %arg0, %arg1, %c0_i32, %c0_i32_0 : i32, i32, i32, i32
  }
}

module attributes {stable_mosaic.version = 11 : i64} {
  func.func @kernel(%arg0: i32, %arg1: memref<1x64x8xbf16, #tpu.memory_space<vmem>>, %arg2: memref<1x8xf32, #tpu.memory_space<vmem>>, %arg3: memref<1x8xf32, #tpu.memory_space<vmem>>, %arg4: memref<1x64x8xbf16, #tpu.memory_space<vmem>>) attributes {dimension_semantics = [#tpu.dimension_semantics<parallel>], iteration_bounds = array<i64: 2>, scalar_prefetch = 0 : i64, scratch_operands = 0 : i64, tpu.core_type = #tpu.core_type<tc>, window_params = [{transform_indices = @transform_0, window_bounds = array<i64: 1, 64, 8>}, {pipeline_mode = #tpu.pipeline_mode<synchronous>, transform_indices = @transform_1, window_bounds = array<i64: 1, 8>}, {pipeline_mode = #tpu.pipeline_mode<synchronous>, transform_indices = @transform_2, window_bounds = array<i64: 1, 8>}, {transform_indices = @transform_3, window_bounds = array<i64: 1, 64, 8>}]} {
    %c0 = arith.constant 0 : index
    %c0_0 = arith.constant 0 : index
    %c0_1 = arith.constant 0 : index
    %0 = vector.load %arg1[%c0, %c0_0, %c0_1] : memref<1x64x8xbf16, #tpu.memory_space<vmem>>, vector<1x64x8xbf16>
    %1 = vector.shape_cast %0 : vector<1x64x8xbf16> to vector<64x8xbf16>
    %2 = arith.extf %1 : vector<64x8xbf16> to vector<64x8xf32>
    %3 = vector.shape_cast %2 : vector<64x8xf32> to vector<1x64x8xf32>
    %cst = arith.constant dense<0.000000e+00> : vector<1xf32>
    %4 = vector.multi_reduction <add>, %3, %cst [1, 2] : vector<1x64x8xf32> to vector<1xf32>
    %5 = vector.shape_cast %4 : vector<1xf32> to vector<1x1x1xf32>
    %6 = vector.extract %5[0, 0, 0] : f32 from vector<1x1x1xf32>
    %cst_2 = arith.constant 5.120000e+02 : f32
    %7 = arith.divf %6, %cst_2 : f32
    %8 = vector.broadcast %7 : f32 to vector<64x8xf32>
    %9 = arith.subf %2, %8 : vector<64x8xf32>
    %10 = arith.mulf %9, %9 : vector<64x8xf32>
    %11 = vector.shape_cast %10 : vector<64x8xf32> to vector<1x64x8xf32>
    %cst_3 = arith.constant dense<0.000000e+00> : vector<1xf32>
    %12 = vector.multi_reduction <add>, %11, %cst_3 [1, 2] : vector<1x64x8xf32> to vector<1xf32>
    %13 = vector.shape_cast %12 : vector<1xf32> to vector<1x1x1xf32>
    %14 = vector.extract %13[0, 0, 0] : f32 from vector<1x1x1xf32>
    %cst_4 = arith.constant 5.120000e+02 : f32
    %15 = arith.divf %14, %cst_4 : f32
    %cst_5 = arith.constant 9.99999974E-6 : f32
    %16 = arith.addf %15, %cst_5 : f32
    %17 = math.rsqrt %16 : f32
    %18 = vector.broadcast %17 : f32 to vector<64x8xf32>
    %19 = arith.mulf %9, %18 : vector<64x8xf32>
    %c0_6 = arith.constant 0 : index
    %c0_7 = arith.constant 0 : index
    %20 = vector.load %arg2[%c0_6, %c0_7] : memref<1x8xf32, #tpu.memory_space<vmem>>, vector<1x8xf32>
    %21 = vector.broadcast %20 : vector<1x8xf32> to vector<64x8xf32>
    %22 = arith.mulf %19, %21 : vector<64x8xf32>
    %c0_8 = arith.constant 0 : index
    %c0_9 = arith.constant 0 : index
    %23 = vector.load %arg3[%c0_8, %c0_9] : memref<1x8xf32, #tpu.memory_space<vmem>>, vector<1x8xf32>
    %24 = vector.broadcast %23 : vector<1x8xf32> to vector<64x8xf32>
    %25 = arith.addf %22, %24 : vector<64x8xf32>
    %cst_10 = arith.constant 5.000000e-01 : f32
    %26 = vector.broadcast %cst_10 : f32 to vector<64x8xf32>
    %27 = arith.mulf %26, %25 : vector<64x8xf32>
    %cst_11 = arith.constant 0.707106769 : f32
    %28 = vector.broadcast %cst_11 : f32 to vector<64x8xf32>
    %29 = arith.mulf %25, %28 : vector<64x8xf32>
    %30 = math.absf %29 : vector<64x8xf32>
    %cst_12 = arith.constant 0.327591091 : f32
    %31 = vector.broadcast %cst_12 : f32 to vector<64x8xf32>
    %32 = arith.mulf %31, %30 : vector<64x8xf32>
    %cst_13 = arith.constant 1.000000e+00 : f32
    %33 = vector.broadcast %cst_13 : f32 to vector<64x8xf32>
    %34 = arith.addf %33, %32 : vector<64x8xf32>
    %cst_14 = arith.constant 1.000000e+00 : f32
    %35 = vector.broadcast %cst_14 : f32 to vector<64x8xf32>
    %36 = arith.divf %35, %34 : vector<64x8xf32>
    %cst_15 = arith.constant 1.06140542 : f32
    %37 = vector.broadcast %cst_15 : f32 to vector<64x8xf32>
    %38 = arith.mulf %37, %36 : vector<64x8xf32>
    %cst_16 = arith.constant -1.45315206 : f32
    %39 = vector.broadcast %cst_16 : f32 to vector<64x8xf32>
    %40 = arith.addf %38, %39 : vector<64x8xf32>
    %41 = arith.mulf %40, %36 : vector<64x8xf32>
    %cst_17 = arith.constant 1.42141378 : f32
    %42 = vector.broadcast %cst_17 : f32 to vector<64x8xf32>
    %43 = arith.addf %41, %42 : vector<64x8xf32>
    %44 = arith.mulf %43, %36 : vector<64x8xf32>
    %cst_18 = arith.constant -0.284496725 : f32
    %45 = vector.broadcast %cst_18 : f32 to vector<64x8xf32>
    %46 = arith.addf %44, %45 : vector<64x8xf32>
    %47 = arith.mulf %46, %36 : vector<64x8xf32>
    %cst_19 = arith.constant 0.254829586 : f32
    %48 = vector.broadcast %cst_19 : f32 to vector<64x8xf32>
    %49 = arith.addf %47, %48 : vector<64x8xf32>
    %50 = arith.mulf %49, %36 : vector<64x8xf32>
    %cst_20 = arith.constant 0.000000e+00 : f32
    %51 = vector.broadcast %cst_20 : f32 to vector<64x8xf32>
    %52 = arith.subf %51, %30 : vector<64x8xf32>
    %53 = arith.mulf %52, %30 : vector<64x8xf32>
    %54 = math.exp %53 : vector<64x8xf32>
    %55 = arith.mulf %50, %54 : vector<64x8xf32>
    %cst_21 = arith.constant 1.000000e+00 : f32
    %56 = vector.broadcast %cst_21 : f32 to vector<64x8xf32>
    %57 = arith.subf %56, %55 : vector<64x8xf32>
    %cst_22 = arith.constant 0.000000e+00 : f32
    %58 = vector.broadcast %cst_22 : f32 to vector<64x8xf32>
    %59 = arith.cmpf oge, %29, %58 : vector<64x8xf32>
    %cst_23 = arith.constant 0.000000e+00 : f32
    %60 = vector.broadcast %cst_23 : f32 to vector<64x8xf32>
    %61 = arith.subf %60, %57 : vector<64x8xf32>
    %62 = arith.select %59, %57, %61 : vector<64x8xi1>, vector<64x8xf32>
    %cst_24 = arith.constant 1.000000e+00 : f32
    %63 = vector.broadcast %cst_24 : f32 to vector<64x8xf32>
    %64 = arith.addf %63, %62 : vector<64x8xf32>
    %65 = arith.mulf %27, %64 : vector<64x8xf32>
    %66 = arith.truncf %65 : vector<64x8xf32> to vector<64x8xbf16>
    %c0_25 = arith.constant 0 : index
    %c0_26 = arith.constant 0 : index
    %c0_27 = arith.constant 0 : index
    %67 = vector.load %arg4[%c0_25, %c0_26, %c0_27] : memref<1x64x8xbf16, #tpu.memory_space<vmem>>, vector<1x64x8xbf16>
    %68 = vector.shape_cast %67 : vector<1x64x8xbf16> to vector<64x8xbf16>
    %69 = vector.shape_cast %66 : vector<64x8xbf16> to vector<1x64x8xbf16>
    tpu.vector_store %arg4[%c0_25, %c0_26, %c0_27], %69 {strides = array<i32>} : memref<1x64x8xbf16, #tpu.memory_space<vmem>>, vector<1x64x8xbf16>,
    return
  }
  func.func @transform_0(%arg0: i32) -> (i32, i32, i32) {
    %c0_i32 = arith.constant 0 : i32
    %c0_i32_0 = arith.constant 0 : i32
    %c0_i32_1 = arith.constant 0 : i32
    return %arg0, %c0_i32, %c0_i32_0 : i32, i32, i32
  }
  func.func @transform_1(%arg0: i32) -> (i32, i32) {
    %c0_i32 = arith.constant 0 : i32
    %c0_i32_0 = arith.constant 0 : i32
    %c0_i32_1 = arith.constant 0 : i32
    return %c0_i32, %c0_i32_0 : i32, i32
  }
  func.func @transform_2(%arg0: i32) -> (i32, i32) {
    %c0_i32 = arith.constant 0 : i32
    %c0_i32_0 = arith.constant 0 : i32
    %c0_i32_1 = arith.constant 0 : i32
    return %c0_i32, %c0_i32_0 : i32, i32
  }
  func.func @transform_3(%arg0: i32) -> (i32, i32, i32) {
    %c0_i32 = arith.constant 0 : i32
    %c0_i32_0 = arith.constant 0 : i32
    %c0_i32_1 = arith.constant 0 : i32
    return %arg0, %c0_i32, %c0_i32_0 : i32, i32, i32
  }
}

module attributes {stable_mosaic.version = 11 : i64} {
  func.func @_conv3x3_kernel(%arg0: i32, %arg1: i32, %arg2: memref<1x10x10x8xbf16, #tpu.memory_space<vmem>>, %arg3: memref<9x8x8xbf16, #tpu.memory_space<vmem>>, %arg4: memref<1x8x8x8xbf16, #tpu.memory_space<vmem>>) attributes {dimension_semantics = [#tpu.dimension_semantics<parallel>, #tpu.dimension_semantics<arbitrary>], iteration_bounds = array<i64: 2, 1>, scalar_prefetch = 0 : i64, scratch_operands = 0 : i64, tpu.core_type = #tpu.core_type<tc>, window_params = [{transform_indices = @transform_0, window_bounds = array<i64: 1, 10, 10, 8>}, {pipeline_mode = #tpu.pipeline_mode<synchronous>, transform_indices = @transform_1, window_bounds = array<i64: 9, 8, 8>}, {transform_indices = @transform_2, window_bounds = array<i64: 1, 8, 8, 8>}]} {
    %c8_i32 = arith.constant 8 : i32
    %0 = arith.muli %arg1, %c8_i32 : i32
    %c0 = arith.constant 0 : index
    %1 = arith.index_cast %0 : i32 to index
    %c0_0 = arith.constant 0 : index
    %c0_1 = arith.constant 0 : index
    %2 = vector.load %arg2[%c0, %1, %c0_0, %c0_1] : memref<1x10x10x8xbf16, #tpu.memory_space<vmem>>, vector<1x10x10x8xbf16>
    %3 = vector.shape_cast %2 : vector<1x10x10x8xbf16> to vector<10x10x8xbf16>
    %cst = arith.constant 0.000000e+00 : f32
    %4 = vector.broadcast %cst : f32 to vector<64x8xf32>
    %5 = vector.extract_strided_slice %3 {offsets = [0, 0, 0], sizes = [8, 8, 8], strides = [1, 1, 1]} : vector<10x10x8xbf16> to vector<8x8x8xbf16>
    %6 = vector.shape_cast %5 : vector<8x8x8xbf16> to vector<64x8xbf16>
    %c0_2 = arith.constant 0 : index
    %c0_3 = arith.constant 0 : index
    %c0_4 = arith.constant 0 : index
    %7 = vector.load %arg3[%c0_2, %c0_3, %c0_4] : memref<9x8x8xbf16, #tpu.memory_space<vmem>>, vector<1x8x8xbf16>
    %8 = vector.shape_cast %7 : vector<1x8x8xbf16> to vector<8x8xbf16>
    %cst_5 = arith.constant dense<0.000000e+00> : vector<64x8xf32>
    %9 = tpu.matmul %6, %8, %cst_5 {dimension_numbers = #tpu.dot_dimension_numbers<[1], [0], [0], [1], [0, 0, 1, 1], [], []>} : vector<64x8xbf16>, vector<8x8xbf16>, vector<64x8xf32> -> vector<64x8xf32>
    %10 = arith.addf %4, %9 : vector<64x8xf32>
    %11 = vector.extract_strided_slice %3 {offsets = [0, 1, 0], sizes = [8, 8, 8], strides = [1, 1, 1]} : vector<10x10x8xbf16> to vector<8x8x8xbf16>
    %12 = vector.shape_cast %11 : vector<8x8x8xbf16> to vector<64x8xbf16>
    %c1 = arith.constant 1 : index
    %c0_6 = arith.constant 0 : index
    %c0_7 = arith.constant 0 : index
    %13 = vector.load %arg3[%c1, %c0_6, %c0_7] : memref<9x8x8xbf16, #tpu.memory_space<vmem>>, vector<1x8x8xbf16>
    %14 = vector.shape_cast %13 : vector<1x8x8xbf16> to vector<8x8xbf16>
    %cst_8 = arith.constant dense<0.000000e+00> : vector<64x8xf32>
    %15 = tpu.matmul %12, %14, %cst_8 {dimension_numbers = #tpu.dot_dimension_numbers<[1], [0], [0], [1], [0, 0, 1, 1], [], []>} : vector<64x8xbf16>, vector<8x8xbf16>, vector<64x8xf32> -> vector<64x8xf32>
    %16 = arith.addf %10, %15 : vector<64x8xf32>
    %17 = vector.extract_strided_slice %3 {offsets = [0, 2, 0], sizes = [8, 8, 8], strides = [1, 1, 1]} : vector<10x10x8xbf16> to vector<8x8x8xbf16>
    %18 = vector.shape_cast %17 : vector<8x8x8xbf16> to vector<64x8xbf16>
    %c2 = arith.constant 2 : index
    %c0_9 = arith.constant 0 : index
    %c0_10 = arith.constant 0 : index
    %19 = vector.load %arg3[%c2, %c0_9, %c0_10] : memref<9x8x8xbf16, #tpu.memory_space<vmem>>, vector<1x8x8xbf16>
    %20 = vector.shape_cast %19 : vector<1x8x8xbf16> to vector<8x8xbf16>
    %cst_11 = arith.constant dense<0.000000e+00> : vector<64x8xf32>
    %21 = tpu.matmul %18, %20, %cst_11 {dimension_numbers = #tpu.dot_dimension_numbers<[1], [0], [0], [1], [0, 0, 1, 1], [], []>} : vector<64x8xbf16>, vector<8x8xbf16>, vector<64x8xf32> -> vector<64x8xf32>
    %22 = arith.addf %16, %21 : vector<64x8xf32>
    %23 = vector.extract_strided_slice %3 {offsets = [1, 0, 0], sizes = [8, 8, 8], strides = [1, 1, 1]} : vector<10x10x8xbf16> to vector<8x8x8xbf16>
    %24 = vector.shape_cast %23 : vector<8x8x8xbf16> to vector<64x8xbf16>
    %c3 = arith.constant 3 : index
    %c0_12 = arith.constant 0 : index
    %c0_13 = arith.constant 0 : index
    %25 = vector.load %arg3[%c3, %c0_12, %c0_13] : memref<9x8x8xbf16, #tpu.memory_space<vmem>>, vector<1x8x8xbf16>
    %26 = vector.shape_cast %25 : vector<1x8x8xbf16> to vector<8x8xbf16>
    %cst_14 = arith.constant dense<0.000000e+00> : vector<64x8xf32>
    %27 = tpu.matmul %24, %26, %cst_14 {dimension_numbers = #tpu.dot_dimension_numbers<[1], [0], [0], [1], [0, 0, 1, 1], [], []>} : vector<64x8xbf16>, vector<8x8xbf16>, vector<64x8xf32> -> vector<64x8xf32>
    %28 = arith.addf %22, %27 : vector<64x8xf32>
    %29 = vector.extract_strided_slice %3 {offsets = [1, 1, 0], sizes = [8, 8, 8], strides = [1, 1, 1]} : vector<10x10x8xbf16> to vector<8x8x8xbf16>
    %30 = vector.shape_cast %29 : vector<8x8x8xbf16> to vector<64x8xbf16>
    %c4 = arith.constant 4 : index
    %c0_15 = arith.constant 0 : index
    %c0_16 = arith.constant 0 : index
    %31 = vector.load %arg3[%c4, %c0_15, %c0_16] : memref<9x8x8xbf16, #tpu.memory_space<vmem>>, vector<1x8x8xbf16>
    %32 = vector.shape_cast %31 : vector<1x8x8xbf16> to vector<8x8xbf16>
    %cst_17 = arith.constant dense<0.000000e+00> : vector<64x8xf32>
    %33 = tpu.matmul %30, %32, %cst_17 {dimension_numbers = #tpu.dot_dimension_numbers<[1], [0], [0], [1], [0, 0, 1, 1], [], []>} : vector<64x8xbf16>, vector<8x8xbf16>, vector<64x8xf32> -> vector<64x8xf32>
    %34 = arith.addf %28, %33 : vector<64x8xf32>
    %35 = vector.extract_strided_slice %3 {offsets = [1, 2, 0], sizes = [8, 8, 8], strides = [1, 1, 1]} : vector<10x10x8xbf16> to vector<8x8x8xbf16>
    %36 = vector.shape_cast %35 : vector<8x8x8xbf16> to vector<64x8xbf16>
    %c5 = arith.constant 5 : index
    %c0_18 = arith.constant 0 : index
    %c0_19 = arith.constant 0 : index
    %37 = vector.load %arg3[%c5, %c0_18, %c0_19] : memref<9x8x8xbf16, #tpu.memory_space<vmem>>, vector<1x8x8xbf16>
    %38 = vector.shape_cast %37 : vector<1x8x8xbf16> to vector<8x8xbf16>
    %cst_20 = arith.constant dense<0.000000e+00> : vector<64x8xf32>
    %39 = tpu.matmul %36, %38, %cst_20 {dimension_numbers = #tpu.dot_dimension_numbers<[1], [0], [0], [1], [0, 0, 1, 1], [], []>} : vector<64x8xbf16>, vector<8x8xbf16>, vector<64x8xf32> -> vector<64x8xf32>
    %40 = arith.addf %34, %39 : vector<64x8xf32>
    %41 = vector.extract_strided_slice %3 {offsets = [2, 0, 0], sizes = [8, 8, 8], strides = [1, 1, 1]} : vector<10x10x8xbf16> to vector<8x8x8xbf16>
    %42 = vector.shape_cast %41 : vector<8x8x8xbf16> to vector<64x8xbf16>
    %c6 = arith.constant 6 : index
    %c0_21 = arith.constant 0 : index
    %c0_22 = arith.constant 0 : index
    %43 = vector.load %arg3[%c6, %c0_21, %c0_22] : memref<9x8x8xbf16, #tpu.memory_space<vmem>>, vector<1x8x8xbf16>
    %44 = vector.shape_cast %43 : vector<1x8x8xbf16> to vector<8x8xbf16>
    %cst_23 = arith.constant dense<0.000000e+00> : vector<64x8xf32>
    %45 = tpu.matmul %42, %44, %cst_23 {dimension_numbers = #tpu.dot_dimension_numbers<[1], [0], [0], [1], [0, 0, 1, 1], [], []>} : vector<64x8xbf16>, vector<8x8xbf16>, vector<64x8xf32> -> vector<64x8xf32>
    %46 = arith.addf %40, %45 : vector<64x8xf32>
    %47 = vector.extract_strided_slice %3 {offsets = [2, 1, 0], sizes = [8, 8, 8], strides = [1, 1, 1]} : vector<10x10x8xbf16> to vector<8x8x8xbf16>
    %48 = vector.shape_cast %47 : vector<8x8x8xbf16> to vector<64x8xbf16>
    %c7 = arith.constant 7 : index
    %c0_24 = arith.constant 0 : index
    %c0_25 = arith.constant 0 : index
    %49 = vector.load %arg3[%c7, %c0_24, %c0_25] : memref<9x8x8xbf16, #tpu.memory_space<vmem>>, vector<1x8x8xbf16>
    %50 = vector.shape_cast %49 : vector<1x8x8xbf16> to vector<8x8xbf16>
    %cst_26 = arith.constant dense<0.000000e+00> : vector<64x8xf32>
    %51 = tpu.matmul %48, %50, %cst_26 {dimension_numbers = #tpu.dot_dimension_numbers<[1], [0], [0], [1], [0, 0, 1, 1], [], []>} : vector<64x8xbf16>, vector<8x8xbf16>, vector<64x8xf32> -> vector<64x8xf32>
    %52 = arith.addf %46, %51 : vector<64x8xf32>
    %53 = vector.extract_strided_slice %3 {offsets = [2, 2, 0], sizes = [8, 8, 8], strides = [1, 1, 1]} : vector<10x10x8xbf16> to vector<8x8x8xbf16>
    %54 = vector.shape_cast %53 : vector<8x8x8xbf16> to vector<64x8xbf16>
    %c8 = arith.constant 8 : index
    %c0_27 = arith.constant 0 : index
    %c0_28 = arith.constant 0 : index
    %55 = vector.load %arg3[%c8, %c0_27, %c0_28] : memref<9x8x8xbf16, #tpu.memory_space<vmem>>, vector<1x8x8xbf16>
    %56 = vector.shape_cast %55 : vector<1x8x8xbf16> to vector<8x8xbf16>
    %cst_29 = arith.constant dense<0.000000e+00> : vector<64x8xf32>
    %57 = tpu.matmul %54, %56, %cst_29 {dimension_numbers = #tpu.dot_dimension_numbers<[1], [0], [0], [1], [0, 0, 1, 1], [], []>} : vector<64x8xbf16>, vector<8x8xbf16>, vector<64x8xf32> -> vector<64x8xf32>
    %58 = arith.addf %52, %57 : vector<64x8xf32>
    %59 = vector.shape_cast %58 : vector<64x8xf32> to vector<8x8x8xf32>
    %60 = arith.truncf %59 : vector<8x8x8xf32> to vector<8x8x8xbf16>
    %c0_30 = arith.constant 0 : index
    %c0_31 = arith.constant 0 : index
    %c0_32 = arith.constant 0 : index
    %c0_33 = arith.constant 0 : index
    %61 = vector.load %arg4[%c0_30, %c0_31, %c0_32, %c0_33] : memref<1x8x8x8xbf16, #tpu.memory_space<vmem>>, vector<1x8x8x8xbf16>
    %62 = vector.shape_cast %61 : vector<1x8x8x8xbf16> to vector<8x8x8xbf16>
    %63 = vector.shape_cast %60 : vector<8x8x8xbf16> to vector<1x8x8x8xbf16>
    tpu.vector_store %arg4[%c0_30, %c0_31, %c0_32, %c0_33], %63 {strides = array<i32>} : memref<1x8x8x8xbf16, #tpu.memory_space<vmem>>, vector<1x8x8x8xbf16>,
    return
  }
  func.func @transform_0(%arg0: i32, %arg1: i32) -> (i32, i32, i32, i32) {
    %c0_i32 = arith.constant 0 : i32
    %c0_i32_0 = arith.constant 0 : i32
    %c0_i32_1 = arith.constant 0 : i32
    %c0_i32_2 = arith.constant 0 : i32
    return %arg0, %c0_i32, %c0_i32_0, %c0_i32_1 : i32, i32, i32, i32
  }
  func.func @transform_1(%arg0: i32, %arg1: i32) -> (i32, i32, i32) {
    %c0_i32 = arith.constant 0 : i32
    %c0_i32_0 = arith.constant 0 : i32
    %c0_i32_1 = arith.constant 0 : i32
    %c0_i32_2 = arith.constant 0 : i32
    return %c0_i32, %c0_i32_0, %c0_i32_1 : i32, i32, i32
  }
  func.func @transform_2(%arg0: i32, %arg1: i32) -> (i32, i32, i32, i32) {
    %c0_i32 = arith.constant 0 : i32
    %c0_i32_0 = arith.constant 0 : i32
    %c0_i32_1 = arith.constant 0 : i32
    return %arg0, %arg1, %c0_i32, %c0_i32_0 : i32, i32, i32, i32
  }
}

module attributes {stable_mosaic.version = 11 : i64} {
  func.func @kernel(%arg0: i32, %arg1: memref<1x64x8xbf16, #tpu.memory_space<vmem>>, %arg2: memref<1x1x8xf32, #tpu.memory_space<vmem>>, %arg3: memref<1x8xf32, #tpu.memory_space<vmem>>, %arg4: memref<1x8xf32, #tpu.memory_space<vmem>>, %arg5: memref<1x64x8xf32, #tpu.memory_space<vmem>>) attributes {dimension_semantics = [#tpu.dimension_semantics<parallel>], iteration_bounds = array<i64: 2>, scalar_prefetch = 0 : i64, scratch_operands = 0 : i64, tpu.core_type = #tpu.core_type<tc>, window_params = [{transform_indices = @transform_0, window_bounds = array<i64: 1, 64, 8>}, {transform_indices = @transform_1, window_bounds = array<i64: 1, 1, 8>}, {pipeline_mode = #tpu.pipeline_mode<synchronous>, transform_indices = @transform_2, window_bounds = array<i64: 1, 8>}, {pipeline_mode = #tpu.pipeline_mode<synchronous>, transform_indices = @transform_3, window_bounds = array<i64: 1, 8>}, {transform_indices = @transform_4, window_bounds = array<i64: 1, 64, 8>}]} {
    %c0 = arith.constant 0 : index
    %c0_0 = arith.constant 0 : index
    %c0_1 = arith.constant 0 : index
    %0 = vector.load %arg1[%c0, %c0_0, %c0_1] : memref<1x64x8xbf16, #tpu.memory_space<vmem>>, vector<1x64x8xbf16>
    %1 = vector.shape_cast %0 : vector<1x64x8xbf16> to vector<64x8xbf16>
    %2 = arith.extf %1 : vector<64x8xbf16> to vector<64x8xf32>
    %3 = vector.shape_cast %2 : vector<64x8xf32> to vector<1x64x8xf32>
    %cst = arith.constant dense<0.000000e+00> : vector<1xf32>
    %4 = vector.multi_reduction <add>, %3, %cst [1, 2] : vector<1x64x8xf32> to vector<1xf32>
    %5 = vector.shape_cast %4 : vector<1xf32> to vector<1x1x1xf32>
    %6 = vector.extract %5[0, 0, 0] : f32 from vector<1x1x1xf32>
    %cst_2 = arith.constant 5.120000e+02 : f32
    %7 = arith.divf %6, %cst_2 : f32
    %8 = vector.broadcast %7 : f32 to vector<64x8xf32>
    %9 = arith.subf %2, %8 : vector<64x8xf32>
    %10 = arith.mulf %9, %9 : vector<64x8xf32>
    %11 = vector.shape_cast %10 : vector<64x8xf32> to vector<1x64x8xf32>
    %cst_3 = arith.constant dense<0.000000e+00> : vector<1xf32>
    %12 = vector.multi_reduction <add>, %11, %cst_3 [1, 2] : vector<1x64x8xf32> to vector<1xf32>
    %13 = vector.shape_cast %12 : vector<1xf32> to vector<1x1x1xf32>
    %14 = vector.extract %13[0, 0, 0] : f32 from vector<1x1x1xf32>
    %cst_4 = arith.constant 5.120000e+02 : f32
    %15 = arith.divf %14, %cst_4 : f32
    %cst_5 = arith.constant 9.99999974E-6 : f32
    %16 = arith.addf %15, %cst_5 : f32
    %17 = math.rsqrt %16 : f32
    %18 = vector.broadcast %17 : f32 to vector<64x8xf32>
    %19 = arith.mulf %9, %18 : vector<64x8xf32>
    %c0_6 = arith.constant 0 : index
    %c0_7 = arith.constant 0 : index
    %20 = vector.load %arg3[%c0_6, %c0_7] : memref<1x8xf32, #tpu.memory_space<vmem>>, vector<1x8xf32>
    %21 = vector.broadcast %20 : vector<1x8xf32> to vector<64x8xf32>
    %22 = arith.mulf %19, %21 : vector<64x8xf32>
    %c0_8 = arith.constant 0 : index
    %c0_9 = arith.constant 0 : index
    %23 = vector.load %arg4[%c0_8, %c0_9] : memref<1x8xf32, #tpu.memory_space<vmem>>, vector<1x8xf32>
    %24 = vector.broadcast %23 : vector<1x8xf32> to vector<64x8xf32>
    %25 = arith.addf %22, %24 : vector<64x8xf32>
    %c0_10 = arith.constant 0 : index
    %c0_11 = arith.constant 0 : index
    %c0_12 = arith.constant 0 : index
    %26 = vector.load %arg2[%c0_10, %c0_11, %c0_12] : memref<1x1x8xf32, #tpu.memory_space<vmem>>, vector<1x1x8xf32>
    %27 = vector.shape_cast %26 : vector<1x1x8xf32> to vector<1x8xf32>
    %28 = vector.broadcast %27 : vector<1x8xf32> to vector<64x8xf32>
    %29 = arith.addf %25, %28 : vector<64x8xf32>
    %c0_13 = arith.constant 0 : index
    %c0_14 = arith.constant 0 : index
    %c0_15 = arith.constant 0 : index
    %30 = vector.load %arg5[%c0_13, %c0_14, %c0_15] : memref<1x64x8xf32, #tpu.memory_space<vmem>>, vector<1x64x8xf32>
    %31 = vector.shape_cast %30 : vector<1x64x8xf32> to vector<64x8xf32>
    %32 = vector.shape_cast %29 : vector<64x8xf32> to vector<1x64x8xf32>
    tpu.vector_store %arg5[%c0_13, %c0_14, %c0_15], %32 {strides = array<i32>} : memref<1x64x8xf32, #tpu.memory_space<vmem>>, vector<1x64x8xf32>,
    return
  }
  func.func @transform_0(%arg0: i32) -> (i32, i32, i32) {
    %c0_i32 = arith.constant 0 : i32
    %c0_i32_0 = arith.constant 0 : i32
    %c0_i32_1 = arith.constant 0 : i32
    return %arg0, %c0_i32, %c0_i32_0 : i32, i32, i32
  }
  func.func @transform_1(%arg0: i32) -> (i32, i32, i32) {
    %c0_i32 = arith.constant 0 : i32
    %c0_i32_0 = arith.constant 0 : i32
    %c0_i32_1 = arith.constant 0 : i32
    return %arg0, %c0_i32, %c0_i32_0 : i32, i32, i32
  }
  func.func @transform_2(%arg0: i32) -> (i32, i32) {
    %c0_i32 = arith.constant 0 : i32
    %c0_i32_0 = arith.constant 0 : i32
    %c0_i32_1 = arith.constant 0 : i32
    return %c0_i32, %c0_i32_0 : i32, i32
  }
  func.func @transform_3(%arg0: i32) -> (i32, i32) {
    %c0_i32 = arith.constant 0 : i32
    %c0_i32_0 = arith.constant 0 : i32
    %c0_i32_1 = arith.constant 0 : i32
    return %c0_i32, %c0_i32_0 : i32, i32
  }
  func.func @transform_4(%arg0: i32) -> (i32, i32, i32) {
    %c0_i32 = arith.constant 0 : i32
    %c0_i32_0 = arith.constant 0 : i32
    %c0_i32_1 = arith.constant 0 : i32
    return %arg0, %c0_i32, %c0_i32_0 : i32, i32, i32
  }
}

</mosaic_0001>

<bundles_post_ra>
// kernel: down_forward.11
= control target key start
LH: loop header
LB: loop body
LE: loop exit
PB: predicated region body
PF: predicated region fallthrough
CT: control target
= control target key end

     0   :  { %s850_s15 = smov 0   ;;  %s1090_s0 = inlined_call_operand.vmem [shape: bf16[2,64,4], index: 0, kind: input, shape index: {}]   ;;  %s1091_s1 = inlined_call_operand.vmem [shape: bf16[2,64,4], index: 1, kind: input, shape index: {}]   ;;  %s1092_s2 = inlined_call_operand.vmem [shape: f32[1,4], index: 2, kind: input, shape index: {}]   ;;  %s1093_s3 = inlined_call_operand.vmem [shape: f32[1,4], index: 3, kind: input, shape index: {}]   ;;  %s1094_s4 = inlined_call_operand.vmem [shape: bf16[2,64,4], index: 4, kind: output, shape index: {}]  }
   0x1 LB: > { %s697_s16 = sadd.s32 4294967295, %s823_s15   ;;  %p701_p0 = scmp.ge.s32.totalorder %s823_s15, 1  ;;  %s823_s15 = sphi %s850_s15, %s14_s15  }
   0x2   : > { %p172_p1 = scmp.lt.s32.totalorder %s823_s15, 3 }
   0x4   : > { %p173_p2 = pnand %p701_p0, %p172_p1 }
   0x5   : > { %p203_p3 = scmp.lt.s32.totalorder (!%p173_p2), %s697_s16, 1  ;;  %vm234_vm0 = vcmask (!%p173_p2), 31744   ;;  %vm621_vm9 = vcmask (!%p173_p2), 27648  }
   0x6   : > { %176 = sbr.rel (%p173_p2) target bundleno = 599 (0x257), region = 36 }
   0xd   : > { %s1096_s16 = smov (!%p203_p3, %s697_s16), 1 }
   0xe   : > { %s858_s17 = sshll.u32 %s1096_s16, 5 }
   0xf   : > { %s207_s20 = scalar_lea.vmem %s1090_s0, %s858_s17  ;;  %s212_s28 = scalar_lea.vmem %s1091_s1, %s858_s17 }
  0x10   : > { %v732_v0 = vld [vmem:[%s207_s20] sm:$0xff]   ;;  %v763_v1 = vld [vmem:[%s207_s20 + $0x8] sm:$0xff]   ;;  %v764_v2 = vld [vmem:[%s207_s20 + $0x10] sm:$0xff]   ;;  %s217_s10 = scalar_lea.vmem %s1094_s4, %s858_s17 }
  0x11   : > { %v733_v3 = vunpack.c.l.bf16 %v732_v0  ;;  %v734_v4 = vunpack.c.h.bf16 %v732_v0  ;;  %v737_v5 = vunpack.c.l.bf16 %v763_v1  ;;  %v738_v6 = vunpack.c.h.bf16 %v763_v1  ;;  %v765_v11 = vld [vmem:[%s207_s20 + $0x18] sm:$0xff]  }
  0x12   : > { %v741_v7 = vunpack.c.l.bf16 %v764_v2  ;;  %v742_v13 = vunpack.c.h.bf16 %v764_v2  ;;  %v745_v16 = vunpack.c.l.bf16 %v765_v11  ;;  %v746_v19 = vunpack.c.h.bf16 %v765_v11  ;;  %v748_v11 = vld [vmem:[%s212_s28] sm:$0xff]  }
  0x13   : > { %v235_v8 = vsel %vm234_vm0, %v733_v3, 0.0  ;;  %v236_v9 = vsel %vm234_vm0, %v734_v4, 0.0  ;;  %v238_v10 = vsel %vm234_vm0, %v737_v5, 0.0  ;;  %v240_v14 = vsel %vm234_vm0, %v738_v6, 0.0 }
  0x14   : > { %v237_v12 = vadd.f32 %v236_v9, %v235_v8  ;;  %v242_v17 = vsel %vm234_vm0, %v741_v7, 0.0  ;;  %v244_v20 = vsel %vm234_vm0, %v742_v13, 0.0  ;;  %v246_v22 = vsel %vm234_vm0, %v745_v16, 0.0 }
  0x15   : > { %v248_v24 = vsel %vm234_vm0, %v746_v19, 0.0 }
  0x16   : > { %v239_v15 = vadd.f32 %v238_v10, %v237_v12  ;;  %v766_v12 = vld [vmem:[%s212_s28 + $0x8] sm:$0xff]  }
  0x18   : > { %v241_v18 = vadd.f32 %v240_v14, %v239_v15  ;;  %v768_v14 = vld [vmem:[%s212_s28 + $0x18] sm:$0xff]   ;;  %v749_v15 = vunpack.c.l.bf16 %v748_v11 }
  0x1a   : > { %v243_v21 = vadd.f32 %v242_v17, %v241_v18  ;;  %v753_v17 = vunpack.c.l.bf16 %v766_v12  ;;  %v754_v18 = vunpack.c.h.bf16 %v766_v12 }
  0x1c   : > { %v245_v23 = vadd.f32 %v244_v20, %v243_v21  ;;  %v761_v21 = vunpack.c.l.bf16 %v768_v14 }
  0x1e   : > { %v247_v25 = vadd.f32 %v246_v22, %v245_v23  ;;  %v762_v22 = vunpack.c.h.bf16 %v768_v14 }
  0x20   : > { %v249_v26 = vadd.f32 %v248_v24, %v247_v25  ;;  %v708_v24 = vld [vmem:[%s1092_s2] ss:$0 sm:$0xff] }
  0x22   : > { %250 = vadd.xlane.f32.xlu0 %v249_v26 }
  0xaf   : > { %v251_v27 = vpop.xlane.xlu0 %250 }
  0xb0   : > { %v252_v28 = vrot.slane %v251_v27, 4 }
  0xb2   : > { %v253_v29 = vadd.f32 %v252_v28, %v251_v27 }
  0xb4   : > { %v254_v30 = vrot.slane %v253_v29, 2 }
  0xb6   : > { %v255_v31 = vadd.f32 %v254_v30, %v253_v29 }
  0xb8   : > { %v256_v32 = vrot.slane %v255_v31, 1 }
  0xba   : > { %v257_v33 = vadd.f32 %v256_v32, %v255_v31 }
  0xbc   : > { %769 = vpush %v257_v33  ;;  %v709_v33 = vld [vmem:[%s1093_s3] ss:$0 sm:$0xff] }
  0xed   : > { %s770_s21 = spop %769 }
  0xee   : > { %s261_s22 = smul.f32 0.00390625, %s770_s21 }
  0xf0   : > { %v262_v34 = vstv %s261_s22 }
  0xf1   : > { %v872_v35 = vsub.f32 %v733_v3, %v262_v34  ;;  %v874_v36 = vsub.f32 %v734_v4, %v262_v34  ;;  %v876_v37 = vsub.f32 %v737_v5, %v262_v34  ;;  %v878_v38 = vsub.f32 %v738_v6, %v262_v34 }
  0xf2   : > { %v880_v39 = vsub.f32 %v741_v7, %v262_v34  ;;  %v268_v43 = vsub.f32 %v742_v13, %v262_v34  ;;  %v269_v48 = vsub.f32 %v745_v16, %v262_v34  ;;  %v270_v52 = vsub.f32 %v746_v19, %v262_v34  ;;  %v767_v13 = vld [vmem:[%s212_s28 + $0x10] sm:$0xff]  }
  0xf3   : > { %v271_v40 = vmul.f32 %v872_v35, %v872_v35  ;;  %v272_v41 = vmul.f32 %v874_v36, %v874_v36  ;;  %v273_v42 = vmul.f32 %v876_v37, %v876_v37  ;;  %v274_v44 = vmul.f32 %v878_v38, %v878_v38 }
  0xf4   : > { %v275_v49 = vmul.f32 %v880_v39, %v880_v39  ;;  %v276_v53 = vmul.f32 %v268_v43, %v268_v43  ;;  %v277_v56 = vmul.f32 %v269_v48, %v269_v48  ;;  %v278_v59 = vmul.f32 %v270_v52, %v270_v52 }
  0xf5   : > { %v279_v45 = vsel %vm234_vm0, %v271_v40, 0.0  ;;  %v280_v46 = vsel %vm234_vm0, %v272_v41, 0.0  ;;  %v282_v50 = vsel %vm234_vm0, %v273_v42, 0.0  ;;  %v284_v54 = vsel %vm234_vm0, %v274_v44, 0.0 }
  0xf6   : > { %v281_v47 = vadd.f32 %v280_v46, %v279_v45  ;;  %v286_v57 = vsel %vm234_vm0, %v275_v49, 0.0  ;;  %v288_v60 = vsel %vm234_vm0, %v276_v53, 0.0  ;;  %v290_v62 = vsel %vm234_vm0, %v277_v56, 0.0 }
  0xf7   : > { %v292_v0 = vsel %vm234_vm0, %v278_v59, 0.0  ;;  %v750_v16 = vunpack.c.h.bf16 %v748_v11  ;;  %v757_v19 = vunpack.c.l.bf16 %v767_v13  ;;  %v758_v20 = vunpack.c.h.bf16 %v767_v13 }
  0xf8   : > { %v283_v51 = vadd.f32 %v282_v50, %v281_v47 }
  0xfa   : > { %v285_v55 = vadd.f32 %v284_v54, %v283_v51 }
  0xfc   : > { %v287_v58 = vadd.f32 %v286_v57, %v285_v55 }
  0xfe   : > { %v289_v61 = vadd.f32 %v288_v60, %v287_v58 }
 0x100   : > { %v291_v63 = vadd.f32 %v290_v62, %v289_v61 }
 0x102   : > { %v293_v1 = vadd.f32 %v292_v0, %v291_v63 }
 0x104   : > { %294 = vadd.xlane.f32.xlu0 %v293_v1 }
 0x191   : > { %v295_v2 = vpop.xlane.xlu0 %294 }
 0x192   : > { %v296_v3 = vrot.slane %v295_v2, 4 }
 0x194   : > { %v297_v4 = vadd.f32 %v296_v3, %v295_v2 }
 0x196   : > { %v298_v5 = vrot.slane %v297_v4, 2 }
 0x198   : > { %v299_v6 = vadd.f32 %v298_v5, %v297_v4 }
 0x19a   : > { %v300_v7 = vrot.slane %v299_v6, 1 }
 0x19c   : > { %v301_v8 = vadd.f32 %v300_v7, %v299_v6 }
 0x19e   : > { %771 = vpush %v301_v8 }
 0x1cf   : > { %s772_s23 = spop %771 }
 0x1d0   : > { %s305_s24 = smul.f32 0.00390625, %s772_s23 }
 0x1d2   : > { %s306_s25 = sadd.f32 1e-05, %s305_s24 }
 0x1d4   : > { %v307_v9 = vstv %s306_s25 }
 0x1d5   : > { %783 = vrsqrt.f32 %v307_v9 }
 0x1df   : > { %v784_v10 = vpop.eup %783 }
 0x1e0   : > { %773 = vpush %v784_v10 }
 0x211   : > { %s774_s29 = spop %773 }
 0x212   : > { %v310_v23 = vstv %s774_s29 }
 0x213   : > { %v311_v25 = vmul.f32 %v310_v23, %v872_v35  ;;  %v312_v26 = vmul.f32 %v310_v23, %v874_v36  ;;  %v313_v27 = vmul.f32 %v310_v23, %v876_v37  ;;  %v314_v28 = vmul.f32 %v310_v23, %v878_v38 }
 0x214   : > { %v315_v29 = vmul.f32 %v310_v23, %v880_v39  ;;  %v316_v30 = vmul.f32 %v310_v23, %v268_v43  ;;  %v317_v31 = vmul.f32 %v310_v23, %v269_v48  ;;  %v318_v32 = vmul.f32 %v310_v23, %v270_v52 }
 0x215   : > { %v326_v34 = vmul.f32 %v708_v24, %v311_v25  ;;  %v327_v40 = vmul.f32 %v708_v24, %v312_v26  ;;  %v328_v41 = vmul.f32 %v708_v24, %v313_v27  ;;  %v329_v42 = vmul.f32 %v708_v24, %v314_v28 }
 0x216   : > { %v330_v35 = vmul.f32 %v708_v24, %v315_v29  ;;  %v331_v44 = vmul.f32 %v708_v24, %v316_v30  ;;  %v332_v36 = vmul.f32 %v708_v24, %v317_v31  ;;  %v333_v45 = vmul.f32 %v708_v24, %v318_v32 }
 0x217   : > { %v341_v37 = vadd.f32 %v709_v33, %v326_v34  ;;  %v342_v46 = vadd.f32 %v709_v33, %v327_v40  ;;  %v343_v38 = vadd.f32 %v709_v33, %v328_v41  ;;  %v344_v47 = vadd.f32 %v709_v33, %v329_v42 }
 0x218   : > { %v345_v39 = vadd.f32 %v709_v33, %v330_v35  ;;  %v346_v43 = vadd.f32 %v709_v33, %v331_v44  ;;  %v347_v48 = vadd.f32 %v709_v33, %v332_v36  ;;  %v348_v49 = vadd.f32 %v709_v33, %v333_v45 }
 0x219   : > { %v915_v50 = vadd.f32 %v749_v15, %v341_v37  ;;  %v917_v51 = vadd.f32 %v750_v16, %v342_v46  ;;  %v919_v52 = vadd.f32 %v753_v17, %v343_v38  ;;  %v921_v53 = vadd.f32 %v754_v18, %v344_v47 }
 0x21a   : > { %v923_v54 = vadd.f32 %v757_v19, %v345_v39  ;;  %v925_v55 = vadd.f32 %v758_v20, %v346_v43  ;;  %v927_v56 = vadd.f32 %v761_v21, %v347_v48  ;;  %v929_v57 = vadd.f32 %v762_v22, %v348_v49 }
 0x21b   : > { %v932_v58 = vmul.f32 0.70710677, %v915_v50  ;;  %v935_v59 = vmul.f32 0.70710677, %v917_v51  ;;  %v938_v60 = vmul.f32 0.70710677, %v919_v52 }
 0x21c   : > { %v941_v61 = vmul.f32 0.70710677, %v921_v53  ;;  %v944_v62 = vmul.f32 0.70710677, %v923_v54  ;;  %v947_v63 = vmul.f32 0.70710677, %v925_v55 }
 0x21d   : > { %v950_v0 = vmul.f32 0.70710677, %v927_v56  ;;  %v953_v1 = vmul.f32 0.70710677, %v929_v57  ;;  %v389_v2 = vand.u32 2147483647, %v932_v58 }
 0x21e   : > { %v390_v3 = vand.u32 2147483647, %v935_v59  ;;  %v391_v4 = vand.u32 2147483647, %v938_v60  ;;  %v392_v5 = vand.u32 2147483647, %v941_v61 }
 0x21f   : > { %v393_v6 = vand.u32 2147483647, %v944_v62  ;;  %v394_v7 = vand.u32 2147483647, %v947_v63  ;;  %v395_v8 = vand.u32 2147483647, %v950_v0 }
 0x220   : > { %v396_v9 = vand.u32 2147483647, %v953_v1  ;;  %v397_v10 = vmul.f32 0.3275911, %v389_v2  ;;  %v398_v11 = vmul.f32 0.3275911, %v390_v3 }
 0x221   : > { %v399_v12 = vmul.f32 0.3275911, %v391_v4  ;;  %v400_v13 = vmul.f32 0.3275911, %v392_v5  ;;  %v401_v14 = vmul.f32 0.3275911, %v393_v6 }
 0x222   : > { %v402_v15 = vmul.f32 0.3275911, %v394_v7  ;;  %v403_v16 = vmul.f32 0.3275911, %v395_v8  ;;  %v404_v17 = vmul.f32 0.3275911, %v396_v9 }
 0x223   : > { %v405_v18 = vadd.f32 1.0, %v397_v10  ;;  %v406_v19 = vadd.f32 1.0, %v398_v11  ;;  %v407_v20 = vadd.f32 1.0, %v399_v12  ;;  %v408_v21 = vadd.f32 1.0, %v400_v13 }
 0x224   : > { %v409_v22 = vadd.f32 1.0, %v401_v14  ;;  %v410_v23 = vadd.f32 1.0, %v402_v15  ;;  %v501_v24 = vsub.f32 0.0, %v389_v2  ;;  %v502_v25 = vsub.f32 0.0, %v390_v3 }
 0x225   : > { %785 = vrcp.f32 %v405_v18  ;;  %v503_v26 = vsub.f32 0.0, %v391_v4  ;;  %v411_v27 = vadd.f32 1.0, %v403_v16  ;;  %v504_v28 = vsub.f32 0.0, %v392_v5 }
 0x226   : > { %787 = vrcp.f32 %v406_v19  ;;  %v505_v29 = vsub.f32 0.0, %v393_v6  ;;  %v412_v30 = vadd.f32 1.0, %v404_v17  ;;  %v506_v31 = vsub.f32 0.0, %v394_v7 }
 0x227   : > { %789 = vrcp.f32 %v407_v20  ;;  %v509_v32 = vmul.f32 %v501_v24, %v389_v2  ;;  %v507_v33 = vsub.f32 0.0, %v395_v8  ;;  %v510_v34 = vmul.f32 %v502_v25, %v390_v3 }
 0x228   : > { %791 = vrcp.f32 %v408_v21  ;;  %v511_v40 = vmul.f32 %v503_v26, %v391_v4  ;;  %v508_v41 = vsub.f32 0.0, %v396_v9  ;;  %v512_v42 = vmul.f32 %v504_v28, %v392_v5 }
 0x229   : > { %793 = vrcp.f32 %v409_v22  ;;  %v513_v35 = vmul.f32 %v505_v29, %v393_v6  ;;  %v517_v44 = vmul.f32 1.442695, %v509_v32  ;;  %v514_v36 = vmul.f32 %v506_v31, %v394_v7 }
 0x22a   : > { %795 = vrcp.f32 %v410_v23  ;;  %v519_v45 = vmul.f32 1.442695, %v510_v34  ;;  %v515_v37 = vmul.f32 %v507_v33, %v395_v8  ;;  %v521_v46 = vmul.f32 1.442695, %v511_v40 }
 0x22b   : > { %797 = vrcp.f32 %v411_v27  ;;  %v516_v38 = vmul.f32 %v508_v41, %v396_v9  ;;  %v523_v47 = vmul.f32 1.442695, %v512_v42  ;;  %v964_v39 = vmul.f32 0.5, %v915_v50 }
 0x22c   : > { %799 = vrcp.f32 %v412_v30  ;;  %v967_v43 = vmul.f32 0.5, %v917_v51  ;;  %v525_v48 = vmul.f32 1.442695, %v513_v35  ;;  %v972_v2 = vmul.f32 0.5, %v919_v52 }
 0x22d   : > { %801 = vpow2.f32 %v517_v44  ;;  %v975_v3 = vmul.f32 0.5, %v921_v53  ;;  %v527_v4 = vmul.f32 1.442695, %v514_v36  ;;  %v980_v50 = vmul.f32 0.5, %v923_v54 }
 0x22e   : > { %803 = vpow2.f32 %v519_v45  ;;  %v529_v6 = vmul.f32 1.442695, %v515_v37  ;;  %v986_v8 = vmul.f32 0.5, %v925_v55  ;;  %v531_v53 = vmul.f32 1.442695, %v516_v38 }
 0x22f   : > { %v969_v49 = vpop.eup %785  ;;  %805 = vpow2.f32 %v521_v46  ;;  %v992_v10 = vmul.f32 0.5, %v927_v56  ;;  %v998_v13 = vmul.f32 0.5, %v929_v57  ;;  %vm549_vm1 = vcmp.ge.f32.partialorder %v932_v58, 0.0 }
 0x230   : > { %v977_v5 = vpop.eup %787  ;;  %v429_v51 = vmul.f32 1.0614054, %v969_v49  ;;  %807 = vpow2.f32 %v523_v47  ;;  %vm550_vm2 = vcmp.ge.f32.partialorder %v935_v59, 0.0  ;;  %vm551_vm3 = vcmp.ge.f32.partialorder %v938_v60, 0.0 }
 0x231   : > { %v983_v7 = vpop.eup %789  ;;  %v430_v52 = vmul.f32 1.0614054, %v977_v5  ;;  %809 = vpow2.f32 %v525_v48  ;;  %vm552_vm4 = vcmp.ge.f32.partialorder %v941_v61, 0.0  ;;  %vm553_vm5 = vcmp.ge.f32.partialorder %v944_v62, 0.0 }
 0x232   : > { %v989_v9 = vpop.eup %791  ;;  %v431_v54 = vmul.f32 1.0614054, %v983_v7  ;;  %v437_v11 = vadd.f32 -1.4531521, %v429_v51  ;;  %811 = vpow2.f32 %v527_v4  ;;  %vm554_vm6 = vcmp.ge.f32.partialorder %v947_v63, 0.0 }
 0x233   : > { %v995_v12 = vpop.eup %793  ;;  %v432_v55 = vmul.f32 1.0614054, %v989_v9  ;;  %v438_v14 = vadd.f32 -1.4531521, %v430_v52  ;;  %813 = vpow2.f32 %v529_v6  ;;  %vm555_vm7 = vcmp.ge.f32.partialorder %v950_v0, 0.0 }
 0x234   : > { %v1001_v15 = vpop.eup %795  ;;  %v433_v16 = vmul.f32 1.0614054, %v995_v12  ;;  %v439_v17 = vadd.f32 -1.4531521, %v431_v54  ;;  %v445_v56 = vmul.f32 %v969_v49, %v437_v11  ;;  %815 = vpow2.f32 %v531_v53 }
 0x235   : > { %v1005_v18 = vpop.eup %797  ;;  %v434_v19 = vmul.f32 1.0614054, %v1001_v15  ;;  %v440_v20 = vadd.f32 -1.4531521, %v432_v55  ;;  %v446_v57 = vmul.f32 %v977_v5, %v438_v14  ;;  %vm556_vm8 = vcmp.ge.f32.partialorder %v953_v1, 0.0 }
 0x236   : > { %v1009_v21 = vpop.eup %799  ;;  %v435_v22 = vmul.f32 1.0614054, %v1005_v18  ;;  %v441_v23 = vadd.f32 -1.4531521, %v433_v16  ;;  %v447_v24 = vmul.f32 %v983_v7, %v439_v17  ;;  %v453_v25 = vadd.f32 1.4214138, %v445_v56 }
 0x237   : > { %v436_v26 = vmul.f32 1.0614054, %v1009_v21  ;;  %v442_v27 = vadd.f32 -1.4531521, %v434_v19  ;;  %v448_v28 = vmul.f32 %v989_v9, %v440_v20  ;;  %v454_v29 = vadd.f32 1.4214138, %v446_v57  ;;  %v802_v30 = vpop.eup %801 }
 0x238   : > { %v443_v31 = vadd.f32 -1.4531521, %v435_v22  ;;  %v449_v32 = vmul.f32 %v995_v12, %v441_v23  ;;  %v455_v33 = vadd.f32 1.4214138, %v447_v24  ;;  %v461_v34 = vmul.f32 %v969_v49, %v453_v25  ;;  %v804_v40 = vpop.eup %803 }
 0x239   : > { %v444_v41 = vadd.f32 -1.4531521, %v436_v26  ;;  %v450_v42 = vmul.f32 %v1001_v15, %v442_v27  ;;  %v456_v35 = vadd.f32 1.4214138, %v448_v28  ;;  %v462_v44 = vmul.f32 %v977_v5, %v454_v29  ;;  %v806_v36 = vpop.eup %805 }
 0x23a   : > { %v451_v45 = vmul.f32 %v1005_v18, %v443_v31  ;;  %v457_v37 = vadd.f32 1.4214138, %v449_v32  ;;  %v463_v46 = vmul.f32 %v983_v7, %v455_v33  ;;  %v469_v38 = vadd.f32 -0.28449672, %v461_v34  ;;  %v808_v47 = vpop.eup %807 }
 0x23b   : > { %v452_v48 = vmul.f32 %v1009_v21, %v444_v41  ;;  %v458_v4 = vadd.f32 1.4214138, %v450_v42  ;;  %v464_v51 = vmul.f32 %v989_v9, %v456_v35  ;;  %v470_v6 = vadd.f32 -0.28449672, %v462_v44  ;;  %v810_v52 = vpop.eup %809 }
 0x23c   : > { %v459_v53 = vadd.f32 1.4214138, %v451_v45  ;;  %v465_v54 = vmul.f32 %v995_v12, %v457_v37  ;;  %v471_v11 = vadd.f32 -0.28449672, %v463_v46  ;;  %v477_v55 = vmul.f32 %v969_v49, %v469_v38  ;;  %v812_v14 = vpop.eup %811 }
 0x23d   : > { %v460_v16 = vadd.f32 1.4214138, %v452_v48  ;;  %v466_v17 = vmul.f32 %v1001_v15, %v458_v4  ;;  %v472_v56 = vadd.f32 -0.28449672, %v464_v51  ;;  %v478_v19 = vmul.f32 %v977_v5, %v470_v6  ;;  %v814_v20 = vpop.eup %813 }
 0x23e   : > { %v467_v57 = vmul.f32 %v1005_v18, %v459_v53  ;;  %v473_v22 = vadd.f32 -0.28449672, %v465_v54  ;;  %v479_v23 = vmul.f32 %v983_v7, %v471_v11  ;;  %v485_v24 = vadd.f32 0.2548296, %v477_v55  ;;  %v816_v25 = vpop.eup %815 }
 0x23f   : > { %v468_v26 = vmul.f32 %v1009_v21, %v460_v16  ;;  %v474_v27 = vadd.f32 -0.28449672, %v466_v17  ;;  %v480_v28 = vmul.f32 %v989_v9, %v472_v56  ;;  %v486_v29 = vadd.f32 0.2548296, %v478_v19 }
 0x240   : > { %v475_v31 = vadd.f32 -0.28449672, %v467_v57  ;;  %v481_v32 = vmul.f32 %v995_v12, %v473_v22  ;;  %v487_v33 = vadd.f32 0.2548296, %v479_v23  ;;  %v493_v34 = vmul.f32 %v969_v49, %v485_v24 }
 0x241   : > { %v476_v41 = vadd.f32 -0.28449672, %v468_v26  ;;  %v482_v42 = vmul.f32 %v1001_v15, %v474_v27  ;;  %v488_v35 = vadd.f32 0.2548296, %v480_v28  ;;  %v494_v44 = vmul.f32 %v977_v5, %v486_v29 }
 0x242   : > { %v483_v45 = vmul.f32 %v1005_v18, %v475_v31  ;;  %v489_v37 = vadd.f32 0.2548296, %v481_v32  ;;  %v495_v46 = vmul.f32 %v983_v7, %v487_v33  ;;  %v533_v38 = vmul.f32 %v802_v30, %v493_v34 }
 0x243   : > { %v484_v49 = vmul.f32 %v1009_v21, %v476_v41  ;;  %v490_v48 = vadd.f32 0.2548296, %v482_v42  ;;  %v496_v4 = vmul.f32 %v989_v9, %v488_v35  ;;  %v534_v51 = vmul.f32 %v804_v40, %v494_v44 }
 0x244   : > { %v491_v6 = vadd.f32 0.2548296, %v483_v45  ;;  %v497_v5 = vmul.f32 %v995_v12, %v489_v37  ;;  %v535_v53 = vmul.f32 %v806_v36, %v495_v46  ;;  %v541_v54 = vsub.f32 1.0, %v533_v38 }
 0x245   : > { %v492_v11 = vadd.f32 0.2548296, %v484_v49  ;;  %v498_v7 = vmul.f32 %v1001_v15, %v490_v48  ;;  %v536_v30 = vmul.f32 %v808_v47, %v496_v4  ;;  %v542_v55 = vsub.f32 1.0, %v534_v51 }
 0x246   : > { %v499_v16 = vmul.f32 %v1005_v18, %v491_v6  ;;  %v537_v9 = vmul.f32 %v810_v52, %v497_v5  ;;  %v543_v40 = vsub.f32 1.0, %v535_v53  ;;  %v557_v17 = vsub.f32 0.0, %v541_v54 }
 0x247   : > { %v500_v12 = vmul.f32 %v1009_v21, %v492_v11  ;;  %v538_v36 = vmul.f32 %v812_v14, %v498_v7  ;;  %v544_v56 = vsub.f32 1.0, %v536_v30  ;;  %v558_v19 = vsub.f32 0.0, %v542_v55 }
 0x248   : > { %v539_v57 = vmul.f32 %v814_v20, %v499_v16  ;;  %v545_v22 = vsub.f32 1.0, %v537_v9  ;;  %v559_v15 = vsub.f32 0.0, %v543_v40  ;;  %v565_v47 = vsel %vm549_vm1, %v541_v54, %v557_v17 }
 0x249   : > { %v540_v23 = vmul.f32 %v816_v25, %v500_v12  ;;  %v546_v24 = vsub.f32 1.0, %v538_v36  ;;  %v560_v18 = vsub.f32 0.0, %v544_v56  ;;  %v566_v52 = vsel %vm550_vm2, %v542_v55, %v558_v19 }
 0x24a   : > { %v547_v26 = vsub.f32 1.0, %v539_v57  ;;  %v561_v27 = vsub.f32 0.0, %v545_v22  ;;  %v567_v21 = vsel %vm551_vm3, %v543_v40, %v559_v15  ;;  %v573_v14 = vadd.f32 1.0, %v565_v47 }
 0x24b   : > { %v548_v28 = vsub.f32 1.0, %v540_v23  ;;  %v562_v20 = vsub.f32 0.0, %v546_v24  ;;  %v568_v29 = vsel %vm552_vm4, %v544_v56, %v560_v18  ;;  %v574_v58 = vadd.f32 1.0, %v566_v52 }
 0x24c   : > { %v563_v31 = vsub.f32 0.0, %v547_v26  ;;  %v569_v25 = vsel %vm553_vm5, %v545_v22, %v561_v27  ;;  %v575_v32 = vadd.f32 1.0, %v567_v21  ;;  %v576_v59 = vadd.f32 1.0, %v568_v29 }
 0x24d   : > { %v564_v33 = vsub.f32 0.0, %v548_v28  ;;  %v570_v34 = vsel %vm554_vm6, %v546_v24, %v562_v20  ;;  %v577_v60 = vadd.f32 1.0, %v569_v25  ;;  %v581_v41 = vmul.f32 %v573_v14, %v964_v39 }
 0x24e   : > { %v571_v42 = vsel %vm555_vm7, %v547_v26, %v563_v31  ;;  %v578_v35 = vadd.f32 1.0, %v570_v34  ;;  %v582_v61 = vmul.f32 %v574_v58, %v967_v43  ;;  %v583_v44 = vmul.f32 %v575_v32, %v972_v2 }
 0x24f   : > { %v572_v62 = vsel %vm556_vm8, %v548_v28, %v564_v33  ;;  %v579_v63 = vadd.f32 1.0, %v571_v42  ;;  %v584_v45 = vmul.f32 %v576_v59, %v975_v3  ;;  %v585_v39 = vmul.f32 %v577_v60, %v980_v50 }
 0x250   : > { %v580_v37 = vadd.f32 1.0, %v572_v62  ;;  %v586_v0 = vmul.f32 %v578_v35, %v986_v8  ;;  %v723_v46 = vpack.c.bf16 %v581_v41, %v581_v41  ;;  %v724_v38 = vpack.c.bf16 %v582_v61, %v582_v61 }
 0x251   : > { %v587_v43 = vmul.f32 %v579_v63, %v992_v10  ;;  %v725_v2 = vpack.c.bf16 %v583_v44, %v583_v44  ;;  %v726_v49 = vpack.c.bf16 %v584_v45, %v584_v45  ;;  %v727_v48 = vpack.c.bf16 %v585_v39, %v585_v39 }
 0x252   : > { %v588_v4 = vmul.f32 %v580_v37, %v998_v13  ;;  %v728_v51 = vpack.c.bf16 %v586_v0, %v586_v0  ;;  %622 = vst.msk [vmem:[%s217_s10] sm:$0xf] %vm621_vm9, %v723_v46  ;;  %623 = vst.msk [vmem:[%s217_s10 + $0x4] sm:$0xf] %vm621_vm9, %v724_v38 }
 0x253   : > { %v729_v1 = vpack.c.bf16 %v587_v43, %v587_v43  ;;  %624 = vst.msk [vmem:[%s217_s10 + $0x8] sm:$0xf] %vm621_vm9, %v725_v2  ;;  %625 = vst.msk [vmem:[%s217_s10 + $0xc] sm:$0xf] %vm621_vm9, %v726_v49 }
 0x254   : > { %626 = vst.msk [vmem:[%s217_s10 + $0x10] sm:$0xf] %vm621_vm9, %v727_v48  ;;  %v730_v3 = vpack.c.bf16 %v588_v4, %v588_v4  ;;  %627 = vst.msk [vmem:[%s217_s10 + $0x14] sm:$0xf] %vm621_vm9, %v728_v51 }
 0x255   : > { %628 = vst.msk [vmem:[%s217_s10 + $0x18] sm:$0xf] %vm621_vm9, %v729_v1 }
 0x256   : > { %629 = vst.msk [vmem:[%s217_s10 + $0x1c] sm:$0xf] %vm621_vm9, %v730_v3 }
 0x257 PF: > { %s14_s15 = sadd.s32 1, %s823_s15  }
 0x258   : > { %p11_p4 = scmp.ge.s32.totalorder %s14_s15, 4  }
 0x25a   :  { %13 = sbr.rel (!%p11_p4) target bundleno = 1 (0x1), region = 69 }

// kernel: down_forward.9
= control target key start
LH: loop header
LB: loop body
LE: loop exit
PB: predicated region body
PF: predicated region fallthrough
CT: control target
= control target key end

     0   :  { %s740_s12 = smov 0   ;;  %s954_s0 = inlined_call_operand.vmem [shape: bf16[2,64,4], index: 0, kind: input, shape index: {}]   ;;  %s955_s1 = inlined_call_operand.vmem [shape: f32[1,4], index: 1, kind: input, shape index: {}]   ;;  %s956_s2 = inlined_call_operand.vmem [shape: f32[1,4], index: 2, kind: input, shape index: {}]   ;;  %s957_s3 = inlined_call_operand.vmem [shape: bf16[2,64,4], index: 3, kind: output, shape index: {}]  }
   0x1 LB: > { %s614_s13 = sadd.s32 4294967295, %s718_s12   ;;  %p618_p0 = scmp.ge.s32.totalorder %s718_s12, 1  ;;  %s718_s12 = sphi %s740_s12, %s13_s12  }
   0x2   : > { %p137_p1 = scmp.lt.s32.totalorder %s718_s12, 3 }
   0x4   : > { %p138_p2 = pnand %p618_p0, %p137_p1 }
   0x5   : > { %p161_p3 = scmp.lt.s32.totalorder (!%p138_p2), %s614_s13, 1  ;;  %vm187_vm0 = vcmask (!%p138_p2), 31744   ;;  %vm550_vm9 = vcmask (!%p138_p2), 27648  }
   0x6   : > { %141 = sbr.rel (%p138_p2) target bundleno = 597 (0x255), region = 32 }
   0xd   : > { %s959_s13 = smov (!%p161_p3, %s614_s13), 1 }
   0xe   : > { %s635_s14 = sshll.u32 %s959_s13, 5 }
   0xf   : > { %s165_s17 = scalar_lea.vmem %s954_s0, %s635_s14  ;;  %s170_s30 = scalar_lea.vmem %s957_s3, %s635_s14 }
  0x10   : > { %v646_v0 = vld [vmem:[%s165_s17] sm:$0xff]   ;;  %v661_v1 = vld [vmem:[%s165_s17 + $0x8] sm:$0xff]   ;;  %v662_v2 = vld [vmem:[%s165_s17 + $0x10] sm:$0xff]  }
  0x11   : > { %v647_v3 = vunpack.c.l.bf16 %v646_v0  ;;  %v648_v4 = vunpack.c.h.bf16 %v646_v0  ;;  %v651_v5 = vunpack.c.l.bf16 %v661_v1  ;;  %v652_v6 = vunpack.c.h.bf16 %v661_v1  ;;  %v663_v11 = vld [vmem:[%s165_s17 + $0x18] sm:$0xff]  }
  0x12   : > { %v655_v7 = vunpack.c.l.bf16 %v662_v2  ;;  %v656_v13 = vunpack.c.h.bf16 %v662_v2  ;;  %v659_v16 = vunpack.c.l.bf16 %v663_v11  ;;  %v660_v19 = vunpack.c.h.bf16 %v663_v11 }
  0x13   : > { %v188_v8 = vsel %vm187_vm0, %v647_v3, 0.0  ;;  %v189_v9 = vsel %vm187_vm0, %v648_v4, 0.0  ;;  %v191_v10 = vsel %vm187_vm0, %v651_v5, 0.0  ;;  %v193_v14 = vsel %vm187_vm0, %v652_v6, 0.0 }
  0x14   : > { %v190_v12 = vadd.f32 %v189_v9, %v188_v8  ;;  %v195_v17 = vsel %vm187_vm0, %v655_v7, 0.0  ;;  %v197_v20 = vsel %vm187_vm0, %v656_v13, 0.0  ;;  %v199_v22 = vsel %vm187_vm0, %v659_v16, 0.0 }
  0x15   : > { %v201_v24 = vsel %vm187_vm0, %v660_v19, 0.0 }
  0x16   : > { %v192_v15 = vadd.f32 %v191_v10, %v190_v12  ;;  %v623_v12 = vld [vmem:[%s955_s1] ss:$0 sm:$0xff] }
  0x18   : > { %v194_v18 = vadd.f32 %v193_v14, %v192_v15 }
  0x1a   : > { %v196_v21 = vadd.f32 %v195_v17, %v194_v18 }
  0x1c   : > { %v198_v23 = vadd.f32 %v197_v20, %v196_v21  ;;  %v624_v21 = vld [vmem:[%s956_s2] ss:$0 sm:$0xff] }
  0x1e   : > { %v200_v25 = vadd.f32 %v199_v22, %v198_v23 }
  0x20   : > { %v202_v26 = vadd.f32 %v201_v24, %v200_v25 }
  0x22   : > { %203 = vadd.xlane.f32.xlu0 %v202_v26 }
  0xaf   : > { %v204_v27 = vpop.xlane.xlu0 %203 }
  0xb0   : > { %v205_v28 = vrot.slane %v204_v27, 4 }
  0xb2   : > { %v206_v29 = vadd.f32 %v205_v28, %v204_v27 }
  0xb4   : > { %v207_v30 = vrot.slane %v206_v29, 2 }
  0xb6   : > { %v208_v31 = vadd.f32 %v207_v30, %v206_v29 }
  0xb8   : > { %v209_v32 = vrot.slane %v208_v31, 1 }
  0xba   : > { %v210_v33 = vadd.f32 %v209_v32, %v208_v31 }
  0xbc   : > { %664 = vpush %v210_v33 }
  0xed   : > { %s665_s18 = spop %664 }
  0xee   : > { %s214_s19 = smul.f32 0.00390625, %s665_s18 }
  0xf0   : > { %v215_v34 = vstv %s214_s19 }
  0xf1   : > { %v216_v35 = vsub.f32 %v647_v3, %v215_v34  ;;  %v217_v36 = vsub.f32 %v648_v4, %v215_v34  ;;  %v218_v37 = vsub.f32 %v651_v5, %v215_v34  ;;  %v219_v38 = vsub.f32 %v652_v6, %v215_v34 }
  0xf2   : > { %v220_v39 = vsub.f32 %v655_v7, %v215_v34  ;;  %v221_v43 = vsub.f32 %v656_v13, %v215_v34  ;;  %v222_v48 = vsub.f32 %v659_v16, %v215_v34  ;;  %v223_v52 = vsub.f32 %v660_v19, %v215_v34 }
  0xf3   : > { %v224_v40 = vmul.f32 %v216_v35, %v216_v35  ;;  %v225_v41 = vmul.f32 %v217_v36, %v217_v36  ;;  %v226_v42 = vmul.f32 %v218_v37, %v218_v37  ;;  %v227_v44 = vmul.f32 %v219_v38, %v219_v38 }
  0xf4   : > { %v228_v49 = vmul.f32 %v220_v39, %v220_v39  ;;  %v229_v53 = vmul.f32 %v221_v43, %v221_v43  ;;  %v230_v56 = vmul.f32 %v222_v48, %v222_v48  ;;  %v231_v59 = vmul.f32 %v223_v52, %v223_v52 }
  0xf5   : > { %v232_v45 = vsel %vm187_vm0, %v224_v40, 0.0  ;;  %v233_v46 = vsel %vm187_vm0, %v225_v41, 0.0  ;;  %v235_v50 = vsel %vm187_vm0, %v226_v42, 0.0  ;;  %v237_v54 = vsel %vm187_vm0, %v227_v44, 0.0 }
  0xf6   : > { %v234_v47 = vadd.f32 %v233_v46, %v232_v45  ;;  %v239_v57 = vsel %vm187_vm0, %v228_v49, 0.0  ;;  %v241_v60 = vsel %vm187_vm0, %v229_v53, 0.0  ;;  %v243_v62 = vsel %vm187_vm0, %v230_v56, 0.0 }
  0xf7   : > { %v245_v0 = vsel %vm187_vm0, %v231_v59, 0.0 }
  0xf8   : > { %v236_v51 = vadd.f32 %v235_v50, %v234_v47 }
  0xfa   : > { %v238_v55 = vadd.f32 %v237_v54, %v236_v51 }
  0xfc   : > { %v240_v58 = vadd.f32 %v239_v57, %v238_v55 }
  0xfe   : > { %v242_v61 = vadd.f32 %v241_v60, %v240_v58 }
 0x100   : > { %v244_v63 = vadd.f32 %v243_v62, %v242_v61 }
 0x102   : > { %v246_v1 = vadd.f32 %v245_v0, %v244_v63 }
 0x104   : > { %247 = vadd.xlane.f32.xlu0 %v246_v1 }
 0x191   : > { %v248_v2 = vpop.xlane.xlu0 %247 }
 0x192   : > { %v249_v3 = vrot.slane %v248_v2, 4 }
 0x194   : > { %v250_v4 = vadd.f32 %v249_v3, %v248_v2 }
 0x196   : > { %v251_v5 = vrot.slane %v250_v4, 2 }
 0x198   : > { %v252_v6 = vadd.f32 %v251_v5, %v250_v4 }
 0x19a   : > { %v253_v7 = vrot.slane %v252_v6, 1 }
 0x19c   : > { %v254_v8 = vadd.f32 %v253_v7, %v252_v6 }
 0x19e   : > { %666 = vpush %v254_v8 }
 0x1cf   : > { %s667_s20 = spop %666 }
 0x1d0   : > { %s258_s21 = smul.f32 0.00390625, %s667_s20 }
 0x1d2   : > { %s259_s22 = sadd.f32 1e-05, %s258_s21 }
 0x1d4   : > { %v260_v9 = vstv %s259_s22 }
 0x1d5   : > { %678 = vrsqrt.f32 %v260_v9 }
 0x1df   : > { %v679_v10 = vpop.eup %678 }
 0x1e0   : > { %668 = vpush %v679_v10 }
 0x211   : > { %s669_s23 = spop %668 }
 0x212   : > { %v263_v11 = vstv %s669_s23 }
 0x213   : > { %v264_v13 = vmul.f32 %v263_v11, %v216_v35  ;;  %v265_v14 = vmul.f32 %v263_v11, %v217_v36  ;;  %v266_v15 = vmul.f32 %v263_v11, %v218_v37  ;;  %v267_v16 = vmul.f32 %v263_v11, %v219_v38 }
 0x214   : > { %v268_v17 = vmul.f32 %v263_v11, %v220_v39  ;;  %v269_v18 = vmul.f32 %v263_v11, %v221_v43  ;;  %v270_v19 = vmul.f32 %v263_v11, %v222_v48  ;;  %v271_v20 = vmul.f32 %v263_v11, %v223_v52 }
 0x215   : > { %v279_v22 = vmul.f32 %v623_v12, %v264_v13  ;;  %v280_v23 = vmul.f32 %v623_v12, %v265_v14  ;;  %v281_v24 = vmul.f32 %v623_v12, %v266_v15  ;;  %v282_v25 = vmul.f32 %v623_v12, %v267_v16 }
 0x216   : > { %v283_v26 = vmul.f32 %v623_v12, %v268_v17  ;;  %v284_v27 = vmul.f32 %v623_v12, %v269_v18  ;;  %v285_v28 = vmul.f32 %v623_v12, %v270_v19  ;;  %v286_v29 = vmul.f32 %v623_v12, %v271_v20 }
 0x217   : > { %v778_v30 = vadd.f32 %v624_v21, %v279_v22  ;;  %v780_v31 = vadd.f32 %v624_v21, %v280_v23  ;;  %v782_v32 = vadd.f32 %v624_v21, %v281_v24  ;;  %v784_v33 = vadd.f32 %v624_v21, %v282_v25 }
 0x218   : > { %v786_v34 = vadd.f32 %v624_v21, %v283_v26  ;;  %v788_v35 = vadd.f32 %v624_v21, %v284_v27  ;;  %v790_v36 = vadd.f32 %v624_v21, %v285_v28  ;;  %v792_v37 = vadd.f32 %v624_v21, %v286_v29 }
 0x219   : > { %v795_v38 = vmul.f32 0.70710677, %v778_v30  ;;  %v798_v39 = vmul.f32 0.70710677, %v780_v31  ;;  %v801_v40 = vmul.f32 0.70710677, %v782_v32 }
 0x21a   : > { %v804_v41 = vmul.f32 0.70710677, %v784_v33  ;;  %v807_v42 = vmul.f32 0.70710677, %v786_v34  ;;  %v810_v43 = vmul.f32 0.70710677, %v788_v35 }
 0x21b   : > { %v813_v44 = vmul.f32 0.70710677, %v790_v36  ;;  %v816_v45 = vmul.f32 0.70710677, %v792_v37  ;;  %v318_v46 = vand.u32 2147483647, %v795_v38 }
 0x21c   : > { %v319_v47 = vand.u32 2147483647, %v798_v39  ;;  %v320_v48 = vand.u32 2147483647, %v801_v40  ;;  %v321_v49 = vand.u32 2147483647, %v804_v41 }
 0x21d   : > { %v322_v50 = vand.u32 2147483647, %v807_v42  ;;  %v323_v51 = vand.u32 2147483647, %v810_v43  ;;  %v324_v52 = vand.u32 2147483647, %v813_v44 }
 0x21e   : > { %v325_v53 = vand.u32 2147483647, %v816_v45  ;;  %v326_v54 = vmul.f32 0.3275911, %v318_v46  ;;  %v327_v55 = vmul.f32 0.3275911, %v319_v47 }
 0x21f   : > { %v328_v56 = vmul.f32 0.3275911, %v320_v48  ;;  %v329_v57 = vmul.f32 0.3275911, %v321_v49  ;;  %v330_v58 = vmul.f32 0.3275911, %v322_v50 }
 0x220   : > { %v331_v59 = vmul.f32 0.3275911, %v323_v51  ;;  %v332_v60 = vmul.f32 0.3275911, %v324_v52  ;;  %v333_v61 = vmul.f32 0.3275911, %v325_v53 }
 0x221   : > { %v334_v62 = vadd.f32 1.0, %v326_v54  ;;  %v335_v63 = vadd.f32 1.0, %v327_v55  ;;  %v336_v0 = vadd.f32 1.0, %v328_v56  ;;  %v337_v1 = vadd.f32 1.0, %v329_v57 }
 0x222   : > { %v338_v2 = vadd.f32 1.0, %v330_v58  ;;  %v339_v3 = vadd.f32 1.0, %v331_v59  ;;  %v430_v4 = vsub.f32 0.0, %v318_v46  ;;  %v431_v5 = vsub.f32 0.0, %v319_v47 }
 0x223   : > { %680 = vrcp.f32 %v334_v62  ;;  %v432_v6 = vsub.f32 0.0, %v320_v48  ;;  %v340_v7 = vadd.f32 1.0, %v332_v60  ;;  %v433_v8 = vsub.f32 0.0, %v321_v49 }
 0x224   : > { %682 = vrcp.f32 %v335_v63  ;;  %v434_v9 = vsub.f32 0.0, %v322_v50  ;;  %v341_v10 = vadd.f32 1.0, %v333_v61  ;;  %v435_v11 = vsub.f32 0.0, %v323_v51 }
 0x225   : > { %684 = vrcp.f32 %v336_v0  ;;  %v438_v12 = vmul.f32 %v430_v4, %v318_v46  ;;  %v436_v13 = vsub.f32 0.0, %v324_v52  ;;  %v439_v14 = vmul.f32 %v431_v5, %v319_v47 }
 0x226   : > { %686 = vrcp.f32 %v337_v1  ;;  %v440_v15 = vmul.f32 %v432_v6, %v320_v48  ;;  %v437_v16 = vsub.f32 0.0, %v325_v53  ;;  %v441_v17 = vmul.f32 %v433_v8, %v321_v49 }
 0x227   : > { %688 = vrcp.f32 %v338_v2  ;;  %v442_v18 = vmul.f32 %v434_v9, %v322_v50  ;;  %v446_v19 = vmul.f32 1.442695, %v438_v12  ;;  %v443_v20 = vmul.f32 %v435_v11, %v323_v51 }
 0x228   : > { %690 = vrcp.f32 %v339_v3  ;;  %v448_v21 = vmul.f32 1.442695, %v439_v14  ;;  %v444_v22 = vmul.f32 %v436_v13, %v324_v52  ;;  %v450_v23 = vmul.f32 1.442695, %v440_v15 }
 0x229   : > { %692 = vrcp.f32 %v340_v7  ;;  %v445_v24 = vmul.f32 %v437_v16, %v325_v53  ;;  %v452_v25 = vmul.f32 1.442695, %v441_v17  ;;  %v827_v26 = vmul.f32 0.5, %v778_v30 }
 0x22a   : > { %694 = vrcp.f32 %v341_v10  ;;  %v830_v27 = vmul.f32 0.5, %v780_v31  ;;  %v454_v28 = vmul.f32 1.442695, %v442_v18  ;;  %v835_v46 = vmul.f32 0.5, %v782_v32 }
 0x22b   : > { %696 = vpow2.f32 %v446_v19  ;;  %v838_v47 = vmul.f32 0.5, %v784_v33  ;;  %v456_v48 = vmul.f32 1.442695, %v443_v20  ;;  %v843_v30 = vmul.f32 0.5, %v786_v34 }
 0x22c   : > { %698 = vpow2.f32 %v448_v21  ;;  %v458_v50 = vmul.f32 1.442695, %v444_v22  ;;  %v849_v52 = vmul.f32 0.5, %v788_v35  ;;  %v460_v33 = vmul.f32 1.442695, %v445_v24 }
 0x22d   : > { %v832_v29 = vpop.eup %680  ;;  %700 = vpow2.f32 %v450_v23  ;;  %v855_v54 = vmul.f32 0.5, %v790_v36  ;;  %v861_v57 = vmul.f32 0.5, %v792_v37  ;;  %vm478_vm1 = vcmp.ge.f32.partialorder %v795_v38, 0.0 }
 0x22e   : > { %v840_v49 = vpop.eup %682  ;;  %v358_v31 = vmul.f32 1.0614054, %v832_v29  ;;  %702 = vpow2.f32 %v452_v25  ;;  %vm479_vm2 = vcmp.ge.f32.partialorder %v798_v39, 0.0  ;;  %vm480_vm3 = vcmp.ge.f32.partialorder %v801_v40, 0.0 }
 0x22f   : > { %v846_v51 = vpop.eup %684  ;;  %v359_v32 = vmul.f32 1.0614054, %v840_v49  ;;  %704 = vpow2.f32 %v454_v28  ;;  %vm481_vm4 = vcmp.ge.f32.partialorder %v804_v41, 0.0  ;;  %vm482_vm5 = vcmp.ge.f32.partialorder %v807_v42, 0.0 }
 0x230   : > { %v852_v53 = vpop.eup %686  ;;  %v360_v34 = vmul.f32 1.0614054, %v846_v51  ;;  %v366_v55 = vadd.f32 -1.4531521, %v358_v31  ;;  %706 = vpow2.f32 %v456_v48  ;;  %vm483_vm6 = vcmp.ge.f32.partialorder %v810_v43, 0.0 }
 0x231   : > { %v858_v56 = vpop.eup %688  ;;  %v361_v35 = vmul.f32 1.0614054, %v852_v53  ;;  %v367_v58 = vadd.f32 -1.4531521, %v359_v32  ;;  %708 = vpow2.f32 %v458_v50  ;;  %vm484_vm7 = vcmp.ge.f32.partialorder %v813_v44, 0.0 }
 0x232   : > { %v864_v59 = vpop.eup %690  ;;  %v362_v60 = vmul.f32 1.0614054, %v858_v56  ;;  %v368_v61 = vadd.f32 -1.4531521, %v360_v34  ;;  %v374_v36 = vmul.f32 %v832_v29, %v366_v55  ;;  %710 = vpow2.f32 %v460_v33 }
 0x233   : > { %v868_v62 = vpop.eup %692  ;;  %v363_v63 = vmul.f32 1.0614054, %v864_v59  ;;  %v369_v0 = vadd.f32 -1.4531521, %v361_v35  ;;  %v375_v37 = vmul.f32 %v840_v49, %v367_v58  ;;  %vm485_vm8 = vcmp.ge.f32.partialorder %v816_v45, 0.0 }
 0x234   : > { %v872_v1 = vpop.eup %694  ;;  %v364_v2 = vmul.f32 1.0614054, %v868_v62  ;;  %v370_v3 = vadd.f32 -1.4531521, %v362_v60  ;;  %v376_v4 = vmul.f32 %v846_v51, %v368_v61  ;;  %v382_v5 = vadd.f32 1.4214138, %v374_v36 }
 0x235   : > { %v365_v6 = vmul.f32 1.0614054, %v872_v1  ;;  %v371_v7 = vadd.f32 -1.4531521, %v363_v63  ;;  %v377_v8 = vmul.f32 %v852_v53, %v369_v0  ;;  %v383_v9 = vadd.f32 1.4214138, %v375_v37  ;;  %v697_v10 = vpop.eup %696 }
 0x236   : > { %v372_v11 = vadd.f32 -1.4531521, %v364_v2  ;;  %v378_v12 = vmul.f32 %v858_v56, %v370_v3  ;;  %v384_v13 = vadd.f32 1.4214138, %v376_v4  ;;  %v390_v14 = vmul.f32 %v832_v29, %v382_v5  ;;  %v699_v15 = vpop.eup %698 }
 0x237   : > { %v373_v16 = vadd.f32 -1.4531521, %v365_v6  ;;  %v379_v17 = vmul.f32 %v864_v59, %v371_v7  ;;  %v385_v18 = vadd.f32 1.4214138, %v377_v8  ;;  %v391_v19 = vmul.f32 %v840_v49, %v383_v9  ;;  %v701_v20 = vpop.eup %700 }
 0x238   : > { %v380_v21 = vmul.f32 %v868_v62, %v372_v11  ;;  %v386_v22 = vadd.f32 1.4214138, %v378_v12  ;;  %v392_v23 = vmul.f32 %v846_v51, %v384_v13  ;;  %v398_v24 = vadd.f32 -0.28449672, %v390_v14  ;;  %v703_v25 = vpop.eup %702 }
 0x239   : > { %v381_v28 = vmul.f32 %v872_v1, %v373_v16  ;;  %v387_v48 = vadd.f32 1.4214138, %v379_v17  ;;  %v393_v31 = vmul.f32 %v852_v53, %v385_v18  ;;  %v399_v50 = vadd.f32 -0.28449672, %v391_v19  ;;  %v705_v32 = vpop.eup %704 }
 0x23a   : > { %v388_v33 = vadd.f32 1.4214138, %v380_v21  ;;  %v394_v34 = vmul.f32 %v858_v56, %v386_v22  ;;  %v400_v55 = vadd.f32 -0.28449672, %v392_v23  ;;  %v406_v35 = vmul.f32 %v832_v29, %v398_v24  ;;  %v707_v58 = vpop.eup %706 }
 0x23b   : > { %v389_v60 = vadd.f32 1.4214138, %v381_v28  ;;  %v395_v61 = vmul.f32 %v864_v59, %v387_v48  ;;  %v401_v36 = vadd.f32 -0.28449672, %v393_v31  ;;  %v407_v63 = vmul.f32 %v840_v49, %v399_v50  ;;  %v709_v0 = vpop.eup %708 }
 0x23c   : > { %v396_v37 = vmul.f32 %v868_v62, %v388_v33  ;;  %v402_v2 = vadd.f32 -0.28449672, %v394_v34  ;;  %v408_v3 = vmul.f32 %v846_v51, %v400_v55  ;;  %v414_v4 = vadd.f32 0.2548296, %v406_v35  ;;  %v711_v5 = vpop.eup %710 }
 0x23d   : > { %v397_v6 = vmul.f32 %v872_v1, %v389_v60  ;;  %v403_v7 = vadd.f32 -0.28449672, %v395_v61  ;;  %v409_v8 = vmul.f32 %v852_v53, %v401_v36  ;;  %v415_v9 = vadd.f32 0.2548296, %v407_v63 }
 0x23e   : > { %v404_v11 = vadd.f32 -0.28449672, %v396_v37  ;;  %v410_v12 = vmul.f32 %v858_v56, %v402_v2  ;;  %v416_v13 = vadd.f32 0.2548296, %v408_v3  ;;  %v422_v14 = vmul.f32 %v832_v29, %v414_v4 }
 0x23f   : > { %v405_v16 = vadd.f32 -0.28449672, %v397_v6  ;;  %v411_v17 = vmul.f32 %v864_v59, %v403_v7  ;;  %v417_v18 = vadd.f32 0.2548296, %v409_v8  ;;  %v423_v19 = vmul.f32 %v840_v49, %v415_v9 }
 0x240   : > { %v412_v21 = vmul.f32 %v868_v62, %v404_v11  ;;  %v418_v22 = vadd.f32 0.2548296, %v410_v12  ;;  %v424_v23 = vmul.f32 %v846_v51, %v416_v13  ;;  %v462_v24 = vmul.f32 %v697_v10, %v422_v14 }
 0x241   : > { %v413_v29 = vmul.f32 %v872_v1, %v405_v16  ;;  %v419_v28 = vadd.f32 0.2548296, %v411_v17  ;;  %v425_v48 = vmul.f32 %v852_v53, %v417_v18  ;;  %v463_v31 = vmul.f32 %v699_v15, %v423_v19 }
 0x242   : > { %v420_v50 = vadd.f32 0.2548296, %v412_v21  ;;  %v426_v49 = vmul.f32 %v858_v56, %v418_v22  ;;  %v464_v33 = vmul.f32 %v701_v20, %v424_v23  ;;  %v470_v34 = vsub.f32 1.0, %v462_v24 }
 0x243   : > { %v421_v55 = vadd.f32 0.2548296, %v413_v29  ;;  %v427_v51 = vmul.f32 %v864_v59, %v419_v28  ;;  %v465_v10 = vmul.f32 %v703_v25, %v425_v48  ;;  %v471_v35 = vsub.f32 1.0, %v463_v31 }
 0x244   : > { %v428_v60 = vmul.f32 %v868_v62, %v420_v50  ;;  %v466_v53 = vmul.f32 %v705_v32, %v426_v49  ;;  %v472_v15 = vsub.f32 1.0, %v464_v33  ;;  %v486_v61 = vsub.f32 0.0, %v470_v34 }
 0x245   : > { %v429_v56 = vmul.f32 %v872_v1, %v421_v55  ;;  %v467_v20 = vmul.f32 %v707_v58, %v427_v51  ;;  %v473_v36 = vsub.f32 1.0, %v465_v10  ;;  %v487_v63 = vsub.f32 0.0, %v471_v35 }
 0x246   : > { %v468_v37 = vmul.f32 %v709_v0, %v428_v60  ;;  %v474_v2 = vsub.f32 1.0, %v466_v53  ;;  %v488_v59 = vsub.f32 0.0, %v472_v15  ;;  %v494_v25 = vsel %vm478_vm1, %v470_v34, %v486_v61 }
 0x247   : > { %v469_v3 = vmul.f32 %v711_v5, %v429_v56  ;;  %v475_v4 = vsub.f32 1.0, %v467_v20  ;;  %v489_v62 = vsub.f32 0.0, %v473_v36  ;;  %v495_v32 = vsel %vm479_vm2, %v471_v35, %v487_v63 }
 0x248   : > { %v476_v6 = vsub.f32 1.0, %v468_v37  ;;  %v490_v7 = vsub.f32 0.0, %v474_v2  ;;  %v496_v1 = vsel %vm480_vm3, %v472_v15, %v488_v59  ;;  %v502_v58 = vadd.f32 1.0, %v494_v25 }
 0x249   : > { %v477_v8 = vsub.f32 1.0, %v469_v3  ;;  %v491_v0 = vsub.f32 0.0, %v475_v4  ;;  %v497_v9 = vsel %vm481_vm4, %v473_v36, %v489_v62  ;;  %v503_v38 = vadd.f32 1.0, %v495_v32 }
 0x24a   : > { %v492_v11 = vsub.f32 0.0, %v476_v6  ;;  %v498_v5 = vsel %vm482_vm5, %v474_v2, %v490_v7  ;;  %v504_v12 = vadd.f32 1.0, %v496_v1  ;;  %v505_v39 = vadd.f32 1.0, %v497_v9 }
 0x24b   : > { %v493_v13 = vsub.f32 0.0, %v477_v8  ;;  %v499_v14 = vsel %vm483_vm6, %v475_v4, %v491_v0  ;;  %v506_v40 = vadd.f32 1.0, %v498_v5  ;;  %v510_v16 = vmul.f32 %v502_v58, %v827_v26 }
 0x24c   : > { %v500_v17 = vsel %vm484_vm7, %v476_v6, %v492_v11  ;;  %v507_v18 = vadd.f32 1.0, %v499_v14  ;;  %v511_v41 = vmul.f32 %v503_v38, %v830_v27  ;;  %v512_v19 = vmul.f32 %v504_v12, %v835_v46 }
 0x24d   : > { %v501_v42 = vsel %vm485_vm8, %v477_v8, %v493_v13  ;;  %v508_v43 = vadd.f32 1.0, %v500_v17  ;;  %v513_v21 = vmul.f32 %v505_v39, %v838_v47  ;;  %v514_v26 = vmul.f32 %v506_v40, %v843_v30 }
 0x24e   : > { %v509_v44 = vadd.f32 1.0, %v501_v42  ;;  %v515_v22 = vmul.f32 %v507_v18, %v849_v52  ;;  %v637_v23 = vpack.c.bf16 %v510_v16, %v510_v16  ;;  %v638_v27 = vpack.c.bf16 %v511_v41, %v511_v41 }
 0x24f   : > { %v516_v46 = vmul.f32 %v508_v43, %v855_v54  ;;  %v639_v24 = vpack.c.bf16 %v512_v19, %v512_v19  ;;  %v640_v29 = vpack.c.bf16 %v513_v21, %v513_v21  ;;  %v641_v28 = vpack.c.bf16 %v514_v26, %v514_v26 }
 0x250   : > { %v517_v48 = vmul.f32 %v509_v44, %v861_v57  ;;  %v642_v31 = vpack.c.bf16 %v515_v22, %v515_v22  ;;  %551 = vst.msk [vmem:[%s170_s30] sm:$0xf] %vm550_vm9, %v637_v23  ;;  %552 = vst.msk [vmem:[%s170_s30 + $0x4] sm:$0xf] %vm550_vm9, %v638_v27 }
 0x251   : > { %v643_v45 = vpack.c.bf16 %v516_v46, %v516_v46  ;;  %553 = vst.msk [vmem:[%s170_s30 + $0x8] sm:$0xf] %vm550_vm9, %v639_v24  ;;  %554 = vst.msk [vmem:[%s170_s30 + $0xc] sm:$0xf] %vm550_vm9, %v640_v29 }
 0x252   : > { %555 = vst.msk [vmem:[%s170_s30 + $0x10] sm:$0xf] %vm550_vm9, %v641_v28  ;;  %v644_v47 = vpack.c.bf16 %v517_v48, %v517_v48  ;;  %556 = vst.msk [vmem:[%s170_s30 + $0x14] sm:$0xf] %vm550_vm9, %v642_v31 }
 0x253   : > { %557 = vst.msk [vmem:[%s170_s30 + $0x18] sm:$0xf] %vm550_vm9, %v643_v45 }
 0x254   : > { %558 = vst.msk [vmem:[%s170_s30 + $0x1c] sm:$0xf] %vm550_vm9, %v644_v47 }
 0x255 PF: > { %s13_s12 = sadd.s32 1, %s718_s12  }
 0x256   : > { %p10_p4 = scmp.ge.s32.totalorder %s13_s12, 4  }
 0x258   :  { %12 = sbr.rel (!%p10_p4) target bundleno = 1 (0x1), region = 62 }

// kernel: down_forward.8
= control target key start
LH: loop header
LB: loop body
LE: loop exit
PB: predicated region body
PF: predicated region fallthrough
CT: control target
= control target key end

     0   :  { %s1699_s9 = smov 0   ;;  %s1701_s10 = smov 0   ;;  %s2068_s0 = inlined_call_operand.vmem [shape: bf16[2,10,10,4], index: 0, kind: input, shape index: {}]   ;;  %s2069_s1 = inlined_call_operand.vmem [shape: bf16[9,4,4], index: 1, kind: input, shape index: {}]   ;;  %s2070_s2 = inlined_call_operand.vmem [shape: bf16[2,8,8,4], index: 2, kind: output, shape index: {}]  }
   0x1   :  { %s1703_s11 = smov 0  }
   0x2 LB: > { %s24_s12 = sadd.s32 1, %s1678_s10  ;;  %p1327_p0 = scmp.ge.s32.totalorder %s1682_s11, 1  ;;  %s1682_s11 = sphi %s1703_s11, %s12_s11   ;;  %s1678_s10 = sphi %s1701_s10, %s2076_s10   ;;  %s1674_s9 = sphi %s1699_s9, %s2075_s9  }
   0x3   : > { %p26_p1 = scmp.ge.s32.totalorder %s24_s12, 2  ;;  %p126_p2 = scmp.lt.s32.totalorder %s1682_s11, 3 }
   0x5   : > { %s2078_s12 = smov (%p26_p1, %s24_s12), 0  ;;  %p127_p3 = pnand %p1327_p0, %p126_p2 }
   0x6   : > { %v1331_v0 = vld [vmem:[%s2069_s1 + $0x2] sm:$0x3] (!%p127_p3)  ;;  %vm335_vm0 = vcmask (!%p127_p3), 1041408   ;;  %v1723_v1 = vld [vmem:[%s2069_s1 + $0x8] sm:$0x3] (!%p127_p3)  ;;  %p152_p4 = scmp.lt.s32.totalorder (!%p127_p3), %s1674_s9, 1 }
   0x7   : > { %130 = sbr.rel (%p127_p3) target bundleno = 326 (0x146), region = 28  ;;  %1616 = vmatprep.subr.msk.bf16.mxu1 (!%p127_p3), %vm335_vm0, %v1331_v0  ;;  %1620 = vmatprep.subr.msk.bf16.mxu0 (!%p127_p3), %vm335_vm0, %v1723_v1  ;;  %v337_v2 = vsel (!%p127_p3), %vm335_vm0, %v1331_v0, 0  ;;  %v1731_v3 = vsel (!%p127_p3), %vm335_vm0, %v1723_v1, 0  ;;  %v192_v4 = vld [vmem:[%s2069_s1] sm:$0x3] (!%p127_p3)  ;;  %vm322_vm3 = vcmask (!%p127_p3), 31744  }
   0x8   : > { %1461 = vmatpush3.bf16.msra.mxu1 (!%p127_p3), %v337_v2  ;;  %1501 = vmatpush3.bf16.msra.mxu0 (!%p127_p3), %v1731_v3  ;;  %v1384_v5 = vld [vmem:[%s2069_s1 + $0xa] sm:$0x3] (!%p127_p3)  ;;  %vm193_vm1 = vsmask.f32 (!%p127_p3), 3328  ;;  %vm194_vm2 = vsmask.f32 (!%p127_p3), 7440 }
   0x9   : > { %1617 = vmatprep.subr.msk.bf16.mxu1 (!%p127_p3), %vm335_vm0, %v192_v4  ;;  %1622 = vmatprep.subr.msk.bf16.mxu0 (!%p127_p3), %vm335_vm0, %v1384_v5  ;;  %v1772_v17 = vsel (!%p127_p3), %vm335_vm0, %v192_v4, 0  ;;  %v1775_v18 = vsel (!%p127_p3), %vm335_vm0, %v1384_v5, 0  ;;  %vm1791_vm4 = vmor (!%p127_p3), %vm193_vm1, %vm194_vm2  ;;  %vm512_vm5 = vcmask (!%p127_p3), 1042432   ;;  %vm513_vm6 = vcmask (!%p127_p3), 1046532  }
   0xa   : > { %vm1862_vm7 = vmor (!%p127_p3), %vm512_vm5, %vm513_vm6  ;;  %vm1231_vm8 = vcmask (!%p127_p3), 27648  }
   0xe   : > { %s2080_s9 = smov (!%p152_p4, %s1674_s9), 1 }
   0xf   : > { %s1626_s21 = smul.u32 80, %s2080_s9  ;;  %s1414_s7 = sshll.u32 %s2080_s9, 5 }
  0x10   : > { %s2041_s14 = scalar_lea.vmem %s2070_s2, %s1414_s7 }
  0x11   : > { %s1748_s24 = scalar_lea.vmem %s2068_s0, %s1626_s21 }
  0x12   : > { %v1751_v6 = vld [vmem:[%s1748_s24] sm:$0xf]  ;;  %v1754_v7 = vld [vmem:[%s1748_s24 + $0x4] sm:$0x1]  ;;  %v1757_v8 = vld [vmem:[%s1748_s24 + $0x8] sm:$0xf] }
  0x13   : > { %v1760_v9 = vld [vmem:[%s1748_s24 + $0xc] sm:$0x1]  ;;  %v197_v10 = vshrl.u32 %v1751_v6, 16  ;;  %v200_v11 = vshll.u32 %v1751_v6, 16  ;;  %v206_v12 = vshll.u32 %v1754_v7, 16  ;;  %v211_v13 = vshrl.u32 %v1757_v8, 16 }
  0x14   : > { %v214_v14 = vshll.u32 %v1757_v8, 16  ;;  %v220_v15 = vshll.u32 %v1760_v9, 16  ;;  %v1769_v16 = vld [vmem:[%s1748_s24 + $0x10] sm:$0xf]  ;;  %v521_v22 = vrot.slane %v1760_v9, 5  ;;  %v1340_v9 = vcombine.low %v1751_v6, %v1757_v8 }
  0x15   : > { %v199_v19 = vrot.slane %v197_v10, 4  ;;  %v202_v20 = vrot.slane %v200_v11, 5  ;;  %v213_v21 = vrot.slane %v211_v13, 4  ;;  %v1779_v23 = vld [vmem:[%s1748_s24 + $0x14] sm:$0x1]  ;;  %v208_v24 = vrot.slane %v206_v12, 5 }
  0x16   : > { %v216_v25 = vrot.slane %v214_v14, 5  ;;  %v1782_v26 = vld [vmem:[%s1748_s24 + $0x18] sm:$0xf]  ;;  %v1785_v27 = vld [vmem:[%s1748_s24 + $0x1c] sm:$0x1]  ;;  %v222_v29 = vrot.slane %v220_v15, 5 }
  0x17   : > { %v203_v28 = vor.u32 %v202_v20, %v199_v19  ;;  %v225_v30 = vshrl.u32 %v1769_v16, 16  ;;  %v228_v31 = vshll.u32 %v1769_v16, 16  ;;  %v1796_v34 = vld [vmem:[%s1748_s24 + $0x20] sm:$0xf]  ;;  %v234_v35 = vshll.u32 %v1779_v23, 16 }
  0x18   : > { %v217_v33 = vor.u32 %v216_v25, %v213_v21  ;;  %v239_v36 = vshrl.u32 %v1782_v26, 16  ;;  %v242_v37 = vshll.u32 %v1782_v26, 16  ;;  %v1802_v39 = vld [vmem:[%s1748_s24 + $0x24] sm:$0x1]  ;;  %v248_v42 = vshll.u32 %v1785_v27, 16 }
  0x19   : > { %v204_v38 = vrot.slane %v203_v28, 4  ;;  %v227_v40 = vrot.slane %v225_v30, 4  ;;  %v230_v41 = vrot.slane %v228_v31, 5  ;;  %v236_v44 = vrot.slane %v234_v35, 5  ;;  %v1813_v55 = vld [vmem:[%s1748_s24 + $0x28] sm:$0xf] }
  0x1a   : > { %v218_v43 = vrot.slane %v217_v33, 4  ;;  %v241_v45 = vrot.slane %v239_v36, 4  ;;  %v244_v46 = vrot.slane %v242_v37, 5  ;;  %v250_v49 = vrot.slane %v248_v42, 5  ;;  %v1817_v60 = vld [vmem:[%s1748_s24 + $0x2c] sm:$0x1] }
  0x1b   : > { %v209_v47 = vsel %vm1791_vm4, %v204_v38, %v208_v24  ;;  %v231_v48 = vor.u32 %v230_v41, %v227_v40  ;;  %v253_v50 = vshrl.u32 %v1796_v34, 16  ;;  %v256_v53 = vshll.u32 %v1796_v34, 16  ;;  %v1821_v2 = vld [vmem:[%s1748_s24 + $0x30] sm:$0xf]  ;;  %v1830_v12 = vld [vmem:[%s1748_s24 + $0x34] sm:$0x1] }
  0x1c   : > { %v223_v51 = vsel %vm1791_vm4, %v218_v43, %v222_v29  ;;  %v245_v52 = vor.u32 %v244_v46, %v241_v45  ;;  %v262_v54 = vshll.u32 %v1802_v39, 16  ;;  %v525_v59 = vrot.slane %v1779_v23, 5  ;;  %v1836_v20 = vld [vmem:[%s1748_s24 + $0x38] sm:$0xf]  ;;  %v1841_v25 = vld [vmem:[%s1748_s24 + $0x3c] sm:$0x1] }
  0x1d   : > { %v1332_v56 = vcombine.low %v209_v47, %v223_v51  ;;  %v232_v57 = vrot.slane %v231_v48, 4  ;;  %v255_v58 = vrot.slane %v253_v50, 4  ;;  %v258_v62 = vrot.slane %v256_v53, 5  ;;  %v1850_v35 = vld [vmem:[%s2069_s1 + $0x4] sm:$0x3] }
  0x1e   : > { %v246_v61 = vrot.slane %v245_v52, 4  ;;  %v264_v63 = vrot.slane %v262_v54, 5  ;;  %v529_v0 = vrot.slane %v1785_v27, 5  ;;  %v533_v5 = vrot.slane %v1802_v39, 5  ;;  %v1393_v53 = vld [vmem:[%s2069_s1 + $0xc] sm:$0x3] }
  0x1f   : > { %1462 = vmatprep.mubr.msk.bf16.mxu1 %vm322_vm3, %v1332_v56  ;;  %v237_v4 = vsel %vm1791_vm4, %v232_v57, %v236_v44  ;;  %v267_v10 = vshrl.u32 %v1813_v55, 16  ;;  %v270_v11 = vshll.u32 %v1813_v55, 16  ;;  %v259_v14 = vor.u32 %v258_v62, %v255_v58 }
  0x20   : > { %v251_v13 = vsel %vm1791_vm4, %v246_v61, %v250_v49  ;;  %v1375_v15 = vcombine.low %v223_v51, %v237_v4  ;;  %v276_v19 = vshll.u32 %v1817_v60, 16  ;;  %v281_v28 = vshrl.u32 %v1821_v2, 16  ;;  %v1406_v49 = vld [vmem:[%s2069_s1 + $0x10] sm:$0x3] }
  0x21   : > { %v1838_v21 = vcombine.low %v237_v4, %v251_v13  ;;  %v269_v23 = vrot.slane %v267_v10, 4  ;;  %v272_v24 = vrot.slane %v270_v11, 5  ;;  %v260_v29 = vrot.slane %v259_v14, 4 }
  0x22   : > { %1502 = vmatprep.mubr.msk.bf16.mxu0 %vm322_vm3, %v1375_v15  ;;  %v278_v30 = vrot.slane %v276_v19, 5  ;;  %v284_v31 = vshll.u32 %v1821_v2, 16  ;;  %v290_v33 = vshll.u32 %v1830_v12, 16  ;;  %v283_v37 = vrot.slane %v281_v28, 4  ;;  %v1927_v28 = vld [vmem:[%s1748_s24 + $0x40] sm:$0xf] }
  0x23   : > { %1463 = vmatmul.mubr.msk.bf16.vlgmr.msra.gmra.mrb[0].mxu1 %vm322_vm3, %v1838_v21  ;;  %v273_v36 = vor.u32 %v272_v24, %v269_v23  ;;  %v295_v38 = vshrl.u32 %v1836_v20, 16  ;;  %v298_v40 = vshll.u32 %v1836_v20, 16  ;;  %v265_v41 = vsel %vm1791_vm4, %v260_v29, %v264_v63  ;;  %v1930_v29 = vld [vmem:[%s1748_s24 + $0x44] sm:$0x1] }
  0x24   : > { %1471 = vmatpush3.bf16.msra.mxu1 %v1772_v17  ;;  %v286_v42 = vrot.slane %v284_v31, 5  ;;  %v292_v43 = vrot.slane %v290_v33, 5  ;;  %v304_v44 = vshll.u32 %v1841_v25, 16  ;;  %v1376_v45 = vcombine.low %v251_v13, %v265_v41 }
  0x25   : > { %v274_v46 = vrot.slane %v273_v36, 4  ;;  %v297_v47 = vrot.slane %v295_v38, 4  ;;  %v300_v48 = vrot.slane %v298_v40, 5  ;;  %1618 = vmatprep.subr.msk.bf16.mxu1 %vm335_vm0, %v1850_v35  ;;  %v1349_v17 = vrot.slane %v1757_v8, 9 }
  0x26   : > { %v287_v50 = vor.u32 %v286_v42, %v283_v37  ;;  %v306_v51 = vrot.slane %v304_v44, 5  ;;  %v1350_v52 = vrot.slane %v1769_v16, 9  ;;  %1503 = vmatmul.mubr.msk.bf16.vlgmr.msra.gmra.mrb[0].mxu0 %vm322_vm3, %v1376_v45  ;;  %v1351_v57 = vrot.slane %v1782_v26, 9  ;;  %v1399_v37 = vld [vmem:[%s2069_s1 + $0xe] sm:$0x3] }
  0x27   : > { %v1876_v54 = vsel %vm1791_vm4, %v274_v46, %v278_v30  ;;  %v301_v56 = vor.u32 %v300_v48, %v297_v47  ;;  %v1352_v58 = vrot.slane %v1796_v34, 9  ;;  %1511 = vmatpush3.bf16.msra.mxu0 %v1775_v18  ;;  %v522_v63 = vsel %vm1862_vm7, %v1349_v17, %v521_v22  ;;  %v190_v44 = vld [vmem:[%s1748_s24 + $0x48] sm:$0xf]  ;;  %v191_v45 = vld [vmem:[%s1748_s24 + $0x4c] sm:$0x1] }
  0x28   : > { %v1882_v61 = vcombine.low %v265_v41, %v1876_v54  ;;  %v288_v62 = vrot.slane %v287_v50, 4  ;;  %v526_v4 = vsel %vm1862_vm7, %v1350_v52, %v525_v59  ;;  %1623 = vmatprep.subr.msk.bf16.mxu0 %vm335_vm0, %v1393_v53  ;;  %v1353_v22 = vrot.slane %v1813_v55, 9 }
  0x29   : > { %v302_v10 = vrot.slane %v301_v56, 4  ;;  %v1385_v11 = vcombine.low %v522_v63, %v526_v4  ;;  %v537_v13 = vrot.slane %v1817_v60, 5  ;;  %v1354_v14 = vrot.slane %v1821_v2, 9 }
  0x2a   : > { %1466 = vmatprep.mubr.msk.bf16.mxu1 %vm322_vm3, %v1882_v61  ;;  %v1895_v18 = vsel %vm1791_vm4, %v288_v62, %v292_v43  ;;  %v541_v15 = vrot.slane %v1830_v12, 5  ;;  %v530_v23 = vsel %vm1862_vm7, %v1351_v57, %v529_v0  ;;  %v534_v24 = vsel %vm1862_vm7, %v1352_v58, %v533_v5 }
  0x2b   : > { %v1902_v59 = vsel %vm1791_vm4, %v302_v10, %v306_v51  ;;  %1512 = vmatprep.mubr.msk.bf16.mxu0 %vm322_vm3, %v1385_v11  ;;  %v538_v60 = vsel %vm1862_vm7, %v1353_v22, %v537_v13  ;;  %v1386_v27 = vcombine.low %v530_v23, %v534_v24  ;;  %v1355_v39 = vrot.slane %v1836_v20, 9 }
  0x2c   : > { %v1910_v19 = vcombine.low %v1895_v18, %v1902_v59  ;;  %v1924_v12 = vsel %vm1862_vm7, %v1354_v14, %v541_v15  ;;  %v545_v5 = vrot.slane %v1841_v25, 5  ;;  %v1383_v30 = vrot.slane %v1927_v28, 9 }
  0x2d   : > { %v1387_v0 = vcombine.low %v538_v60, %v1924_v12  ;;  %v857_v31 = vrot.slane %v1930_v29, 5  ;;  %v963_v33 = vsel %vm335_vm0, %v1393_v53, 0  ;;  %v1341_v36 = vcombine.low %v1769_v16, %v1782_v26 }
  0x2e   : > { %1467 = vmatmul.mubr.msk.bf16.gmra.mrb[4].mxu1 %vm322_vm3, %v1910_v19  ;;  %v574_v38 = vsel %vm335_vm0, %v1850_v35, 0  ;;  %v1342_v25 = vcombine.low %v1796_v34, %v1813_v55  ;;  %v517_v40 = vrot.slane %v1754_v7, 5  ;;  %v546_v41 = vsel %vm1862_vm7, %v1355_v39, %v545_v5  ;;  %v1365_v7 = vld [vmem:[%s2069_s1 + $0x6] sm:$0x3] }
  0x2f   : > { %1472 = vmatprep.mubr.msk.bf16.mxu1 %vm322_vm3, %v1340_v9  ;;  %v1957_v42 = vsel %vm1862_vm7, %v1383_v30, %v857_v31  ;;  %v1348_v43 = vrot.slane %v1751_v6, 9  ;;  %v1405_v35 = vrot.slane %v190_v44, 9  ;;  %v1138_v46 = vrot.slane %v191_v45, 5 }
  0x30   : > { %v1388_v47 = vcombine.low %v546_v41, %v1957_v42  ;;  %v1343_v50 = vcombine.low %v1821_v2, %v1836_v20  ;;  %v1060_v17 = vsel %vm335_vm0, %v1399_v37, 0  ;;  %v1358_v52 = vcombine.low %v526_v4, %v530_v23 }
  0x31   : > { %v1971_v6 = vsel %vm1862_vm7, %v1405_v35, %v1138_v46  ;;  %v518_v48 = vsel %vm1862_vm7, %v1348_v43, %v517_v40  ;;  %v670_v53 = vsel %vm335_vm0, %v1365_v7, 0  ;;  %v1359_v56 = vcombine.low %v534_v24, %v538_v60 }
  0x32   : > { %1513 = vmatmul.mubr.msk.bf16.vlgmr.msra.gmra.mrb[0].mxu0 %vm322_vm3, %v1386_v27  ;;  %v1357_v51 = vcombine.low %v518_v48, %v522_v63  ;;  %v1039_v57 = vshrl.u32 %v190_v44, 16  ;;  %v1042_v58 = vshll.u32 %v190_v44, 16  ;;  %v746_v62 = vshrl.u32 %v1927_v28, 16 }
  0x33   : > { %1521 = vmatpush3.bf16.msra.mxu0 %v963_v33  ;;  %1516 = vmatprep.mubr.msk.bf16.mxu0 %vm322_vm3, %v1387_v0  ;;  %v749_v63 = vshll.u32 %v1927_v28, 16  ;;  %v1394_v4 = vcombine.low %v1927_v28, %v190_v44  ;;  %v1360_v13 = vcombine.low %v1924_v12, %v546_v41  ;;  %v1366_v14 = vcombine.low %v1757_v8, %v1769_v16 }
  0x34   : > { %1624 = vmatprep.subr.msk.bf16.mxu0 %vm335_vm0, %v1399_v37  ;;  %v748_v10 = vrot.slane %v746_v62, 4  ;;  %v1041_v9 = vrot.slane %v1039_v57, 4  ;;  %v1044_v22 = vrot.slane %v1042_v58, 5  ;;  %v755_v23 = vshll.u32 %v1930_v29, 16 }
  0x35   : > { %v751_v11 = vrot.slane %v749_v63, 5  ;;  %v1048_v60 = vshll.u32 %v191_v45, 16  ;;  %v1148_v0 = vsel %vm335_vm0, %v1406_v49, 0  ;;  %v1367_v8 = vcombine.low %v1782_v26, %v1796_v34 }
  0x36   : > { %1473 = vmatmul.mubr.msk.bf16.vlgmr.msra.gmra.mrb[0].mxu1 %vm322_vm3, %v1341_v36  ;;  %v1045_v24 = vor.u32 %v1044_v22, %v1041_v9  ;;  %v757_v27 = vrot.slane %v755_v23, 5  ;;  %v1368_v16 = vcombine.low %v1813_v55, %v1821_v2  ;;  %v1369_v34 = vcombine.low %v1836_v20, %v1927_v28 }
  0x37   : > { %1481 = vmatpush3.bf16.msra.mxu1 %v574_v38  ;;  %1476 = vmatprep.mubr.msk.bf16.mxu1 %vm322_vm3, %v1342_v25  ;;  %v752_v15 = vor.u32 %v751_v11, %v748_v10  ;;  %v1050_v39 = vrot.slane %v1048_v60, 5  ;;  %v1377_v55 = vcombine.low %v1876_v54, %v1895_v18  ;;  %v1407_v32 = vcombine.low %v1957_v42, %v1971_v6 }
  0x38   : > { %1619 = vmatprep.subr.msk.bf16.mxu1 %vm335_vm0, %v1365_v7  ;;  %v1046_v12 = vrot.slane %v1045_v24, 4 }
  0x3a   : > { %1517 = vmatmul.mubr.msk.bf16.gmra.mrb[4].mxu0 %vm322_vm3, %v1388_v47  ;;  %v1051_v29 = vsel %vm1791_vm4, %v1046_v12, %v1050_v39 }
  0x3b   : > { %1522 = vmatprep.mubr.msk.bf16.mxu0 %vm322_vm3, %v1341_v36 }
  0x3e   : > { %1477 = vmatmul.mubr.msk.bf16.gmra.mrb[4].mxu1 %vm322_vm3, %v1343_v50 }
  0x3f   : > { %1482 = vmatprep.mubr.msk.bf16.mxu1 %vm322_vm3, %v1357_v51 }
  0x42   : > { %1523 = vmatmul.mubr.msk.bf16.vlgmr.msra.gmra.mrb[0].mxu0 %vm322_vm3, %v1342_v25 }
  0x43   : > { %1531 = vmatpush3.bf16.msra.mxu0 %v1060_v17  ;;  %1526 = vmatprep.mubr.msk.bf16.mxu0 %vm322_vm3, %v1343_v50 }
  0x44   : > { %1625 = vmatprep.subr.msk.bf16.mxu0 %vm335_vm0, %v1406_v49 }
  0x46   : > { %1483 = vmatmul.mubr.msk.bf16.vlgmr.msra.gmra.mrb[0].mxu1 %vm322_vm3, %v1358_v52 }
  0x47   : > { %1491 = vmatpush3.bf16.msra.mxu1 %v670_v53  ;;  %1486 = vmatprep.mubr.msk.bf16.mxu1 %vm322_vm3, %v1359_v56 }
  0x48   : > { %1621 = vmatprep.subr.msk.bf16.mxu1 %vm335_vm0, %v1723_v1  ;;  %v753_v1 = vrot.slane %v752_v15, 4 }
  0x4a   : > { %1527 = vmatmul.mubr.msk.bf16.gmra.mrb[4].mxu0 %vm322_vm3, %v1394_v4 }
  0x4b   : > { %1532 = vmatprep.mubr.msk.bf16.mxu0 %vm322_vm3, %v1838_v21  ;;  %v758_v21 = vsel %vm1791_vm4, %v753_v1, %v757_v27 }
  0x4c   : > { %v1400_v26 = vcombine.low %v758_v21, %v1051_v29 }
  0x4e   : > { %1487 = vmatmul.mubr.msk.bf16.gmra.mrb[4].mxu1 %vm322_vm3, %v1360_v13 }
  0x4f   : > { %1492 = vmatprep.mubr.msk.bf16.mxu1 %vm322_vm3, %v1366_v14 }
  0x52   : > { %1533 = vmatmul.mubr.msk.bf16.vlgmr.msra.gmra.mrb[0].mxu0 %vm322_vm3, %v1882_v61 }
  0x53   : > { %1541 = vmatpush3.bf16.msra.mxu0 %v1148_v0  ;;  %1536 = vmatprep.mubr.msk.bf16.mxu0 %vm322_vm3, %v1910_v19 }
  0x56   : > { %1493 = vmatmul.mubr.msk.bf16.vlgmr.msra.gmra.mrb[0].mxu1 %vm322_vm3, %v1367_v8 }
  0x57   : > { %1551 = vmatpush3.bf16.msra.mxu1 %v1731_v3  ;;  %1496 = vmatprep.mubr.msk.bf16.mxu1 %vm322_vm3, %v1368_v16  ;;  %v1378_v3 = vcombine.low %v1902_v59, %v758_v21 }
  0x5a   : > { %1537 = vmatmul.mubr.msk.bf16.gmra.mrb[4].mxu0 %vm322_vm3, %v1400_v26 }
  0x5b   : > { %1542 = vmatprep.mubr.msk.bf16.mxu0 %vm322_vm3, %v1358_v52 }
  0x5e   : > { %1497 = vmatmul.mubr.msk.bf16.gmra.mrb[4].mxu1 %vm322_vm3, %v1369_v34 }
  0x5f   : > { %1506 = vmatprep.mubr.msk.bf16.mxu1 %vm322_vm3, %v1377_v55 }
  0x62   : > { %1543 = vmatmul.mubr.msk.bf16.vlgmr.msra.gmra.mrb[0].mxu0 %vm322_vm3, %v1359_v56 }
  0x63   : > { %1546 = vmatprep.mubr.msk.bf16.mxu0 %vm322_vm3, %v1360_v13 }
  0x6a   : > { %1507 = vmatmul.mubr.msk.bf16.vlgmr.msra.gmra.mrb[4].mxu1 %vm322_vm3, %v1378_v3  ;;  %1547 = vmatmul.mubr.msk.bf16.gmra.mrb[4].mxu0 %vm322_vm3, %v1407_v32 }
 0x129   : > { %v1494_v2 = vpop.f32.mrb[0].mxu1 }
 0x12a   : > { %v706_v20 = vpop.f32.mrb[1].mxu1 }
 0x12b   : > { %v1495_v54 = vpop.f32.mrb[2].mxu1 }
 0x12c   : > { %v709_v61 = vpop.f32.mrb[3].mxu1 }
 0x135   : > { %v1544_v18 = vpop.f32.mrb[0].mxu0 }
 0x136   : > { %v1552_v19 = vadd.f32 %v1544_v18, %v1494_v2  ;;  %v1184_v28 = vpop.f32.mrb[1].mxu0 }
 0x137   : > { %v1553_v59 = vadd.f32 %v1184_v28, %v706_v20  ;;  %v1545_v5 = vpop.f32.mrb[2].mxu0 }
 0x138   : > { %v1225_v30 = vpack.c.bf16 %v1552_v19, %v1552_v19  ;;  %v1554_v31 = vadd.f32 %v1545_v5, %v1495_v54  ;;  %v1187_v33 = vpop.f32.mrb[3].mxu0 }
 0x139   : > { %v1223_v36 = vpack.c.bf16 %v1553_v59, %v1553_v59  ;;  %v1555_v37 = vadd.f32 %v1187_v33, %v709_v61 }
 0x13a   : > { %1234 = vst.msk [vmem:[%s2041_s14 + $0x8] sm:$0xf] %vm1231_vm8, %v1225_v30  ;;  %v1226_v38 = vpack.c.bf16 %v1554_v31, %v1554_v31 }
 0x13b   : > { %1232 = vst.msk [vmem:[%s2041_s14] sm:$0xf] %vm1231_vm8, %v1223_v36  ;;  %v1224_v25 = vpack.c.bf16 %v1555_v37, %v1555_v37 }
 0x13c   : > { %1235 = vst.msk [vmem:[%s2041_s14 + $0xc] sm:$0xf] %vm1231_vm8, %v1226_v38 }
 0x13d   : > { %v1508_v40 = vpop.f32.mrb[4].mxu1  ;;  %1233 = vst.msk [vmem:[%s2041_s14 + $0x4] sm:$0xf] %vm1231_vm8, %v1224_v25  ;;  %v1548_v41 = vpop.f32.mrb[4].mxu0 }
 0x13e   : > { %v831_v42 = vpop.f32.mrb[5].mxu1  ;;  %v1556_v43 = vadd.f32 %v1548_v41, %v1508_v40  ;;  %v1200_v44 = vpop.f32.mrb[5].mxu0 }
 0x13f   : > { %v1509_v45 = vpop.f32.mrb[6].mxu1  ;;  %v1557_v7 = vadd.f32 %v1200_v44, %v831_v42  ;;  %v1549_v35 = vpop.f32.mrb[6].mxu0 }
 0x140   : > { %v834_v46 = vpop.f32.mrb[7].mxu1  ;;  %v1229_v47 = vpack.c.bf16 %v1556_v43, %v1556_v43  ;;  %v1558_v6 = vadd.f32 %v1549_v35, %v1509_v45  ;;  %v1203_v48 = vpop.f32.mrb[7].mxu0 }
 0x141   : > { %v1227_v50 = vpack.c.bf16 %v1557_v7, %v1557_v7  ;;  %v1559_v51 = vadd.f32 %v1203_v48, %v834_v46 }
 0x142   : > { %1238 = vst.msk [vmem:[%s2041_s14 + $0x18] sm:$0xf] %vm1231_vm8, %v1229_v47  ;;  %v1230_v17 = vpack.c.bf16 %v1558_v6, %v1558_v6 }
 0x143   : > { %1236 = vst.msk [vmem:[%s2041_s14 + $0x10] sm:$0xf] %vm1231_vm8, %v1227_v50  ;;  %v1228_v52 = vpack.c.bf16 %v1559_v51, %v1559_v51 }
 0x144   : > { %1239 = vst.msk [vmem:[%s2041_s14 + $0x1c] sm:$0xf] %vm1231_vm8, %v1230_v17 }
 0x145   : > { %1237 = vst.msk [vmem:[%s2041_s14 + $0x14] sm:$0xf] %vm1231_vm8, %v1228_v52 }
 0x146 PF: > { %s12_s11 = sadd.s32 1, %s1682_s11   ;;  %s2075_s9 = smov %s1678_s10 }
 0x147   : > { %p9_p5 = scmp.ge.s32.totalorder %s12_s11, 4   ;;  %s2076_s10 = smov %s2078_s12 }
 0x149   :  { %11 = sbr.rel (!%p9_p5) target bundleno = 2 (0x2), region = 67 }

// kernel: down_forward.13
= control target key start
LH: loop header
LB: loop body
LE: loop exit
PB: predicated region body
PF: predicated region fallthrough
CT: control target
= control target key end

     0   :  { %s740_s12 = smov 0   ;;  %s954_s0 = inlined_call_operand.vmem [shape: bf16[2,64,8], index: 0, kind: input, shape index: {}]   ;;  %s955_s1 = inlined_call_operand.vmem [shape: f32[1,8], index: 1, kind: input, shape index: {}]   ;;  %s956_s2 = inlined_call_operand.vmem [shape: f32[1,8], index: 2, kind: input, shape index: {}]   ;;  %s957_s3 = inlined_call_operand.vmem [shape: bf16[2,64,8], index: 3, kind: output, shape index: {}]  }
   0x1 LB: > { %s614_s13 = sadd.s32 4294967295, %s718_s12   ;;  %p618_p0 = scmp.ge.s32.totalorder %s718_s12, 1  ;;  %s718_s12 = sphi %s740_s12, %s13_s12  }
   0x2   : > { %p137_p1 = scmp.lt.s32.totalorder %s718_s12, 3 }
   0x4   : > { %p138_p2 = pnand %p618_p0, %p137_p1 }
   0x5   : > { %p161_p3 = scmp.lt.s32.totalorder (!%p138_p2), %s614_s13, 1  ;;  %vm187_vm0 = vcmask (!%p138_p2), 64512   ;;  %vm550_vm9 = vcmask (!%p138_p2), 60416  }
   0x6   : > { %141 = sbr.rel (%p138_p2) target bundleno = 597 (0x255), region = 32 }
   0xd   : > { %s959_s13 = smov (!%p161_p3, %s614_s13), 1 }
   0xe   : > { %s635_s14 = sshll.u32 %s959_s13, 5 }
   0xf   : > { %s165_s17 = scalar_lea.vmem %s954_s0, %s635_s14  ;;  %s170_s30 = scalar_lea.vmem %s957_s3, %s635_s14 }
  0x10   : > { %v646_v0 = vld [vmem:[%s165_s17] sm:$0xff]   ;;  %v661_v1 = vld [vmem:[%s165_s17 + $0x8] sm:$0xff]   ;;  %v662_v2 = vld [vmem:[%s165_s17 + $0x10] sm:$0xff]  }
  0x11   : > { %v647_v3 = vunpack.c.l.bf16 %v646_v0  ;;  %v648_v4 = vunpack.c.h.bf16 %v646_v0  ;;  %v651_v5 = vunpack.c.l.bf16 %v661_v1  ;;  %v652_v6 = vunpack.c.h.bf16 %v661_v1  ;;  %v663_v11 = vld [vmem:[%s165_s17 + $0x18] sm:$0xff]  }
  0x12   : > { %v655_v7 = vunpack.c.l.bf16 %v662_v2  ;;  %v656_v13 = vunpack.c.h.bf16 %v662_v2  ;;  %v659_v16 = vunpack.c.l.bf16 %v663_v11  ;;  %v660_v19 = vunpack.c.h.bf16 %v663_v11 }
  0x13   : > { %v188_v8 = vsel %vm187_vm0, %v647_v3, 0.0  ;;  %v189_v9 = vsel %vm187_vm0, %v648_v4, 0.0  ;;  %v191_v10 = vsel %vm187_vm0, %v651_v5, 0.0  ;;  %v193_v14 = vsel %vm187_vm0, %v652_v6, 0.0 }
  0x14   : > { %v190_v12 = vadd.f32 %v189_v9, %v188_v8  ;;  %v195_v17 = vsel %vm187_vm0, %v655_v7, 0.0  ;;  %v197_v20 = vsel %vm187_vm0, %v656_v13, 0.0  ;;  %v199_v22 = vsel %vm187_vm0, %v659_v16, 0.0 }
  0x15   : > { %v201_v24 = vsel %vm187_vm0, %v660_v19, 0.0 }
  0x16   : > { %v192_v15 = vadd.f32 %v191_v10, %v190_v12  ;;  %v623_v12 = vld [vmem:[%s955_s1] ss:$0 sm:$0xff] }
  0x18   : > { %v194_v18 = vadd.f32 %v193_v14, %v192_v15 }
  0x1a   : > { %v196_v21 = vadd.f32 %v195_v17, %v194_v18 }
  0x1c   : > { %v198_v23 = vadd.f32 %v197_v20, %v196_v21  ;;  %v624_v21 = vld [vmem:[%s956_s2] ss:$0 sm:$0xff] }
  0x1e   : > { %v200_v25 = vadd.f32 %v199_v22, %v198_v23 }
  0x20   : > { %v202_v26 = vadd.f32 %v201_v24, %v200_v25 }
  0x22   : > { %203 = vadd.xlane.f32.xlu0 %v202_v26 }
  0xaf   : > { %v204_v27 = vpop.xlane.xlu0 %203 }
  0xb0   : > { %v205_v28 = vrot.slane %v204_v27, 4 }
  0xb2   : > { %v206_v29 = vadd.f32 %v205_v28, %v204_v27 }
  0xb4   : > { %v207_v30 = vrot.slane %v206_v29, 2 }
  0xb6   : > { %v208_v31 = vadd.f32 %v207_v30, %v206_v29 }
  0xb8   : > { %v209_v32 = vrot.slane %v208_v31, 1 }
  0xba   : > { %v210_v33 = vadd.f32 %v209_v32, %v208_v31 }
  0xbc   : > { %664 = vpush %v210_v33 }
  0xed   : > { %s665_s18 = spop %664 }
  0xee   : > { %s214_s19 = smul.f32 0.001953125, %s665_s18 }
  0xf0   : > { %v215_v34 = vstv %s214_s19 }
  0xf1   : > { %v216_v35 = vsub.f32 %v647_v3, %v215_v34  ;;  %v217_v36 = vsub.f32 %v648_v4, %v215_v34  ;;  %v218_v37 = vsub.f32 %v651_v5, %v215_v34  ;;  %v219_v38 = vsub.f32 %v652_v6, %v215_v34 }
  0xf2   : > { %v220_v39 = vsub.f32 %v655_v7, %v215_v34  ;;  %v221_v43 = vsub.f32 %v656_v13, %v215_v34  ;;  %v222_v48 = vsub.f32 %v659_v16, %v215_v34  ;;  %v223_v52 = vsub.f32 %v660_v19, %v215_v34 }
  0xf3   : > { %v224_v40 = vmul.f32 %v216_v35, %v216_v35  ;;  %v225_v41 = vmul.f32 %v217_v36, %v217_v36  ;;  %v226_v42 = vmul.f32 %v218_v37, %v218_v37  ;;  %v227_v44 = vmul.f32 %v219_v38, %v219_v38 }
  0xf4   : > { %v228_v49 = vmul.f32 %v220_v39, %v220_v39  ;;  %v229_v53 = vmul.f32 %v221_v43, %v221_v43  ;;  %v230_v56 = vmul.f32 %v222_v48, %v222_v48  ;;  %v231_v59 = vmul.f32 %v223_v52, %v223_v52 }
  0xf5   : > { %v232_v45 = vsel %vm187_vm0, %v224_v40, 0.0  ;;  %v233_v46 = vsel %vm187_vm0, %v225_v41, 0.0  ;;  %v235_v50 = vsel %vm187_vm0, %v226_v42, 0.0  ;;  %v237_v54 = vsel %vm187_vm0, %v227_v44, 0.0 }
  0xf6   : > { %v234_v47 = vadd.f32 %v233_v46, %v232_v45  ;;  %v239_v57 = vsel %vm187_vm0, %v228_v49, 0.0  ;;  %v241_v60 = vsel %vm187_vm0, %v229_v53, 0.0  ;;  %v243_v62 = vsel %vm187_vm0, %v230_v56, 0.0 }
  0xf7   : > { %v245_v0 = vsel %vm187_vm0, %v231_v59, 0.0 }
  0xf8   : > { %v236_v51 = vadd.f32 %v235_v50, %v234_v47 }
  0xfa   : > { %v238_v55 = vadd.f32 %v237_v54, %v236_v51 }
  0xfc   : > { %v240_v58 = vadd.f32 %v239_v57, %v238_v55 }
  0xfe   : > { %v242_v61 = vadd.f32 %v241_v60, %v240_v58 }
 0x100   : > { %v244_v63 = vadd.f32 %v243_v62, %v242_v61 }
 0x102   : > { %v246_v1 = vadd.f32 %v245_v0, %v244_v63 }
 0x104   : > { %247 = vadd.xlane.f32.xlu0 %v246_v1 }
 0x191   : > { %v248_v2 = vpop.xlane.xlu0 %247 }
 0x192   : > { %v249_v3 = vrot.slane %v248_v2, 4 }
 0x194   : > { %v250_v4 = vadd.f32 %v249_v3, %v248_v2 }
 0x196   : > { %v251_v5 = vrot.slane %v250_v4, 2 }
 0x198   : > { %v252_v6 = vadd.f32 %v251_v5, %v250_v4 }
 0x19a   : > { %v253_v7 = vrot.slane %v252_v6, 1 }
 0x19c   : > { %v254_v8 = vadd.f32 %v253_v7, %v252_v6 }
 0x19e   : > { %666 = vpush %v254_v8 }
 0x1cf   : > { %s667_s20 = spop %666 }
 0x1d0   : > { %s258_s21 = smul.f32 0.001953125, %s667_s20 }
 0x1d2   : > { %s259_s22 = sadd.f32 1e-05, %s258_s21 }
 0x1d4   : > { %v260_v9 = vstv %s259_s22 }
 0x1d5   : > { %678 = vrsqrt.f32 %v260_v9 }
 0x1df   : > { %v679_v10 = vpop.eup %678 }
 0x1e0   : > { %668 = vpush %v679_v10 }
 0x211   : > { %s669_s23 = spop %668 }
 0x212   : > { %v263_v11 = vstv %s669_s23 }
 0x213   : > { %v264_v13 = vmul.f32 %v263_v11, %v216_v35  ;;  %v265_v14 = vmul.f32 %v263_v11, %v217_v36  ;;  %v266_v15 = vmul.f32 %v263_v11, %v218_v37  ;;  %v267_v16 = vmul.f32 %v263_v11, %v219_v38 }
 0x214   : > { %v268_v17 = vmul.f32 %v263_v11, %v220_v39  ;;  %v269_v18 = vmul.f32 %v263_v11, %v221_v43  ;;  %v270_v19 = vmul.f32 %v263_v11, %v222_v48  ;;  %v271_v20 = vmul.f32 %v263_v11, %v223_v52 }
 0x215   : > { %v279_v22 = vmul.f32 %v623_v12, %v264_v13  ;;  %v280_v23 = vmul.f32 %v623_v12, %v265_v14  ;;  %v281_v24 = vmul.f32 %v623_v12, %v266_v15  ;;  %v282_v25 = vmul.f32 %v623_v12, %v267_v16 }
 0x216   : > { %v283_v26 = vmul.f32 %v623_v12, %v268_v17  ;;  %v284_v27 = vmul.f32 %v623_v12, %v269_v18  ;;  %v285_v28 = vmul.f32 %v623_v12, %v270_v19  ;;  %v286_v29 = vmul.f32 %v623_v12, %v271_v20 }
 0x217   : > { %v778_v30 = vadd.f32 %v624_v21, %v279_v22  ;;  %v780_v31 = vadd.f32 %v624_v21, %v280_v23  ;;  %v782_v32 = vadd.f32 %v624_v21, %v281_v24  ;;  %v784_v33 = vadd.f32 %v624_v21, %v282_v25 }
 0x218   : > { %v786_v34 = vadd.f32 %v624_v21, %v283_v26  ;;  %v788_v35 = vadd.f32 %v624_v21, %v284_v27  ;;  %v790_v36 = vadd.f32 %v624_v21, %v285_v28  ;;  %v792_v37 = vadd.f32 %v624_v21, %v286_v29 }
 0x219   : > { %v795_v38 = vmul.f32 0.70710677, %v778_v30  ;;  %v798_v39 = vmul.f32 0.70710677, %v780_v31  ;;  %v801_v40 = vmul.f32 0.70710677, %v782_v32 }
 0x21a   : > { %v804_v41 = vmul.f32 0.70710677, %v784_v33  ;;  %v807_v42 = vmul.f32 0.70710677, %v786_v34  ;;  %v810_v43 = vmul.f32 0.70710677, %v788_v35 }
 0x21b   : > { %v813_v44 = vmul.f32 0.70710677, %v790_v36  ;;  %v816_v45 = vmul.f32 0.70710677, %v792_v37  ;;  %v318_v46 = vand.u32 2147483647, %v795_v38 }
 0x21c   : > { %v319_v47 = vand.u32 2147483647, %v798_v39  ;;  %v320_v48 = vand.u32 2147483647, %v801_v40  ;;  %v321_v49 = vand.u32 2147483647, %v804_v41 }
 0x21d   : > { %v322_v50 = vand.u32 2147483647, %v807_v42  ;;  %v323_v51 = vand.u32 2147483647, %v810_v43  ;;  %v324_v52 = vand.u32 2147483647, %v813_v44 }
 0x21e   : > { %v325_v53 = vand.u32 2147483647, %v816_v45  ;;  %v326_v54 = vmul.f32 0.3275911, %v318_v46  ;;  %v327_v55 = vmul.f32 0.3275911, %v319_v47 }
 0x21f   : > { %v328_v56 = vmul.f32 0.3275911, %v320_v48  ;;  %v329_v57 = vmul.f32 0.3275911, %v321_v49  ;;  %v330_v58 = vmul.f32 0.3275911, %v322_v50 }
 0x220   : > { %v331_v59 = vmul.f32 0.3275911, %v323_v51  ;;  %v332_v60 = vmul.f32 0.3275911, %v324_v52  ;;  %v333_v61 = vmul.f32 0.3275911, %v325_v53 }
 0x221   : > { %v334_v62 = vadd.f32 1.0, %v326_v54  ;;  %v335_v63 = vadd.f32 1.0, %v327_v55  ;;  %v336_v0 = vadd.f32 1.0, %v328_v56  ;;  %v337_v1 = vadd.f32 1.0, %v329_v57 }
 0x222   : > { %v338_v2 = vadd.f32 1.0, %v330_v58  ;;  %v339_v3 = vadd.f32 1.0, %v331_v59  ;;  %v430_v4 = vsub.f32 0.0, %v318_v46  ;;  %v431_v5 = vsub.f32 0.0, %v319_v47 }
 0x223   : > { %680 = vrcp.f32 %v334_v62  ;;  %v432_v6 = vsub.f32 0.0, %v320_v48  ;;  %v340_v7 = vadd.f32 1.0, %v332_v60  ;;  %v433_v8 = vsub.f32 0.0, %v321_v49 }
 0x224   : > { %682 = vrcp.f32 %v335_v63  ;;  %v434_v9 = vsub.f32 0.0, %v322_v50  ;;  %v341_v10 = vadd.f32 1.0, %v333_v61  ;;  %v435_v11 = vsub.f32 0.0, %v323_v51 }
 0x225   : > { %684 = vrcp.f32 %v336_v0  ;;  %v438_v12 = vmul.f32 %v430_v4, %v318_v46  ;;  %v436_v13 = vsub.f32 0.0, %v324_v52  ;;  %v439_v14 = vmul.f32 %v431_v5, %v319_v47 }
 0x226   : > { %686 = vrcp.f32 %v337_v1  ;;  %v440_v15 = vmul.f32 %v432_v6, %v320_v48  ;;  %v437_v16 = vsub.f32 0.0, %v325_v53  ;;  %v441_v17 = vmul.f32 %v433_v8, %v321_v49 }
 0x227   : > { %688 = vrcp.f32 %v338_v2  ;;  %v442_v18 = vmul.f32 %v434_v9, %v322_v50  ;;  %v446_v19 = vmul.f32 1.442695, %v438_v12  ;;  %v443_v20 = vmul.f32 %v435_v11, %v323_v51 }
 0x228   : > { %690 = vrcp.f32 %v339_v3  ;;  %v448_v21 = vmul.f32 1.442695, %v439_v14  ;;  %v444_v22 = vmul.f32 %v436_v13, %v324_v52  ;;  %v450_v23 = vmul.f32 1.442695, %v440_v15 }
 0x229   : > { %692 = vrcp.f32 %v340_v7  ;;  %v445_v24 = vmul.f32 %v437_v16, %v325_v53  ;;  %v452_v25 = vmul.f32 1.442695, %v441_v17  ;;  %v827_v26 = vmul.f32 0.5, %v778_v30 }
 0x22a   : > { %694 = vrcp.f32 %v341_v10  ;;  %v830_v27 = vmul.f32 0.5, %v780_v31  ;;  %v454_v28 = vmul.f32 1.442695, %v442_v18  ;;  %v835_v46 = vmul.f32 0.5, %v782_v32 }
 0x22b   : > { %696 = vpow2.f32 %v446_v19  ;;  %v838_v47 = vmul.f32 0.5, %v784_v33  ;;  %v456_v48 = vmul.f32 1.442695, %v443_v20  ;;  %v843_v30 = vmul.f32 0.5, %v786_v34 }
 0x22c   : > { %698 = vpow2.f32 %v448_v21  ;;  %v458_v50 = vmul.f32 1.442695, %v444_v22  ;;  %v849_v52 = vmul.f32 0.5, %v788_v35  ;;  %v460_v33 = vmul.f32 1.442695, %v445_v24 }
 0x22d   : > { %v832_v29 = vpop.eup %680  ;;  %700 = vpow2.f32 %v450_v23  ;;  %v855_v54 = vmul.f32 0.5, %v790_v36  ;;  %v861_v57 = vmul.f32 0.5, %v792_v37  ;;  %vm478_vm1 = vcmp.ge.f32.partialorder %v795_v38, 0.0 }
 0x22e   : > { %v840_v49 = vpop.eup %682  ;;  %v358_v31 = vmul.f32 1.0614054, %v832_v29  ;;  %702 = vpow2.f32 %v452_v25  ;;  %vm479_vm2 = vcmp.ge.f32.partialorder %v798_v39, 0.0  ;;  %vm480_vm3 = vcmp.ge.f32.partialorder %v801_v40, 0.0 }
 0x22f   : > { %v846_v51 = vpop.eup %684  ;;  %v359_v32 = vmul.f32 1.0614054, %v840_v49  ;;  %704 = vpow2.f32 %v454_v28  ;;  %vm481_vm4 = vcmp.ge.f32.partialorder %v804_v41, 0.0  ;;  %vm482_vm5 = vcmp.ge.f32.partialorder %v807_v42, 0.0 }
 0x230   : > { %v852_v53 = vpop.eup %686  ;;  %v360_v34 = vmul.f32 1.0614054, %v846_v51  ;;  %v366_v55 = vadd.f32 -1.4531521, %v358_v31  ;;  %706 = vpow2.f32 %v456_v48  ;;  %vm483_vm6 = vcmp.ge.f32.partialorder %v810_v43, 0.0 }
 0x231   : > { %v858_v56 = vpop.eup %688  ;;  %v361_v35 = vmul.f32 1.0614054, %v852_v53  ;;  %v367_v58 = vadd.f32 -1.4531521, %v359_v32  ;;  %708 = vpow2.f32 %v458_v50  ;;  %vm484_vm7 = vcmp.ge.f32.partialorder %v813_v44, 0.0 }
 0x232   : > { %v864_v59 = vpop.eup %690  ;;  %v362_v60 = vmul.f32 1.0614054, %v858_v56  ;;  %v368_v61 = vadd.f32 -1.4531521, %v360_v34  ;;  %v374_v36 = vmul.f32 %v832_v29, %v366_v55  ;;  %710 = vpow2.f32 %v460_v33 }
 0x233   : > { %v868_v62 = vpop.eup %692  ;;  %v363_v63 = vmul.f32 1.0614054, %v864_v59  ;;  %v369_v0 = vadd.f32 -1.4531521, %v361_v35  ;;  %v375_v37 = vmul.f32 %v840_v49, %v367_v58  ;;  %vm485_vm8 = vcmp.ge.f32.partialorder %v816_v45, 0.0 }
 0x234   : > { %v872_v1 = vpop.eup %694  ;;  %v364_v2 = vmul.f32 1.0614054, %v868_v62  ;;  %v370_v3 = vadd.f32 -1.4531521, %v362_v60  ;;  %v376_v4 = vmul.f32 %v846_v51, %v368_v61  ;;  %v382_v5 = vadd.f32 1.4214138, %v374_v36 }
 0x235   : > { %v365_v6 = vmul.f32 1.0614054, %v872_v1  ;;  %v371_v7 = vadd.f32 -1.4531521, %v363_v63  ;;  %v377_v8 = vmul.f32 %v852_v53, %v369_v0  ;;  %v383_v9 = vadd.f32 1.4214138, %v375_v37  ;;  %v697_v10 = vpop.eup %696 }
 0x236   : > { %v372_v11 = vadd.f32 -1.4531521, %v364_v2  ;;  %v378_v12 = vmul.f32 %v858_v56, %v370_v3  ;;  %v384_v13 = vadd.f32 1.4214138, %v376_v4  ;;  %v390_v14 = vmul.f32 %v832_v29, %v382_v5  ;;  %v699_v15 = vpop.eup %698 }
 0x237   : > { %v373_v16 = vadd.f32 -1.4531521, %v365_v6  ;;  %v379_v17 = vmul.f32 %v864_v59, %v371_v7  ;;  %v385_v18 = vadd.f32 1.4214138, %v377_v8  ;;  %v391_v19 = vmul.f32 %v840_v49, %v383_v9  ;;  %v701_v20 = vpop.eup %700 }
 0x238   : > { %v380_v21 = vmul.f32 %v868_v62, %v372_v11  ;;  %v386_v22 = vadd.f32 1.4214138, %v378_v12  ;;  %v392_v23 = vmul.f32 %v846_v51, %v384_v13  ;;  %v398_v24 = vadd.f32 -0.28449672, %v390_v14  ;;  %v703_v25 = vpop.eup %702 }
 0x239   : > { %v381_v28 = vmul.f32 %v872_v1, %v373_v16  ;;  %v387_v48 = vadd.f32 1.4214138, %v379_v17  ;;  %v393_v31 = vmul.f32 %v852_v53, %v385_v18  ;;  %v399_v50 = vadd.f32 -0.28449672, %v391_v19  ;;  %v705_v32 = vpop.eup %704 }
 0x23a   : > { %v388_v33 = vadd.f32 1.4214138, %v380_v21  ;;  %v394_v34 = vmul.f32 %v858_v56, %v386_v22  ;;  %v400_v55 = vadd.f32 -0.28449672, %v392_v23  ;;  %v406_v35 = vmul.f32 %v832_v29, %v398_v24  ;;  %v707_v58 = vpop.eup %706 }
 0x23b   : > { %v389_v60 = vadd.f32 1.4214138, %v381_v28  ;;  %v395_v61 = vmul.f32 %v864_v59, %v387_v48  ;;  %v401_v36 = vadd.f32 -0.28449672, %v393_v31  ;;  %v407_v63 = vmul.f32 %v840_v49, %v399_v50  ;;  %v709_v0 = vpop.eup %708 }
 0x23c   : > { %v396_v37 = vmul.f32 %v868_v62, %v388_v33  ;;  %v402_v2 = vadd.f32 -0.28449672, %v394_v34  ;;  %v408_v3 = vmul.f32 %v846_v51, %v400_v55  ;;  %v414_v4 = vadd.f32 0.2548296, %v406_v35  ;;  %v711_v5 = vpop.eup %710 }
 0x23d   : > { %v397_v6 = vmul.f32 %v872_v1, %v389_v60  ;;  %v403_v7 = vadd.f32 -0.28449672, %v395_v61  ;;  %v409_v8 = vmul.f32 %v852_v53, %v401_v36  ;;  %v415_v9 = vadd.f32 0.2548296, %v407_v63 }
 0x23e   : > { %v404_v11 = vadd.f32 -0.28449672, %v396_v37  ;;  %v410_v12 = vmul.f32 %v858_v56, %v402_v2  ;;  %v416_v13 = vadd.f32 0.2548296, %v408_v3  ;;  %v422_v14 = vmul.f32 %v832_v29, %v414_v4 }
 0x23f   : > { %v405_v16 = vadd.f32 -0.28449672, %v397_v6  ;;  %v411_v17 = vmul.f32 %v864_v59, %v403_v7  ;;  %v417_v18 = vadd.f32 0.2548296, %v409_v8  ;;  %v423_v19 = vmul.f32 %v840_v49, %v415_v9 }
 0x240   : > { %v412_v21 = vmul.f32 %v868_v62, %v404_v11  ;;  %v418_v22 = vadd.f32 0.2548296, %v410_v12  ;;  %v424_v23 = vmul.f32 %v846_v51, %v416_v13  ;;  %v462_v24 = vmul.f32 %v697_v10, %v422_v14 }
 0x241   : > { %v413_v29 = vmul.f32 %v872_v1, %v405_v16  ;;  %v419_v28 = vadd.f32 0.2548296, %v411_v17  ;;  %v425_v48 = vmul.f32 %v852_v53, %v417_v18  ;;  %v463_v31 = vmul.f32 %v699_v15, %v423_v19 }
 0x242   : > { %v420_v50 = vadd.f32 0.2548296, %v412_v21  ;;  %v426_v49 = vmul.f32 %v858_v56, %v418_v22  ;;  %v464_v33 = vmul.f32 %v701_v20, %v424_v23  ;;  %v470_v34 = vsub.f32 1.0, %v462_v24 }
 0x243   : > { %v421_v55 = vadd.f32 0.2548296, %v413_v29  ;;  %v427_v51 = vmul.f32 %v864_v59, %v419_v28  ;;  %v465_v10 = vmul.f32 %v703_v25, %v425_v48  ;;  %v471_v35 = vsub.f32 1.0, %v463_v31 }
 0x244   : > { %v428_v60 = vmul.f32 %v868_v62, %v420_v50  ;;  %v466_v53 = vmul.f32 %v705_v32, %v426_v49  ;;  %v472_v15 = vsub.f32 1.0, %v464_v33  ;;  %v486_v61 = vsub.f32 0.0, %v470_v34 }
 0x245   : > { %v429_v56 = vmul.f32 %v872_v1, %v421_v55  ;;  %v467_v20 = vmul.f32 %v707_v58, %v427_v51  ;;  %v473_v36 = vsub.f32 1.0, %v465_v10  ;;  %v487_v63 = vsub.f32 0.0, %v471_v35 }
 0x246   : > { %v468_v37 = vmul.f32 %v709_v0, %v428_v60  ;;  %v474_v2 = vsub.f32 1.0, %v466_v53  ;;  %v488_v59 = vsub.f32 0.0, %v472_v15  ;;  %v494_v25 = vsel %vm478_vm1, %v470_v34, %v486_v61 }
 0x247   : > { %v469_v3 = vmul.f32 %v711_v5, %v429_v56  ;;  %v475_v4 = vsub.f32 1.0, %v467_v20  ;;  %v489_v62 = vsub.f32 0.0, %v473_v36  ;;  %v495_v32 = vsel %vm479_vm2, %v471_v35, %v487_v63 }
 0x248   : > { %v476_v6 = vsub.f32 1.0, %v468_v37  ;;  %v490_v7 = vsub.f32 0.0, %v474_v2  ;;  %v496_v1 = vsel %vm480_vm3, %v472_v15, %v488_v59  ;;  %v502_v58 = vadd.f32 1.0, %v494_v25 }
 0x249   : > { %v477_v8 = vsub.f32 1.0, %v469_v3  ;;  %v491_v0 = vsub.f32 0.0, %v475_v4  ;;  %v497_v9 = vsel %vm481_vm4, %v473_v36, %v489_v62  ;;  %v503_v38 = vadd.f32 1.0, %v495_v32 }
 0x24a   : > { %v492_v11 = vsub.f32 0.0, %v476_v6  ;;  %v498_v5 = vsel %vm482_vm5, %v474_v2, %v490_v7  ;;  %v504_v12 = vadd.f32 1.0, %v496_v1  ;;  %v505_v39 = vadd.f32 1.0, %v497_v9 }
 0x24b   : > { %v493_v13 = vsub.f32 0.0, %v477_v8  ;;  %v499_v14 = vsel %vm483_vm6, %v475_v4, %v491_v0  ;;  %v506_v40 = vadd.f32 1.0, %v498_v5  ;;  %v510_v16 = vmul.f32 %v502_v58, %v827_v26 }
 0x24c   : > { %v500_v17 = vsel %vm484_vm7, %v476_v6, %v492_v11  ;;  %v507_v18 = vadd.f32 1.0, %v499_v14  ;;  %v511_v41 = vmul.f32 %v503_v38, %v830_v27  ;;  %v512_v19 = vmul.f32 %v504_v12, %v835_v46 }
 0x24d   : > { %v501_v42 = vsel %vm485_vm8, %v477_v8, %v493_v13  ;;  %v508_v43 = vadd.f32 1.0, %v500_v17  ;;  %v513_v21 = vmul.f32 %v505_v39, %v838_v47  ;;  %v514_v26 = vmul.f32 %v506_v40, %v843_v30 }
 0x24e   : > { %v509_v44 = vadd.f32 1.0, %v501_v42  ;;  %v515_v22 = vmul.f32 %v507_v18, %v849_v52  ;;  %v637_v23 = vpack.c.bf16 %v510_v16, %v510_v16  ;;  %v638_v27 = vpack.c.bf16 %v511_v41, %v511_v41 }
 0x24f   : > { %v516_v46 = vmul.f32 %v508_v43, %v855_v54  ;;  %v639_v24 = vpack.c.bf16 %v512_v19, %v512_v19  ;;  %v640_v29 = vpack.c.bf16 %v513_v21, %v513_v21  ;;  %v641_v28 = vpack.c.bf16 %v514_v26, %v514_v26 }
 0x250   : > { %v517_v48 = vmul.f32 %v509_v44, %v861_v57  ;;  %v642_v31 = vpack.c.bf16 %v515_v22, %v515_v22  ;;  %551 = vst.msk [vmem:[%s170_s30] sm:$0xf] %vm550_vm9, %v637_v23  ;;  %552 = vst.msk [vmem:[%s170_s30 + $0x4] sm:$0xf] %vm550_vm9, %v638_v27 }
 0x251   : > { %v643_v45 = vpack.c.bf16 %v516_v46, %v516_v46  ;;  %553 = vst.msk [vmem:[%s170_s30 + $0x8] sm:$0xf] %vm550_vm9, %v639_v24  ;;  %554 = vst.msk [vmem:[%s170_s30 + $0xc] sm:$0xf] %vm550_vm9, %v640_v29 }
 0x252   : > { %555 = vst.msk [vmem:[%s170_s30 + $0x10] sm:$0xf] %vm550_vm9, %v641_v28  ;;  %v644_v47 = vpack.c.bf16 %v517_v48, %v517_v48  ;;  %556 = vst.msk [vmem:[%s170_s30 + $0x14] sm:$0xf] %vm550_vm9, %v642_v31 }
 0x253   : > { %557 = vst.msk [vmem:[%s170_s30 + $0x18] sm:$0xf] %vm550_vm9, %v643_v45 }
 0x254   : > { %558 = vst.msk [vmem:[%s170_s30 + $0x1c] sm:$0xf] %vm550_vm9, %v644_v47 }
 0x255 PF: > { %s13_s12 = sadd.s32 1, %s718_s12  }
 0x256   : > { %p10_p4 = scmp.ge.s32.totalorder %s13_s12, 4  }
 0x258   :  { %12 = sbr.rel (!%p10_p4) target bundleno = 1 (0x1), region = 62 }

// kernel: down_forward.12
= control target key start
LH: loop header
LB: loop body
LE: loop exit
PB: predicated region body
PF: predicated region fallthrough
CT: control target
= control target key end

     0   :  { %s1699_s9 = smov 0   ;;  %s1701_s10 = smov 0   ;;  %s2068_s0 = inlined_call_operand.vmem [shape: bf16[2,10,10,4], index: 0, kind: input, shape index: {}]   ;;  %s2069_s1 = inlined_call_operand.vmem [shape: bf16[9,4,8], index: 1, kind: input, shape index: {}]   ;;  %s2070_s2 = inlined_call_operand.vmem [shape: bf16[2,8,8,8], index: 2, kind: output, shape index: {}]  }
   0x1   :  { %s1703_s11 = smov 0  }
   0x2 LB: > { %s24_s12 = sadd.s32 1, %s1678_s10  ;;  %p1327_p0 = scmp.ge.s32.totalorder %s1682_s11, 1  ;;  %s1682_s11 = sphi %s1703_s11, %s12_s11   ;;  %s1678_s10 = sphi %s1701_s10, %s2076_s10   ;;  %s1674_s9 = sphi %s1699_s9, %s2075_s9  }
   0x3   : > { %p26_p1 = scmp.ge.s32.totalorder %s24_s12, 2  ;;  %p126_p2 = scmp.lt.s32.totalorder %s1682_s11, 3 }
   0x5   : > { %s2078_s12 = smov (%p26_p1, %s24_s12), 0  ;;  %p127_p3 = pnand %p1327_p0, %p126_p2 }
   0x6   : > { %v1331_v0 = vld [vmem:[%s2069_s1 + $0x2] sm:$0x3] (!%p127_p3)  ;;  %vm335_vm0 = vcmask (!%p127_p3), 1041408   ;;  %v1723_v1 = vld [vmem:[%s2069_s1 + $0x8] sm:$0x3] (!%p127_p3)  ;;  %p152_p4 = scmp.lt.s32.totalorder (!%p127_p3), %s1674_s9, 1 }
   0x7   : > { %130 = sbr.rel (%p127_p3) target bundleno = 326 (0x146), region = 28  ;;  %1616 = vmatprep.subr.msk.bf16.mxu1 (!%p127_p3), %vm335_vm0, %v1331_v0  ;;  %1620 = vmatprep.subr.msk.bf16.mxu0 (!%p127_p3), %vm335_vm0, %v1723_v1  ;;  %v337_v2 = vsel (!%p127_p3), %vm335_vm0, %v1331_v0, 0  ;;  %v1731_v3 = vsel (!%p127_p3), %vm335_vm0, %v1723_v1, 0  ;;  %v192_v4 = vld [vmem:[%s2069_s1] sm:$0x3] (!%p127_p3)  ;;  %vm322_vm3 = vcmask (!%p127_p3), 31744  }
   0x8   : > { %1461 = vmatpush3.bf16.msra.mxu1 (!%p127_p3), %v337_v2  ;;  %1501 = vmatpush3.bf16.msra.mxu0 (!%p127_p3), %v1731_v3  ;;  %v1384_v5 = vld [vmem:[%s2069_s1 + $0xa] sm:$0x3] (!%p127_p3)  ;;  %vm193_vm1 = vsmask.f32 (!%p127_p3), 3328  ;;  %vm194_vm2 = vsmask.f32 (!%p127_p3), 7440 }
   0x9   : > { %1617 = vmatprep.subr.msk.bf16.mxu1 (!%p127_p3), %vm335_vm0, %v192_v4  ;;  %1622 = vmatprep.subr.msk.bf16.mxu0 (!%p127_p3), %vm335_vm0, %v1384_v5  ;;  %v1772_v17 = vsel (!%p127_p3), %vm335_vm0, %v192_v4, 0  ;;  %v1775_v18 = vsel (!%p127_p3), %vm335_vm0, %v1384_v5, 0  ;;  %vm1791_vm4 = vmor (!%p127_p3), %vm193_vm1, %vm194_vm2  ;;  %vm512_vm5 = vcmask (!%p127_p3), 1042432   ;;  %vm513_vm6 = vcmask (!%p127_p3), 1046532  }
   0xa   : > { %vm1862_vm7 = vmor (!%p127_p3), %vm512_vm5, %vm513_vm6  ;;  %vm1231_vm8 = vcmask (!%p127_p3), 60416  }
   0xe   : > { %s2080_s9 = smov (!%p152_p4, %s1674_s9), 1 }
   0xf   : > { %s1626_s21 = smul.u32 80, %s2080_s9  ;;  %s1414_s7 = sshll.u32 %s2080_s9, 5 }
  0x10   : > { %s2041_s14 = scalar_lea.vmem %s2070_s2, %s1414_s7 }
  0x11   : > { %s1748_s24 = scalar_lea.vmem %s2068_s0, %s1626_s21 }
  0x12   : > { %v1751_v6 = vld [vmem:[%s1748_s24] sm:$0xf]  ;;  %v1754_v7 = vld [vmem:[%s1748_s24 + $0x4] sm:$0x1]  ;;  %v1757_v8 = vld [vmem:[%s1748_s24 + $0x8] sm:$0xf] }
  0x13   : > { %v1760_v9 = vld [vmem:[%s1748_s24 + $0xc] sm:$0x1]  ;;  %v197_v10 = vshrl.u32 %v1751_v6, 16  ;;  %v200_v11 = vshll.u32 %v1751_v6, 16  ;;  %v206_v12 = vshll.u32 %v1754_v7, 16  ;;  %v211_v13 = vshrl.u32 %v1757_v8, 16 }
  0x14   : > { %v214_v14 = vshll.u32 %v1757_v8, 16  ;;  %v220_v15 = vshll.u32 %v1760_v9, 16  ;;  %v1769_v16 = vld [vmem:[%s1748_s24 + $0x10] sm:$0xf]  ;;  %v521_v22 = vrot.slane %v1760_v9, 5  ;;  %v1340_v9 = vcombine.low %v1751_v6, %v1757_v8 }
  0x15   : > { %v199_v19 = vrot.slane %v197_v10, 4  ;;  %v202_v20 = vrot.slane %v200_v11, 5  ;;  %v213_v21 = vrot.slane %v211_v13, 4  ;;  %v1779_v23 = vld [vmem:[%s1748_s24 + $0x14] sm:$0x1]  ;;  %v208_v24 = vrot.slane %v206_v12, 5 }
  0x16   : > { %v216_v25 = vrot.slane %v214_v14, 5  ;;  %v1782_v26 = vld [vmem:[%s1748_s24 + $0x18] sm:$0xf]  ;;  %v1785_v27 = vld [vmem:[%s1748_s24 + $0x1c] sm:$0x1]  ;;  %v222_v29 = vrot.slane %v220_v15, 5 }
  0x17   : > { %v203_v28 = vor.u32 %v202_v20, %v199_v19  ;;  %v225_v30 = vshrl.u32 %v1769_v16, 16  ;;  %v228_v31 = vshll.u32 %v1769_v16, 16  ;;  %v1796_v34 = vld [vmem:[%s1748_s24 + $0x20] sm:$0xf]  ;;  %v234_v35 = vshll.u32 %v1779_v23, 16 }
  0x18   : > { %v217_v33 = vor.u32 %v216_v25, %v213_v21  ;;  %v239_v36 = vshrl.u32 %v1782_v26, 16  ;;  %v242_v37 = vshll.u32 %v1782_v26, 16  ;;  %v1802_v39 = vld [vmem:[%s1748_s24 + $0x24] sm:$0x1]  ;;  %v248_v42 = vshll.u32 %v1785_v27, 16 }
  0x19   : > { %v204_v38 = vrot.slane %v203_v28, 4  ;;  %v227_v40 = vrot.slane %v225_v30, 4  ;;  %v230_v41 = vrot.slane %v228_v31, 5  ;;  %v236_v44 = vrot.slane %v234_v35, 5  ;;  %v1813_v55 = vld [vmem:[%s1748_s24 + $0x28] sm:$0xf] }
  0x1a   : > { %v218_v43 = vrot.slane %v217_v33, 4  ;;  %v241_v45 = vrot.slane %v239_v36, 4  ;;  %v244_v46 = vrot.slane %v242_v37, 5  ;;  %v250_v49 = vrot.slane %v248_v42, 5  ;;  %v1817_v60 = vld [vmem:[%s1748_s24 + $0x2c] sm:$0x1] }
  0x1b   : > { %v209_v47 = vsel %vm1791_vm4, %v204_v38, %v208_v24  ;;  %v231_v48 = vor.u32 %v230_v41, %v227_v40  ;;  %v253_v50 = vshrl.u32 %v1796_v34, 16  ;;  %v256_v53 = vshll.u32 %v1796_v34, 16  ;;  %v1821_v2 = vld [vmem:[%s1748_s24 + $0x30] sm:$0xf]  ;;  %v1830_v12 = vld [vmem:[%s1748_s24 + $0x34] sm:$0x1] }
  0x1c   : > { %v223_v51 = vsel %vm1791_vm4, %v218_v43, %v222_v29  ;;  %v245_v52 = vor.u32 %v244_v46, %v241_v45  ;;  %v262_v54 = vshll.u32 %v1802_v39, 16  ;;  %v525_v59 = vrot.slane %v1779_v23, 5  ;;  %v1836_v20 = vld [vmem:[%s1748_s24 + $0x38] sm:$0xf]  ;;  %v1841_v25 = vld [vmem:[%s1748_s24 + $0x3c] sm:$0x1] }
  0x1d   : > { %v1332_v56 = vcombine.low %v209_v47, %v223_v51  ;;  %v232_v57 = vrot.slane %v231_v48, 4  ;;  %v255_v58 = vrot.slane %v253_v50, 4  ;;  %v258_v62 = vrot.slane %v256_v53, 5  ;;  %v1850_v35 = vld [vmem:[%s2069_s1 + $0x4] sm:$0x3] }
  0x1e   : > { %v246_v61 = vrot.slane %v245_v52, 4  ;;  %v264_v63 = vrot.slane %v262_v54, 5  ;;  %v529_v0 = vrot.slane %v1785_v27, 5  ;;  %v533_v5 = vrot.slane %v1802_v39, 5  ;;  %v1393_v53 = vld [vmem:[%s2069_s1 + $0xc] sm:$0x3] }
  0x1f   : > { %1462 = vmatprep.mubr.msk.bf16.mxu1 %vm322_vm3, %v1332_v56  ;;  %v237_v4 = vsel %vm1791_vm4, %v232_v57, %v236_v44  ;;  %v267_v10 = vshrl.u32 %v1813_v55, 16  ;;  %v270_v11 = vshll.u32 %v1813_v55, 16  ;;  %v259_v14 = vor.u32 %v258_v62, %v255_v58 }
  0x20   : > { %v251_v13 = vsel %vm1791_vm4, %v246_v61, %v250_v49  ;;  %v1375_v15 = vcombine.low %v223_v51, %v237_v4  ;;  %v276_v19 = vshll.u32 %v1817_v60, 16  ;;  %v281_v28 = vshrl.u32 %v1821_v2, 16  ;;  %v1406_v49 = vld [vmem:[%s2069_s1 + $0x10] sm:$0x3] }
  0x21   : > { %v1838_v21 = vcombine.low %v237_v4, %v251_v13  ;;  %v269_v23 = vrot.slane %v267_v10, 4  ;;  %v272_v24 = vrot.slane %v270_v11, 5  ;;  %v260_v29 = vrot.slane %v259_v14, 4 }
  0x22   : > { %1502 = vmatprep.mubr.msk.bf16.mxu0 %vm322_vm3, %v1375_v15  ;;  %v278_v30 = vrot.slane %v276_v19, 5  ;;  %v284_v31 = vshll.u32 %v1821_v2, 16  ;;  %v290_v33 = vshll.u32 %v1830_v12, 16  ;;  %v283_v37 = vrot.slane %v281_v28, 4  ;;  %v1927_v28 = vld [vmem:[%s1748_s24 + $0x40] sm:$0xf] }
  0x23   : > { %1463 = vmatmul.mubr.msk.bf16.vlgmr.msra.gmra.mrb[0].mxu1 %vm322_vm3, %v1838_v21  ;;  %v273_v36 = vor.u32 %v272_v24, %v269_v23  ;;  %v295_v38 = vshrl.u32 %v1836_v20, 16  ;;  %v298_v40 = vshll.u32 %v1836_v20, 16  ;;  %v265_v41 = vsel %vm1791_vm4, %v260_v29, %v264_v63  ;;  %v1930_v29 = vld [vmem:[%s1748_s24 + $0x44] sm:$0x1] }
  0x24   : > { %1471 = vmatpush3.bf16.msra.mxu1 %v1772_v17  ;;  %v286_v42 = vrot.slane %v284_v31, 5  ;;  %v292_v43 = vrot.slane %v290_v33, 5  ;;  %v304_v44 = vshll.u32 %v1841_v25, 16  ;;  %v1376_v45 = vcombine.low %v251_v13, %v265_v41 }
  0x25   : > { %v274_v46 = vrot.slane %v273_v36, 4  ;;  %v297_v47 = vrot.slane %v295_v38, 4  ;;  %v300_v48 = vrot.slane %v298_v40, 5  ;;  %1618 = vmatprep.subr.msk.bf16.mxu1 %vm335_vm0, %v1850_v35  ;;  %v1349_v17 = vrot.slane %v1757_v8, 9 }
  0x26   : > { %v287_v50 = vor.u32 %v286_v42, %v283_v37  ;;  %v306_v51 = vrot.slane %v304_v44, 5  ;;  %v1350_v52 = vrot.slane %v1769_v16, 9  ;;  %1503 = vmatmul.mubr.msk.bf16.vlgmr.msra.gmra.mrb[0].mxu0 %vm322_vm3, %v1376_v45  ;;  %v1351_v57 = vrot.slane %v1782_v26, 9  ;;  %v1399_v37 = vld [vmem:[%s2069_s1 + $0xe] sm:$0x3] }
  0x27   : > { %v1876_v54 = vsel %vm1791_vm4, %v274_v46, %v278_v30  ;;  %v301_v56 = vor.u32 %v300_v48, %v297_v47  ;;  %v1352_v58 = vrot.slane %v1796_v34, 9  ;;  %1511 = vmatpush3.bf16.msra.mxu0 %v1775_v18  ;;  %v522_v63 = vsel %vm1862_vm7, %v1349_v17, %v521_v22  ;;  %v190_v44 = vld [vmem:[%s1748_s24 + $0x48] sm:$0xf]  ;;  %v191_v45 = vld [vmem:[%s1748_s24 + $0x4c] sm:$0x1] }
  0x28   : > { %v1882_v61 = vcombine.low %v265_v41, %v1876_v54  ;;  %v288_v62 = vrot.slane %v287_v50, 4  ;;  %v526_v4 = vsel %vm1862_vm7, %v1350_v52, %v525_v59  ;;  %1623 = vmatprep.subr.msk.bf16.mxu0 %vm335_vm0, %v1393_v53  ;;  %v1353_v22 = vrot.slane %v1813_v55, 9 }
  0x29   : > { %v302_v10 = vrot.slane %v301_v56, 4  ;;  %v1385_v11 = vcombine.low %v522_v63, %v526_v4  ;;  %v537_v13 = vrot.slane %v1817_v60, 5  ;;  %v1354_v14 = vrot.slane %v1821_v2, 9 }
  0x2a   : > { %1466 = vmatprep.mubr.msk.bf16.mxu1 %vm322_vm3, %v1882_v61  ;;  %v1895_v18 = vsel %vm1791_vm4, %v288_v62, %v292_v43  ;;  %v541_v15 = vrot.slane %v1830_v12, 5  ;;  %v530_v23 = vsel %vm1862_vm7, %v1351_v57, %v529_v0  ;;  %v534_v24 = vsel %vm1862_vm7, %v1352_v58, %v533_v5 }
  0x2b   : > { %v1902_v59 = vsel %vm1791_vm4, %v302_v10, %v306_v51  ;;  %1512 = vmatprep.mubr.msk.bf16.mxu0 %vm322_vm3, %v1385_v11  ;;  %v538_v60 = vsel %vm1862_vm7, %v1353_v22, %v537_v13  ;;  %v1386_v27 = vcombine.low %v530_v23, %v534_v24  ;;  %v1355_v39 = vrot.slane %v1836_v20, 9 }
  0x2c   : > { %v1910_v19 = vcombine.low %v1895_v18, %v1902_v59  ;;  %v1924_v12 = vsel %vm1862_vm7, %v1354_v14, %v541_v15  ;;  %v545_v5 = vrot.slane %v1841_v25, 5  ;;  %v1383_v30 = vrot.slane %v1927_v28, 9 }
  0x2d   : > { %v1387_v0 = vcombine.low %v538_v60, %v1924_v12  ;;  %v857_v31 = vrot.slane %v1930_v29, 5  ;;  %v963_v33 = vsel %vm335_vm0, %v1393_v53, 0  ;;  %v1341_v36 = vcombine.low %v1769_v16, %v1782_v26 }
  0x2e   : > { %1467 = vmatmul.mubr.msk.bf16.gmra.mrb[4].mxu1 %vm322_vm3, %v1910_v19  ;;  %v574_v38 = vsel %vm335_vm0, %v1850_v35, 0  ;;  %v1342_v25 = vcombine.low %v1796_v34, %v1813_v55  ;;  %v517_v40 = vrot.slane %v1754_v7, 5  ;;  %v546_v41 = vsel %vm1862_vm7, %v1355_v39, %v545_v5  ;;  %v1365_v7 = vld [vmem:[%s2069_s1 + $0x6] sm:$0x3] }
  0x2f   : > { %1472 = vmatprep.mubr.msk.bf16.mxu1 %vm322_vm3, %v1340_v9  ;;  %v1957_v42 = vsel %vm1862_vm7, %v1383_v30, %v857_v31  ;;  %v1348_v43 = vrot.slane %v1751_v6, 9  ;;  %v1405_v35 = vrot.slane %v190_v44, 9  ;;  %v1138_v46 = vrot.slane %v191_v45, 5 }
  0x30   : > { %v1388_v47 = vcombine.low %v546_v41, %v1957_v42  ;;  %v1343_v50 = vcombine.low %v1821_v2, %v1836_v20  ;;  %v1060_v17 = vsel %vm335_vm0, %v1399_v37, 0  ;;  %v1358_v52 = vcombine.low %v526_v4, %v530_v23 }
  0x31   : > { %v1971_v6 = vsel %vm1862_vm7, %v1405_v35, %v1138_v46  ;;  %v518_v48 = vsel %vm1862_vm7, %v1348_v43, %v517_v40  ;;  %v670_v53 = vsel %vm335_vm0, %v1365_v7, 0  ;;  %v1359_v56 = vcombine.low %v534_v24, %v538_v60 }
  0x32   : > { %1513 = vmatmul.mubr.msk.bf16.vlgmr.msra.gmra.mrb[0].mxu0 %vm322_vm3, %v1386_v27  ;;  %v1357_v51 = vcombine.low %v518_v48, %v522_v63  ;;  %v1039_v57 = vshrl.u32 %v190_v44, 16  ;;  %v1042_v58 = vshll.u32 %v190_v44, 16  ;;  %v746_v62 = vshrl.u32 %v1927_v28, 16 }
  0x33   : > { %1521 = vmatpush3.bf16.msra.mxu0 %v963_v33  ;;  %1516 = vmatprep.mubr.msk.bf16.mxu0 %vm322_vm3, %v1387_v0  ;;  %v749_v63 = vshll.u32 %v1927_v28, 16  ;;  %v1394_v4 = vcombine.low %v1927_v28, %v190_v44  ;;  %v1360_v13 = vcombine.low %v1924_v12, %v546_v41  ;;  %v1366_v14 = vcombine.low %v1757_v8, %v1769_v16 }
  0x34   : > { %1624 = vmatprep.subr.msk.bf16.mxu0 %vm335_vm0, %v1399_v37  ;;  %v748_v10 = vrot.slane %v746_v62, 4  ;;  %v1041_v9 = vrot.slane %v1039_v57, 4  ;;  %v1044_v22 = vrot.slane %v1042_v58, 5  ;;  %v755_v23 = vshll.u32 %v1930_v29, 16 }
  0x35   : > { %v751_v11 = vrot.slane %v749_v63, 5  ;;  %v1048_v60 = vshll.u32 %v191_v45, 16  ;;  %v1148_v0 = vsel %vm335_vm0, %v1406_v49, 0  ;;  %v1367_v8 = vcombine.low %v1782_v26, %v1796_v34 }
  0x36   : > { %1473 = vmatmul.mubr.msk.bf16.vlgmr.msra.gmra.mrb[0].mxu1 %vm322_vm3, %v1341_v36  ;;  %v1045_v24 = vor.u32 %v1044_v22, %v1041_v9  ;;  %v757_v27 = vrot.slane %v755_v23, 5  ;;  %v1368_v16 = vcombine.low %v1813_v55, %v1821_v2  ;;  %v1369_v34 = vcombine.low %v1836_v20, %v1927_v28 }
  0x37   : > { %1481 = vmatpush3.bf16.msra.mxu1 %v574_v38  ;;  %1476 = vmatprep.mubr.msk.bf16.mxu1 %vm322_vm3, %v1342_v25  ;;  %v752_v15 = vor.u32 %v751_v11, %v748_v10  ;;  %v1050_v39 = vrot.slane %v1048_v60, 5  ;;  %v1377_v55 = vcombine.low %v1876_v54, %v1895_v18  ;;  %v1407_v32 = vcombine.low %v1957_v42, %v1971_v6 }
  0x38   : > { %1619 = vmatprep.subr.msk.bf16.mxu1 %vm335_vm0, %v1365_v7  ;;  %v1046_v12 = vrot.slane %v1045_v24, 4 }
  0x3a   : > { %1517 = vmatmul.mubr.msk.bf16.gmra.mrb[4].mxu0 %vm322_vm3, %v1388_v47  ;;  %v1051_v29 = vsel %vm1791_vm4, %v1046_v12, %v1050_v39 }
  0x3b   : > { %1522 = vmatprep.mubr.msk.bf16.mxu0 %vm322_vm3, %v1341_v36 }
  0x3e   : > { %1477 = vmatmul.mubr.msk.bf16.gmra.mrb[4].mxu1 %vm322_vm3, %v1343_v50 }
  0x3f   : > { %1482 = vmatprep.mubr.msk.bf16.mxu1 %vm322_vm3, %v1357_v51 }
  0x42   : > { %1523 = vmatmul.mubr.msk.bf16.vlgmr.msra.gmra.mrb[0].mxu0 %vm322_vm3, %v1342_v25 }
  0x43   : > { %1531 = vmatpush3.bf16.msra.mxu0 %v1060_v17  ;;  %1526 = vmatprep.mubr.msk.bf16.mxu0 %vm322_vm3, %v1343_v50 }
  0x44   : > { %1625 = vmatprep.subr.msk.bf16.mxu0 %vm335_vm0, %v1406_v49 }
  0x46   : > { %1483 = vmatmul.mubr.msk.bf16.vlgmr.msra.gmra.mrb[0].mxu1 %vm322_vm3, %v1358_v52 }
  0x47   : > { %1491 = vmatpush3.bf16.msra.mxu1 %v670_v53  ;;  %1486 = vmatprep.mubr.msk.bf16.mxu1 %vm322_vm3, %v1359_v56 }
  0x48   : > { %1621 = vmatprep.subr.msk.bf16.mxu1 %vm335_vm0, %v1723_v1  ;;  %v753_v1 = vrot.slane %v752_v15, 4 }
  0x4a   : > { %1527 = vmatmul.mubr.msk.bf16.gmra.mrb[4].mxu0 %vm322_vm3, %v1394_v4 }
  0x4b   : > { %1532 = vmatprep.mubr.msk.bf16.mxu0 %vm322_vm3, %v1838_v21  ;;  %v758_v21 = vsel %vm1791_vm4, %v753_v1, %v757_v27 }
  0x4c   : > { %v1400_v26 = vcombine.low %v758_v21, %v1051_v29 }
  0x4e   : > { %1487 = vmatmul.mubr.msk.bf16.gmra.mrb[4].mxu1 %vm322_vm3, %v1360_v13 }
  0x4f   : > { %1492 = vmatprep.mubr.msk.bf16.mxu1 %vm322_vm3, %v1366_v14 }
  0x52   : > { %1533 = vmatmul.mubr.msk.bf16.vlgmr.msra.gmra.mrb[0].mxu0 %vm322_vm3, %v1882_v61 }
  0x53   : > { %1541 = vmatpush3.bf16.msra.mxu0 %v1148_v0  ;;  %1536 = vmatprep.mubr.msk.bf16.mxu0 %vm322_vm3, %v1910_v19 }
  0x56   : > { %1493 = vmatmul.mubr.msk.bf16.vlgmr.msra.gmra.mrb[0].mxu1 %vm322_vm3, %v1367_v8 }
  0x57   : > { %1551 = vmatpush3.bf16.msra.mxu1 %v1731_v3  ;;  %1496 = vmatprep.mubr.msk.bf16.mxu1 %vm322_vm3, %v1368_v16  ;;  %v1378_v3 = vcombine.low %v1902_v59, %v758_v21 }
  0x5a   : > { %1537 = vmatmul.mubr.msk.bf16.gmra.mrb[4].mxu0 %vm322_vm3, %v1400_v26 }
  0x5b   : > { %1542 = vmatprep.mubr.msk.bf16.mxu0 %vm322_vm3, %v1358_v52 }
  0x5e   : > { %1497 = vmatmul.mubr.msk.bf16.gmra.mrb[4].mxu1 %vm322_vm3, %v1369_v34 }
  0x5f   : > { %1506 = vmatprep.mubr.msk.bf16.mxu1 %vm322_vm3, %v1377_v55 }
  0x62   : > { %1543 = vmatmul.mubr.msk.bf16.vlgmr.msra.gmra.mrb[0].mxu0 %vm322_vm3, %v1359_v56 }
  0x63   : > { %1546 = vmatprep.mubr.msk.bf16.mxu0 %vm322_vm3, %v1360_v13 }
  0x6a   : > { %1507 = vmatmul.mubr.msk.bf16.vlgmr.msra.gmra.mrb[4].mxu1 %vm322_vm3, %v1378_v3  ;;  %1547 = vmatmul.mubr.msk.bf16.gmra.mrb[4].mxu0 %vm322_vm3, %v1407_v32 }
 0x129   : > { %v1494_v2 = vpop.f32.mrb[0].mxu1 }
 0x12a   : > { %v706_v20 = vpop.f32.mrb[1].mxu1 }
 0x12b   : > { %v1495_v54 = vpop.f32.mrb[2].mxu1 }
 0x12c   : > { %v709_v61 = vpop.f32.mrb[3].mxu1 }
 0x135   : > { %v1544_v18 = vpop.f32.mrb[0].mxu0 }
 0x136   : > { %v1552_v19 = vadd.f32 %v1544_v18, %v1494_v2  ;;  %v1184_v28 = vpop.f32.mrb[1].mxu0 }
 0x137   : > { %v1553_v59 = vadd.f32 %v1184_v28, %v706_v20  ;;  %v1545_v5 = vpop.f32.mrb[2].mxu0 }
 0x138   : > { %v1225_v30 = vpack.c.bf16 %v1552_v19, %v1552_v19  ;;  %v1554_v31 = vadd.f32 %v1545_v5, %v1495_v54  ;;  %v1187_v33 = vpop.f32.mrb[3].mxu0 }
 0x139   : > { %v1223_v36 = vpack.c.bf16 %v1553_v59, %v1553_v59  ;;  %v1555_v37 = vadd.f32 %v1187_v33, %v709_v61 }
 0x13a   : > { %1234 = vst.msk [vmem:[%s2041_s14 + $0x8] sm:$0xf] %vm1231_vm8, %v1225_v30  ;;  %v1226_v38 = vpack.c.bf16 %v1554_v31, %v1554_v31 }
 0x13b   : > { %1232 = vst.msk [vmem:[%s2041_s14] sm:$0xf] %vm1231_vm8, %v1223_v36  ;;  %v1224_v25 = vpack.c.bf16 %v1555_v37, %v1555_v37 }
 0x13c   : > { %1235 = vst.msk [vmem:[%s2041_s14 + $0xc] sm:$0xf] %vm1231_vm8, %v1226_v38 }
 0x13d   : > { %v1508_v40 = vpop.f32.mrb[4].mxu1  ;;  %1233 = vst.msk [vmem:[%s2041_s14 + $0x4] sm:$0xf] %vm1231_vm8, %v1224_v25  ;;  %v1548_v41 = vpop.f32.mrb[4].mxu0 }
 0x13e   : > { %v831_v42 = vpop.f32.mrb[5].mxu1  ;;  %v1556_v43 = vadd.f32 %v1548_v41, %v1508_v40  ;;  %v1200_v44 = vpop.f32.mrb[5].mxu0 }
 0x13f   : > { %v1509_v45 = vpop.f32.mrb[6].mxu1  ;;  %v1557_v7 = vadd.f32 %v1200_v44, %v831_v42  ;;  %v1549_v35 = vpop.f32.mrb[6].mxu0 }
 0x140   : > { %v834_v46 = vpop.f32.mrb[7].mxu1  ;;  %v1229_v47 = vpack.c.bf16 %v1556_v43, %v1556_v43  ;;  %v1558_v6 = vadd.f32 %v1549_v35, %v1509_v45  ;;  %v1203_v48 = vpop.f32.mrb[7].mxu0 }
 0x141   : > { %v1227_v50 = vpack.c.bf16 %v1557_v7, %v1557_v7  ;;  %v1559_v51 = vadd.f32 %v1203_v48, %v834_v46 }
 0x142   : > { %1238 = vst.msk [vmem:[%s2041_s14 + $0x18] sm:$0xf] %vm1231_vm8, %v1229_v47  ;;  %v1230_v17 = vpack.c.bf16 %v1558_v6, %v1558_v6 }
 0x143   : > { %1236 = vst.msk [vmem:[%s2041_s14 + $0x10] sm:$0xf] %vm1231_vm8, %v1227_v50  ;;  %v1228_v52 = vpack.c.bf16 %v1559_v51, %v1559_v51 }
 0x144   : > { %1239 = vst.msk [vmem:[%s2041_s14 + $0x1c] sm:$0xf] %vm1231_vm8, %v1230_v17 }
 0x145   : > { %1237 = vst.msk [vmem:[%s2041_s14 + $0x14] sm:$0xf] %vm1231_vm8, %v1228_v52 }
 0x146 PF: > { %s12_s11 = sadd.s32 1, %s1682_s11   ;;  %s2075_s9 = smov %s1678_s10 }
 0x147   : > { %p9_p5 = scmp.ge.s32.totalorder %s12_s11, 4   ;;  %s2076_s10 = smov %s2078_s12 }
 0x149   :  { %11 = sbr.rel (!%p9_p5) target bundleno = 2 (0x2), region = 67 }

// kernel: down_forward.15
= control target key start
LH: loop header
LB: loop body
LE: loop exit
PB: predicated region body
PF: predicated region fallthrough
CT: control target
= control target key end

     0   :  { %s514_s15 = smov 0   ;;  %s569_s0 = inlined_call_operand.vmem [shape: bf16[2,64,8], index: 0, kind: input, shape index: {}]   ;;  %s570_s1 = inlined_call_operand.vmem [shape: f32[2,1,8], index: 1, kind: input, shape index: {}]   ;;  %s571_s2 = inlined_call_operand.vmem [shape: f32[1,8], index: 2, kind: input, shape index: {}]   ;;  %s572_s3 = inlined_call_operand.vmem [shape: f32[1,8], index: 3, kind: input, shape index: {}]   ;;  %s573_s4 = inlined_call_operand.vmem [shape: f32[2,64,8], index: 4, kind: output, shape index: {}]  }
   0x1 LB: > { %s430_s16 = sadd.s32 4294967295, %s487_s15   ;;  %p434_p0 = scmp.ge.s32.totalorder %s487_s15, 1  ;;  %s487_s15 = sphi %s514_s15, %s14_s15  }
   0x2   : > { %p170_p1 = scmp.lt.s32.totalorder %s487_s15, 3 }
   0x4   : > { %p171_p2 = pnand %p434_p0, %p170_p1 }
   0x5   : > { %p199_p3 = scmp.lt.s32.totalorder (!%p171_p2), %s430_s16, 1  ;;  %vm228_vm0 = vcmask (!%p171_p2), 64512  }
   0x6   : > { %174 = sbr.rel (%p171_p2) target bundleno = 543 (0x21f), region = 36 }
   0xd   : > { %s575_s16 = smov (!%p199_p3, %s430_s16), 1 }
   0xe   : > { %s444_s17 = sshll.u32 %s575_s16, 5  ;;  %s206_s5 = scalar_lea.vmem %s570_s1, %s575_s16 }
   0xf   : > { %s203_s20 = scalar_lea.vmem %s569_s0, %s444_s17  ;;  %s445_s8 = sshll.u32 %s575_s16, 6 }
  0x10   : > { %v447_v0 = vld [vmem:[%s203_s20] sm:$0xff]   ;;  %v462_v1 = vld [vmem:[%s203_s20 + $0x8] sm:$0xff]   ;;  %v463_v2 = vld [vmem:[%s203_s20 + $0x10] sm:$0xff]   ;;  %s211_s11 = scalar_lea.vmem %s573_s4, %s445_s8 }
  0x11   : > { %v448_v3 = vunpack.c.l.bf16 %v447_v0  ;;  %v449_v4 = vunpack.c.h.bf16 %v447_v0  ;;  %v452_v5 = vunpack.c.l.bf16 %v462_v1  ;;  %v453_v6 = vunpack.c.h.bf16 %v462_v1  ;;  %v464_v11 = vld [vmem:[%s203_s20 + $0x18] sm:$0xff]  }
  0x12   : > { %v456_v7 = vunpack.c.l.bf16 %v463_v2  ;;  %v457_v13 = vunpack.c.h.bf16 %v463_v2  ;;  %v460_v16 = vunpack.c.l.bf16 %v464_v11  ;;  %v461_v19 = vunpack.c.h.bf16 %v464_v11 }
  0x13   : > { %v229_v8 = vsel %vm228_vm0, %v448_v3, 0.0  ;;  %v230_v9 = vsel %vm228_vm0, %v449_v4, 0.0  ;;  %v232_v10 = vsel %vm228_vm0, %v452_v5, 0.0  ;;  %v234_v14 = vsel %vm228_vm0, %v453_v6, 0.0 }
  0x14   : > { %v231_v12 = vadd.f32 %v230_v9, %v229_v8  ;;  %v236_v17 = vsel %vm228_vm0, %v456_v7, 0.0  ;;  %v238_v20 = vsel %vm228_vm0, %v457_v13, 0.0  ;;  %v240_v22 = vsel %vm228_vm0, %v460_v16, 0.0 }
  0x15   : > { %v242_v24 = vsel %vm228_vm0, %v461_v19, 0.0 }
  0x16   : > { %v233_v15 = vadd.f32 %v232_v10, %v231_v12  ;;  %v439_v12 = vld [vmem:[%s571_s2] ss:$0 sm:$0xff] }
  0x18   : > { %v235_v18 = vadd.f32 %v234_v14, %v233_v15 }
  0x1a   : > { %v237_v21 = vadd.f32 %v236_v17, %v235_v18 }
  0x1c   : > { %v239_v23 = vadd.f32 %v238_v20, %v237_v21  ;;  %v440_v21 = vld [vmem:[%s572_s3] ss:$0 sm:$0xff] }
  0x1e   : > { %v241_v25 = vadd.f32 %v240_v22, %v239_v23 }
  0x20   : > { %v243_v26 = vadd.f32 %v242_v24, %v241_v25 }
  0x22   : > { %244 = vadd.xlane.f32.xlu0 %v243_v26  ;;  %v441_v26 = vld [vmem:[%s206_s5] ss:$0 sm:$0xff] }
  0xaf   : > { %v245_v27 = vpop.xlane.xlu0 %244 }
  0xb0   : > { %v246_v28 = vrot.slane %v245_v27, 4 }
  0xb2   : > { %v247_v29 = vadd.f32 %v246_v28, %v245_v27 }
  0xb4   : > { %v248_v30 = vrot.slane %v247_v29, 2 }
  0xb6   : > { %v249_v31 = vadd.f32 %v248_v30, %v247_v29 }
  0xb8   : > { %v250_v32 = vrot.slane %v249_v31, 1 }
  0xba   : > { %v251_v33 = vadd.f32 %v250_v32, %v249_v31 }
  0xbc   : > { %465 = vpush %v251_v33 }
  0xed   : > { %s466_s21 = spop %465 }
  0xee   : > { %s255_s22 = smul.f32 0.001953125, %s466_s21 }
  0xf0   : > { %v256_v34 = vstv %s255_s22 }
  0xf1   : > { %v257_v35 = vsub.f32 %v448_v3, %v256_v34  ;;  %v258_v36 = vsub.f32 %v449_v4, %v256_v34  ;;  %v259_v37 = vsub.f32 %v452_v5, %v256_v34  ;;  %v260_v38 = vsub.f32 %v453_v6, %v256_v34 }
  0xf2   : > { %v261_v39 = vsub.f32 %v456_v7, %v256_v34  ;;  %v262_v43 = vsub.f32 %v457_v13, %v256_v34  ;;  %v263_v48 = vsub.f32 %v460_v16, %v256_v34  ;;  %v264_v52 = vsub.f32 %v461_v19, %v256_v34 }
  0xf3   : > { %v265_v40 = vmul.f32 %v257_v35, %v257_v35  ;;  %v266_v41 = vmul.f32 %v258_v36, %v258_v36  ;;  %v267_v42 = vmul.f32 %v259_v37, %v259_v37  ;;  %v268_v44 = vmul.f32 %v260_v38, %v260_v38 }
  0xf4   : > { %v269_v49 = vmul.f32 %v261_v39, %v261_v39  ;;  %v270_v53 = vmul.f32 %v262_v43, %v262_v43  ;;  %v271_v56 = vmul.f32 %v263_v48, %v263_v48  ;;  %v272_v59 = vmul.f32 %v264_v52, %v264_v52 }
  0xf5   : > { %v273_v45 = vsel %vm228_vm0, %v265_v40, 0.0  ;;  %v274_v46 = vsel %vm228_vm0, %v266_v41, 0.0  ;;  %v276_v50 = vsel %vm228_vm0, %v267_v42, 0.0  ;;  %v278_v54 = vsel %vm228_vm0, %v268_v44, 0.0 }
  0xf6   : > { %v275_v47 = vadd.f32 %v274_v46, %v273_v45  ;;  %v280_v57 = vsel %vm228_vm0, %v269_v49, 0.0  ;;  %v282_v60 = vsel %vm228_vm0, %v270_v53, 0.0  ;;  %v284_v62 = vsel %vm228_vm0, %v271_v56, 0.0 }
  0xf7   : > { %v286_v0 = vsel %vm228_vm0, %v272_v59, 0.0 }
  0xf8   : > { %v277_v51 = vadd.f32 %v276_v50, %v275_v47 }
  0xfa   : > { %v279_v55 = vadd.f32 %v278_v54, %v277_v51 }
  0xfc   : > { %v281_v58 = vadd.f32 %v280_v57, %v279_v55 }
  0xfe   : > { %v283_v61 = vadd.f32 %v282_v60, %v281_v58 }
 0x100   : > { %v285_v63 = vadd.f32 %v284_v62, %v283_v61 }
 0x102   : > { %v287_v1 = vadd.f32 %v286_v0, %v285_v63 }
 0x104   : > { %288 = vadd.xlane.f32.xlu0 %v287_v1 }
 0x191   : > { %v289_v2 = vpop.xlane.xlu0 %288 }
 0x192   : > { %v290_v3 = vrot.slane %v289_v2, 4 }
 0x194   : > { %v291_v4 = vadd.f32 %v290_v3, %v289_v2 }
 0x196   : > { %v292_v5 = vrot.slane %v291_v4, 2 }
 0x198   : > { %v293_v6 = vadd.f32 %v292_v5, %v291_v4 }
 0x19a   : > { %v294_v7 = vrot.slane %v293_v6, 1 }
 0x19c   : > { %v295_v8 = vadd.f32 %v294_v7, %v293_v6 }
 0x19e   : > { %467 = vpush %v295_v8 }
 0x1cf   : > { %s468_s23 = spop %467 }
 0x1d0   : > { %s299_s24 = smul.f32 0.001953125, %s468_s23 }
 0x1d2   : > { %s300_s25 = sadd.f32 1e-05, %s299_s24 }
 0x1d4   : > { %v301_v9 = vstv %s300_s25 }
 0x1d5   : > { %479 = vrsqrt.f32 %v301_v9 }
 0x1df   : > { %v480_v10 = vpop.eup %479 }
 0x1e0   : > { %469 = vpush %v480_v10 }
 0x211   : > { %s470_s26 = spop %469 }
 0x212   : > { %v304_v11 = vstv %s470_s26 }
 0x213   : > { %v305_v13 = vmul.f32 %v304_v11, %v257_v35  ;;  %v306_v14 = vmul.f32 %v304_v11, %v258_v36  ;;  %v307_v15 = vmul.f32 %v304_v11, %v259_v37  ;;  %v308_v16 = vmul.f32 %v304_v11, %v260_v38 }
 0x214   : > { %v309_v17 = vmul.f32 %v304_v11, %v261_v39  ;;  %v310_v18 = vmul.f32 %v304_v11, %v262_v43  ;;  %v311_v19 = vmul.f32 %v304_v11, %v263_v48  ;;  %v312_v20 = vmul.f32 %v304_v11, %v264_v52 }
 0x215   : > { %v320_v22 = vmul.f32 %v439_v12, %v305_v13  ;;  %v321_v23 = vmul.f32 %v439_v12, %v306_v14  ;;  %v322_v24 = vmul.f32 %v439_v12, %v307_v15  ;;  %v323_v25 = vmul.f32 %v439_v12, %v308_v16 }
 0x216   : > { %v324_v27 = vmul.f32 %v439_v12, %v309_v17  ;;  %v325_v28 = vmul.f32 %v439_v12, %v310_v18  ;;  %v326_v29 = vmul.f32 %v439_v12, %v311_v19  ;;  %v327_v30 = vmul.f32 %v439_v12, %v312_v20 }
 0x217   : > { %v335_v31 = vadd.f32 %v440_v21, %v320_v22  ;;  %v336_v32 = vadd.f32 %v440_v21, %v321_v23  ;;  %v337_v33 = vadd.f32 %v440_v21, %v322_v24  ;;  %v338_v34 = vadd.f32 %v440_v21, %v323_v25 }
 0x218   : > { %v339_v35 = vadd.f32 %v440_v21, %v324_v27  ;;  %v340_v36 = vadd.f32 %v440_v21, %v325_v28  ;;  %v341_v37 = vadd.f32 %v440_v21, %v326_v29  ;;  %v342_v38 = vadd.f32 %v440_v21, %v327_v30 }
 0x219   : > { %v350_v39 = vadd.f32 %v441_v26, %v335_v31  ;;  %v351_v40 = vadd.f32 %v441_v26, %v336_v32  ;;  %v352_v41 = vadd.f32 %v441_v26, %v337_v33  ;;  %v353_v42 = vadd.f32 %v441_v26, %v338_v34 }
 0x21a   : > { %v354_v43 = vadd.f32 %v441_v26, %v339_v35  ;;  %v355_v44 = vadd.f32 %v441_v26, %v340_v36  ;;  %v356_v45 = vadd.f32 %v441_v26, %v341_v37  ;;  %v357_v46 = vadd.f32 %v441_v26, %v342_v38 }
 0x21b   : > { %358 = vst.msk [vmem:[%s211_s11] sm:$0xff] %vm228_vm0, %v350_v39  ;;  %359 = vst.msk [vmem:[%s211_s11 + $0x8] sm:$0xff] %vm228_vm0, %v351_v40 }
 0x21c   : > { %360 = vst.msk [vmem:[%s211_s11 + $0x10] sm:$0xff] %vm228_vm0, %v352_v41  ;;  %361 = vst.msk [vmem:[%s211_s11 + $0x18] sm:$0xff] %vm228_vm0, %v353_v42 }
 0x21d   : > { %362 = vst.msk [vmem:[%s211_s11 + $0x20] sm:$0xff] %vm228_vm0, %v354_v43  ;;  %363 = vst.msk [vmem:[%s211_s11 + $0x28] sm:$0xff] %vm228_vm0, %v355_v44 }
 0x21e   : > { %364 = vst.msk [vmem:[%s211_s11 + $0x30] sm:$0xff] %vm228_vm0, %v356_v45  ;;  %365 = vst.msk [vmem:[%s211_s11 + $0x38] sm:$0xff] %vm228_vm0, %v357_v46 }
 0x21f PF: > { %s14_s15 = sadd.s32 1, %s487_s15  }
 0x220   : > { %p11_p4 = scmp.ge.s32.totalorder %s14_s15, 4  }
 0x222   :  { %13 = sbr.rel (!%p11_p4) target bundleno = 1 (0x1), region = 69 }

// kernel: down_forward.14
= control target key start
LH: loop header
LB: loop body
LE: loop exit
PB: predicated region body
PF: predicated region fallthrough
CT: control target
= control target key end

     0   :  { %s1699_s9 = smov 0   ;;  %s1701_s10 = smov 0   ;;  %s2068_s0 = inlined_call_operand.vmem [shape: bf16[2,10,10,8], index: 0, kind: input, shape index: {}]   ;;  %s2069_s1 = inlined_call_operand.vmem [shape: bf16[9,8,8], index: 1, kind: input, shape index: {}]   ;;  %s2070_s2 = inlined_call_operand.vmem [shape: bf16[2,8,8,8], index: 2, kind: output, shape index: {}]  }
   0x1   :  { %s1703_s11 = smov 0  }
   0x2 LB: > { %s24_s12 = sadd.s32 1, %s1678_s10  ;;  %p1327_p0 = scmp.ge.s32.totalorder %s1682_s11, 1  ;;  %s1682_s11 = sphi %s1703_s11, %s12_s11   ;;  %s1678_s10 = sphi %s1701_s10, %s2076_s10   ;;  %s1674_s9 = sphi %s1699_s9, %s2075_s9  }
   0x3   : > { %p26_p1 = scmp.ge.s32.totalorder %s24_s12, 2  ;;  %p126_p2 = scmp.lt.s32.totalorder %s1682_s11, 3 }
   0x5   : > { %s2078_s12 = smov (%p26_p1, %s24_s12), 0  ;;  %p127_p3 = pnand %p1327_p0, %p126_p2 }
   0x6   : > { %v1331_v0 = vld [vmem:[%s2069_s1 + $0x4] sm:$0xf] (!%p127_p3)  ;;  %vm335_vm0 = vcmask (!%p127_p3), 1043456   ;;  %v1723_v1 = vld [vmem:[%s2069_s1 + $0x10] sm:$0xf] (!%p127_p3)  ;;  %p152_p4 = scmp.lt.s32.totalorder (!%p127_p3), %s1674_s9, 1 }
   0x7   : > { %130 = sbr.rel (%p127_p3) target bundleno = 326 (0x146), region = 28  ;;  %1616 = vmatprep.subr.msk.bf16.mxu1 (!%p127_p3), %vm335_vm0, %v1331_v0  ;;  %1620 = vmatprep.subr.msk.bf16.mxu0 (!%p127_p3), %vm335_vm0, %v1723_v1  ;;  %v337_v2 = vsel (!%p127_p3), %vm335_vm0, %v1331_v0, 0  ;;  %v1731_v3 = vsel (!%p127_p3), %vm335_vm0, %v1723_v1, 0  ;;  %v192_v4 = vld [vmem:[%s2069_s1] sm:$0xf] (!%p127_p3)  ;;  %vm322_vm3 = vcmask (!%p127_p3), 64512  }
   0x8   : > { %1461 = vmatpush3.bf16.msra.mxu1 (!%p127_p3), %v337_v2  ;;  %1501 = vmatpush3.bf16.msra.mxu0 (!%p127_p3), %v1731_v3  ;;  %v1384_v5 = vld [vmem:[%s2069_s1 + $0x14] sm:$0xf] (!%p127_p3)  ;;  %vm193_vm1 = vsmask.f32 (!%p127_p3), 3328  ;;  %vm194_vm2 = vsmask.f32 (!%p127_p3), 7440 }
   0x9   : > { %1617 = vmatprep.subr.msk.bf16.mxu1 (!%p127_p3), %vm335_vm0, %v192_v4  ;;  %1622 = vmatprep.subr.msk.bf16.mxu0 (!%p127_p3), %vm335_vm0, %v1384_v5  ;;  %v1772_v17 = vsel (!%p127_p3), %vm335_vm0, %v192_v4, 0  ;;  %v1775_v18 = vsel (!%p127_p3), %vm335_vm0, %v1384_v5, 0  ;;  %vm1791_vm4 = vmor (!%p127_p3), %vm193_vm1, %vm194_vm2  ;;  %vm512_vm5 = vcmask (!%p127_p3), 1042432   ;;  %vm513_vm6 = vcmask (!%p127_p3), 1046532  }
   0xa   : > { %vm1862_vm7 = vmor (!%p127_p3), %vm512_vm5, %vm513_vm6  ;;  %vm1231_vm8 = vcmask (!%p127_p3), 60416  }
   0xe   : > { %s2080_s9 = smov (!%p152_p4, %s1674_s9), 1 }
   0xf   : > { %s1626_s21 = smul.u32 80, %s2080_s9  ;;  %s1414_s7 = sshll.u32 %s2080_s9, 5 }
  0x10   : > { %s2041_s14 = scalar_lea.vmem %s2070_s2, %s1414_s7 }
  0x11   : > { %s1748_s24 = scalar_lea.vmem %s2068_s0, %s1626_s21 }
  0x12   : > { %v1751_v6 = vld [vmem:[%s1748_s24] sm:$0xf]  ;;  %v1754_v7 = vld [vmem:[%s1748_s24 + $0x4] sm:$0x1]  ;;  %v1757_v8 = vld [vmem:[%s1748_s24 + $0x8] sm:$0xf] }
  0x13   : > { %v1760_v9 = vld [vmem:[%s1748_s24 + $0xc] sm:$0x1]  ;;  %v197_v10 = vshrl.u32 %v1751_v6, 16  ;;  %v200_v11 = vshll.u32 %v1751_v6, 16  ;;  %v206_v12 = vshll.u32 %v1754_v7, 16  ;;  %v211_v13 = vshrl.u32 %v1757_v8, 16 }
  0x14   : > { %v214_v14 = vshll.u32 %v1757_v8, 16  ;;  %v220_v15 = vshll.u32 %v1760_v9, 16  ;;  %v1769_v16 = vld [vmem:[%s1748_s24 + $0x10] sm:$0xf]  ;;  %v521_v22 = vrot.slane %v1760_v9, 5  ;;  %v1340_v9 = vcombine.low %v1751_v6, %v1757_v8 }
  0x15   : > { %v199_v19 = vrot.slane %v197_v10, 4  ;;  %v202_v20 = vrot.slane %v200_v11, 5  ;;  %v213_v21 = vrot.slane %v211_v13, 4  ;;  %v1779_v23 = vld [vmem:[%s1748_s24 + $0x14] sm:$0x1]  ;;  %v208_v24 = vrot.slane %v206_v12, 5 }
  0x16   : > { %v216_v25 = vrot.slane %v214_v14, 5  ;;  %v1782_v26 = vld [vmem:[%s1748_s24 + $0x18] sm:$0xf]  ;;  %v1785_v27 = vld [vmem:[%s1748_s24 + $0x1c] sm:$0x1]  ;;  %v222_v29 = vrot.slane %v220_v15, 5 }
  0x17   : > { %v203_v28 = vor.u32 %v202_v20, %v199_v19  ;;  %v225_v30 = vshrl.u32 %v1769_v16, 16  ;;  %v228_v31 = vshll.u32 %v1769_v16, 16  ;;  %v1796_v34 = vld [vmem:[%s1748_s24 + $0x20] sm:$0xf]  ;;  %v234_v35 = vshll.u32 %v1779_v23, 16 }
  0x18   : > { %v217_v33 = vor.u32 %v216_v25, %v213_v21  ;;  %v239_v36 = vshrl.u32 %v1782_v26, 16  ;;  %v242_v37 = vshll.u32 %v1782_v26, 16  ;;  %v1802_v39 = vld [vmem:[%s1748_s24 + $0x24] sm:$0x1]  ;;  %v248_v42 = vshll.u32 %v1785_v27, 16 }
  0x19   : > { %v204_v38 = vrot.slane %v203_v28, 4  ;;  %v227_v40 = vrot.slane %v225_v30, 4  ;;  %v230_v41 = vrot.slane %v228_v31, 5  ;;  %v236_v44 = vrot.slane %v234_v35, 5  ;;  %v1813_v55 = vld [vmem:[%s1748_s24 + $0x28] sm:$0xf] }
  0x1a   : > { %v218_v43 = vrot.slane %v217_v33, 4  ;;  %v241_v45 = vrot.slane %v239_v36, 4  ;;  %v244_v46 = vrot.slane %v242_v37, 5  ;;  %v250_v49 = vrot.slane %v248_v42, 5  ;;  %v1817_v60 = vld [vmem:[%s1748_s24 + $0x2c] sm:$0x1] }
  0x1b   : > { %v209_v47 = vsel %vm1791_vm4, %v204_v38, %v208_v24  ;;  %v231_v48 = vor.u32 %v230_v41, %v227_v40  ;;  %v253_v50 = vshrl.u32 %v1796_v34, 16  ;;  %v256_v53 = vshll.u32 %v1796_v34, 16  ;;  %v1821_v2 = vld [vmem:[%s1748_s24 + $0x30] sm:$0xf]  ;;  %v1830_v12 = vld [vmem:[%s1748_s24 + $0x34] sm:$0x1] }
  0x1c   : > { %v223_v51 = vsel %vm1791_vm4, %v218_v43, %v222_v29  ;;  %v245_v52 = vor.u32 %v244_v46, %v241_v45  ;;  %v262_v54 = vshll.u32 %v1802_v39, 16  ;;  %v525_v59 = vrot.slane %v1779_v23, 5  ;;  %v1836_v20 = vld [vmem:[%s1748_s24 + $0x38] sm:$0xf]  ;;  %v1841_v25 = vld [vmem:[%s1748_s24 + $0x3c] sm:$0x1] }
  0x1d   : > { %v1332_v56 = vcombine.low %v209_v47, %v223_v51  ;;  %v232_v57 = vrot.slane %v231_v48, 4  ;;  %v255_v58 = vrot.slane %v253_v50, 4  ;;  %v258_v62 = vrot.slane %v256_v53, 5  ;;  %v1850_v35 = vld [vmem:[%s2069_s1 + $0x8] sm:$0xf] }
  0x1e   : > { %v246_v61 = vrot.slane %v245_v52, 4  ;;  %v264_v63 = vrot.slane %v262_v54, 5  ;;  %v529_v0 = vrot.slane %v1785_v27, 5  ;;  %v533_v5 = vrot.slane %v1802_v39, 5  ;;  %v1393_v53 = vld [vmem:[%s2069_s1 + $0x18] sm:$0xf] }
  0x1f   : > { %1462 = vmatprep.mubr.msk.bf16.mxu1 %vm322_vm3, %v1332_v56  ;;  %v237_v4 = vsel %vm1791_vm4, %v232_v57, %v236_v44  ;;  %v267_v10 = vshrl.u32 %v1813_v55, 16  ;;  %v270_v11 = vshll.u32 %v1813_v55, 16  ;;  %v259_v14 = vor.u32 %v258_v62, %v255_v58 }
  0x20   : > { %v251_v13 = vsel %vm1791_vm4, %v246_v61, %v250_v49  ;;  %v1375_v15 = vcombine.low %v223_v51, %v237_v4  ;;  %v276_v19 = vshll.u32 %v1817_v60, 16  ;;  %v281_v28 = vshrl.u32 %v1821_v2, 16  ;;  %v1406_v49 = vld [vmem:[%s2069_s1 + $0x20] sm:$0xf] }
  0x21   : > { %v1838_v21 = vcombine.low %v237_v4, %v251_v13  ;;  %v269_v23 = vrot.slane %v267_v10, 4  ;;  %v272_v24 = vrot.slane %v270_v11, 5  ;;  %v260_v29 = vrot.slane %v259_v14, 4 }
  0x22   : > { %1502 = vmatprep.mubr.msk.bf16.mxu0 %vm322_vm3, %v1375_v15  ;;  %v278_v30 = vrot.slane %v276_v19, 5  ;;  %v284_v31 = vshll.u32 %v1821_v2, 16  ;;  %v290_v33 = vshll.u32 %v1830_v12, 16  ;;  %v283_v37 = vrot.slane %v281_v28, 4  ;;  %v1927_v28 = vld [vmem:[%s1748_s24 + $0x40] sm:$0xf] }
  0x23   : > { %1463 = vmatmul.mubr.msk.bf16.vlgmr.msra.gmra.mrb[0].mxu1 %vm322_vm3, %v1838_v21  ;;  %v273_v36 = vor.u32 %v272_v24, %v269_v23  ;;  %v295_v38 = vshrl.u32 %v1836_v20, 16  ;;  %v298_v40 = vshll.u32 %v1836_v20, 16  ;;  %v265_v41 = vsel %vm1791_vm4, %v260_v29, %v264_v63  ;;  %v1930_v29 = vld [vmem:[%s1748_s24 + $0x44] sm:$0x1] }
  0x24   : > { %1471 = vmatpush3.bf16.msra.mxu1 %v1772_v17  ;;  %v286_v42 = vrot.slane %v284_v31, 5  ;;  %v292_v43 = vrot.slane %v290_v33, 5  ;;  %v304_v44 = vshll.u32 %v1841_v25, 16  ;;  %v1376_v45 = vcombine.low %v251_v13, %v265_v41 }
  0x25   : > { %v274_v46 = vrot.slane %v273_v36, 4  ;;  %v297_v47 = vrot.slane %v295_v38, 4  ;;  %v300_v48 = vrot.slane %v298_v40, 5  ;;  %1618 = vmatprep.subr.msk.bf16.mxu1 %vm335_vm0, %v1850_v35  ;;  %v1349_v17 = vrot.slane %v1757_v8, 9 }
  0x26   : > { %v287_v50 = vor.u32 %v286_v42, %v283_v37  ;;  %v306_v51 = vrot.slane %v304_v44, 5  ;;  %v1350_v52 = vrot.slane %v1769_v16, 9  ;;  %1503 = vmatmul.mubr.msk.bf16.vlgmr.msra.gmra.mrb[0].mxu0 %vm322_vm3, %v1376_v45  ;;  %v1351_v57 = vrot.slane %v1782_v26, 9  ;;  %v1399_v37 = vld [vmem:[%s2069_s1 + $0x1c] sm:$0xf] }
  0x27   : > { %v1876_v54 = vsel %vm1791_vm4, %v274_v46, %v278_v30  ;;  %v301_v56 = vor.u32 %v300_v48, %v297_v47  ;;  %v1352_v58 = vrot.slane %v1796_v34, 9  ;;  %1511 = vmatpush3.bf16.msra.mxu0 %v1775_v18  ;;  %v522_v63 = vsel %vm1862_vm7, %v1349_v17, %v521_v22  ;;  %v190_v44 = vld [vmem:[%s1748_s24 + $0x48] sm:$0xf]  ;;  %v191_v45 = vld [vmem:[%s1748_s24 + $0x4c] sm:$0x1] }
  0x28   : > { %v1882_v61 = vcombine.low %v265_v41, %v1876_v54  ;;  %v288_v62 = vrot.slane %v287_v50, 4  ;;  %v526_v4 = vsel %vm1862_vm7, %v1350_v52, %v525_v59  ;;  %1623 = vmatprep.subr.msk.bf16.mxu0 %vm335_vm0, %v1393_v53  ;;  %v1353_v22 = vrot.slane %v1813_v55, 9 }
  0x29   : > { %v302_v10 = vrot.slane %v301_v56, 4  ;;  %v1385_v11 = vcombine.low %v522_v63, %v526_v4  ;;  %v537_v13 = vrot.slane %v1817_v60, 5  ;;  %v1354_v14 = vrot.slane %v1821_v2, 9 }
  0x2a   : > { %1466 = vmatprep.mubr.msk.bf16.mxu1 %vm322_vm3, %v1882_v61  ;;  %v1895_v18 = vsel %vm1791_vm4, %v288_v62, %v292_v43  ;;  %v541_v15 = vrot.slane %v1830_v12, 5  ;;  %v530_v23 = vsel %vm1862_vm7, %v1351_v57, %v529_v0  ;;  %v534_v24 = vsel %vm1862_vm7, %v1352_v58, %v533_v5 }
  0x2b   : > { %v1902_v59 = vsel %vm1791_vm4, %v302_v10, %v306_v51  ;;  %1512 = vmatprep.mubr.msk.bf16.mxu0 %vm322_vm3, %v1385_v11  ;;  %v538_v60 = vsel %vm1862_vm7, %v1353_v22, %v537_v13  ;;  %v1386_v27 = vcombine.low %v530_v23, %v534_v24  ;;  %v1355_v39 = vrot.slane %v1836_v20, 9 }
  0x2c   : > { %v1910_v19 = vcombine.low %v1895_v18, %v1902_v59  ;;  %v1924_v12 = vsel %vm1862_vm7, %v1354_v14, %v541_v15  ;;  %v545_v5 = vrot.slane %v1841_v25, 5  ;;  %v1383_v30 = vrot.slane %v1927_v28, 9 }
  0x2d   : > { %v1387_v0 = vcombine.low %v538_v60, %v1924_v12  ;;  %v857_v31 = vrot.slane %v1930_v29, 5  ;;  %v963_v33 = vsel %vm335_vm0, %v1393_v53, 0  ;;  %v1341_v36 = vcombine.low %v1769_v16, %v1782_v26 }
  0x2e   : > { %1467 = vmatmul.mubr.msk.bf16.gmra.mrb[4].mxu1 %vm322_vm3, %v1910_v19  ;;  %v574_v38 = vsel %vm335_vm0, %v1850_v35, 0  ;;  %v1342_v25 = vcombine.low %v1796_v34, %v1813_v55  ;;  %v517_v40 = vrot.slane %v1754_v7, 5  ;;  %v546_v41 = vsel %vm1862_vm7, %v1355_v39, %v545_v5  ;;  %v1365_v7 = vld [vmem:[%s2069_s1 + $0xc] sm:$0xf] }
  0x2f   : > { %1472 = vmatprep.mubr.msk.bf16.mxu1 %vm322_vm3, %v1340_v9  ;;  %v1957_v42 = vsel %vm1862_vm7, %v1383_v30, %v857_v31  ;;  %v1348_v43 = vrot.slane %v1751_v6, 9  ;;  %v1405_v35 = vrot.slane %v190_v44, 9  ;;  %v1138_v46 = vrot.slane %v191_v45, 5 }
  0x30   : > { %v1388_v47 = vcombine.low %v546_v41, %v1957_v42  ;;  %v1343_v50 = vcombine.low %v1821_v2, %v1836_v20  ;;  %v1060_v17 = vsel %vm335_vm0, %v1399_v37, 0  ;;  %v1358_v52 = vcombine.low %v526_v4, %v530_v23 }
  0x31   : > { %v1971_v6 = vsel %vm1862_vm7, %v1405_v35, %v1138_v46  ;;  %v518_v48 = vsel %vm1862_vm7, %v1348_v43, %v517_v40  ;;  %v670_v53 = vsel %vm335_vm0, %v1365_v7, 0  ;;  %v1359_v56 = vcombine.low %v534_v24, %v538_v60 }
  0x32   : > { %1513 = vmatmul.mubr.msk.bf16.vlgmr.msra.gmra.mrb[0].mxu0 %vm322_vm3, %v1386_v27  ;;  %v1357_v51 = vcombine.low %v518_v48, %v522_v63  ;;  %v1039_v57 = vshrl.u32 %v190_v44, 16  ;;  %v1042_v58 = vshll.u32 %v190_v44, 16  ;;  %v746_v62 = vshrl.u32 %v1927_v28, 16 }
  0x33   : > { %1521 = vmatpush3.bf16.msra.mxu0 %v963_v33  ;;  %1516 = vmatprep.mubr.msk.bf16.mxu0 %vm322_vm3, %v1387_v0  ;;  %v749_v63 = vshll.u32 %v1927_v28, 16  ;;  %v1394_v4 = vcombine.low %v1927_v28, %v190_v44  ;;  %v1360_v13 = vcombine.low %v1924_v12, %v546_v41  ;;  %v1366_v14 = vcombine.low %v1757_v8, %v1769_v16 }
  0x34   : > { %1624 = vmatprep.subr.msk.bf16.mxu0 %vm335_vm0, %v1399_v37  ;;  %v748_v10 = vrot.slane %v746_v62, 4  ;;  %v1041_v9 = vrot.slane %v1039_v57, 4  ;;  %v1044_v22 = vrot.slane %v1042_v58, 5  ;;  %v755_v23 = vshll.u32 %v1930_v29, 16 }
  0x35   : > { %v751_v11 = vrot.slane %v749_v63, 5  ;;  %v1048_v60 = vshll.u32 %v191_v45, 16  ;;  %v1148_v0 = vsel %vm335_vm0, %v1406_v49, 0  ;;  %v1367_v8 = vcombine.low %v1782_v26, %v1796_v34 }
  0x36   : > { %1473 = vmatmul.mubr.msk.bf16.vlgmr.msra.gmra.mrb[0].mxu1 %vm322_vm3, %v1341_v36  ;;  %v1045_v24 = vor.u32 %v1044_v22, %v1041_v9  ;;  %v757_v27 = vrot.slane %v755_v23, 5  ;;  %v1368_v16 = vcombine.low %v1813_v55, %v1821_v2  ;;  %v1369_v34 = vcombine.low %v1836_v20, %v1927_v28 }
  0x37   : > { %1481 = vmatpush3.bf16.msra.mxu1 %v574_v38  ;;  %1476 = vmatprep.mubr.msk.bf16.mxu1 %vm322_vm3, %v1342_v25  ;;  %v752_v15 = vor.u32 %v751_v11, %v748_v10  ;;  %v1050_v39 = vrot.slane %v1048_v60, 5  ;;  %v1377_v55 = vcombine.low %v1876_v54, %v1895_v18  ;;  %v1407_v32 = vcombine.low %v1957_v42, %v1971_v6 }
  0x38   : > { %1619 = vmatprep.subr.msk.bf16.mxu1 %vm335_vm0, %v1365_v7  ;;  %v1046_v12 = vrot.slane %v1045_v24, 4 }
  0x3a   : > { %1517 = vmatmul.mubr.msk.bf16.gmra.mrb[4].mxu0 %vm322_vm3, %v1388_v47  ;;  %v1051_v29 = vsel %vm1791_vm4, %v1046_v12, %v1050_v39 }
  0x3b   : > { %1522 = vmatprep.mubr.msk.bf16.mxu0 %vm322_vm3, %v1341_v36 }
  0x3e   : > { %1477 = vmatmul.mubr.msk.bf16.gmra.mrb[4].mxu1 %vm322_vm3, %v1343_v50 }
  0x3f   : > { %1482 = vmatprep.mubr.msk.bf16.mxu1 %vm322_vm3, %v1357_v51 }
  0x42   : > { %1523 = vmatmul.mubr.msk.bf16.vlgmr.msra.gmra.mrb[0].mxu0 %vm322_vm3, %v1342_v25 }
  0x43   : > { %1531 = vmatpush3.bf16.msra.mxu0 %v1060_v17  ;;  %1526 = vmatprep.mubr.msk.bf16.mxu0 %vm322_vm3, %v1343_v50 }
  0x44   : > { %1625 = vmatprep.subr.msk.bf16.mxu0 %vm335_vm0, %v1406_v49 }
  0x46   : > { %1483 = vmatmul.mubr.msk.bf16.vlgmr.msra.gmra.mrb[0].mxu1 %vm322_vm3, %v1358_v52 }
  0x47   : > { %1491 = vmatpush3.bf16.msra.mxu1 %v670_v53  ;;  %1486 = vmatprep.mubr.msk.bf16.mxu1 %vm322_vm3, %v1359_v56 }
  0x48   : > { %1621 = vmatprep.subr.msk.bf16.mxu1 %vm335_vm0, %v1723_v1  ;;  %v753_v1 = vrot.slane %v752_v15, 4 }
  0x4a   : > { %1527 = vmatmul.mubr.msk.bf16.gmra.mrb[4].mxu0 %vm322_vm3, %v1394_v4 }
  0x4b   : > { %1532 = vmatprep.mubr.msk.bf16.mxu0 %vm322_vm3, %v1838_v21  ;;  %v758_v21 = vsel %vm1791_vm4, %v753_v1, %v757_v27 }
  0x4c   : > { %v1400_v26 = vcombine.low %v758_v21, %v1051_v29 }
  0x4e   : > { %1487 = vmatmul.mubr.msk.bf16.gmra.mrb[4].mxu1 %vm322_vm3, %v1360_v13 }
  0x4f   : > { %1492 = vmatprep.mubr.msk.bf16.mxu1 %vm322_vm3, %v1366_v14 }
  0x52   : > { %1533 = vmatmul.mubr.msk.bf16.vlgmr.msra.gmra.mrb[0].mxu0 %vm322_vm3, %v1882_v61 }
  0x53   : > { %1541 = vmatpush3.bf16.msra.mxu0 %v1148_v0  ;;  %1536 = vmatprep.mubr.msk.bf16.mxu0 %vm322_vm3, %v1910_v19 }
  0x56   : > { %1493 = vmatmul.mubr.msk.bf16.vlgmr.msra.gmra.mrb[0].mxu1 %vm322_vm3, %v1367_v8 }
  0x57   : > { %1551 = vmatpush3.bf16.msra.mxu1 %v1731_v3  ;;  %1496 = vmatprep.mubr.msk.bf16.mxu1 %vm322_vm3, %v1368_v16  ;;  %v1378_v3 = vcombine.low %v1902_v59, %v758_v21 }
  0x5a   : > { %1537 = vmatmul.mubr.msk.bf16.gmra.mrb[4].mxu0 %vm322_vm3, %v1400_v26 }
  0x5b   : > { %1542 = vmatprep.mubr.msk.bf16.mxu0 %vm322_vm3, %v1358_v52 }
  0x5e   : > { %1497 = vmatmul.mubr.msk.bf16.gmra.mrb[4].mxu1 %vm322_vm3, %v1369_v34 }
  0x5f   : > { %1506 = vmatprep.mubr.msk.bf16.mxu1 %vm322_vm3, %v1377_v55 }
  0x62   : > { %1543 = vmatmul.mubr.msk.bf16.vlgmr.msra.gmra.mrb[0].mxu0 %vm322_vm3, %v1359_v56 }
  0x63   : > { %1546 = vmatprep.mubr.msk.bf16.mxu0 %vm322_vm3, %v1360_v13 }
  0x6a   : > { %1507 = vmatmul.mubr.msk.bf16.vlgmr.msra.gmra.mrb[4].mxu1 %vm322_vm3, %v1378_v3  ;;  %1547 = vmatmul.mubr.msk.bf16.gmra.mrb[4].mxu0 %vm322_vm3, %v1407_v32 }
 0x129   : > { %v1494_v2 = vpop.f32.mrb[0].mxu1 }
 0x12a   : > { %v706_v20 = vpop.f32.mrb[1].mxu1 }
 0x12b   : > { %v1495_v54 = vpop.f32.mrb[2].mxu1 }
 0x12c   : > { %v709_v61 = vpop.f32.mrb[3].mxu1 }
 0x135   : > { %v1544_v18 = vpop.f32.mrb[0].mxu0 }
 0x136   : > { %v1552_v19 = vadd.f32 %v1544_v18, %v1494_v2  ;;  %v1184_v28 = vpop.f32.mrb[1].mxu0 }
 0x137   : > { %v1553_v59 = vadd.f32 %v1184_v28, %v706_v20  ;;  %v1545_v5 = vpop.f32.mrb[2].mxu0 }
 0x138   : > { %v1225_v30 = vpack.c.bf16 %v1552_v19, %v1552_v19  ;;  %v1554_v31 = vadd.f32 %v1545_v5, %v1495_v54  ;;  %v1187_v33 = vpop.f32.mrb[3].mxu0 }
 0x139   : > { %v1223_v36 = vpack.c.bf16 %v1553_v59, %v1553_v59  ;;  %v1555_v37 = vadd.f32 %v1187_v33, %v709_v61 }
 0x13a   : > { %1234 = vst.msk [vmem:[%s2041_s14 + $0x8] sm:$0xf] %vm1231_vm8, %v1225_v30  ;;  %v1226_v38 = vpack.c.bf16 %v1554_v31, %v1554_v31 }
 0x13b   : > { %1232 = vst.msk [vmem:[%s2041_s14] sm:$0xf] %vm1231_vm8, %v1223_v36  ;;  %v1224_v25 = vpack.c.bf16 %v1555_v37, %v1555_v37 }
 0x13c   : > { %1235 = vst.msk [vmem:[%s2041_s14 + $0xc] sm:$0xf] %vm1231_vm8, %v1226_v38 }
 0x13d   : > { %v1508_v40 = vpop.f32.mrb[4].mxu1  ;;  %1233 = vst.msk [vmem:[%s2041_s14 + $0x4] sm:$0xf] %vm1231_vm8, %v1224_v25  ;;  %v1548_v41 = vpop.f32.mrb[4].mxu0 }
 0x13e   : > { %v831_v42 = vpop.f32.mrb[5].mxu1  ;;  %v1556_v43 = vadd.f32 %v1548_v41, %v1508_v40  ;;  %v1200_v44 = vpop.f32.mrb[5].mxu0 }
 0x13f   : > { %v1509_v45 = vpop.f32.mrb[6].mxu1  ;;  %v1557_v7 = vadd.f32 %v1200_v44, %v831_v42  ;;  %v1549_v35 = vpop.f32.mrb[6].mxu0 }
 0x140   : > { %v834_v46 = vpop.f32.mrb[7].mxu1  ;;  %v1229_v47 = vpack.c.bf16 %v1556_v43, %v1556_v43  ;;  %v1558_v6 = vadd.f32 %v1549_v35, %v1509_v45  ;;  %v1203_v48 = vpop.f32.mrb[7].mxu0 }
 0x141   : > { %v1227_v50 = vpack.c.bf16 %v1557_v7, %v1557_v7  ;;  %v1559_v51 = vadd.f32 %v1203_v48, %v834_v46 }
 0x142   : > { %1238 = vst.msk [vmem:[%s2041_s14 + $0x18] sm:$0xf] %vm1231_vm8, %v1229_v47  ;;  %v1230_v17 = vpack.c.bf16 %v1558_v6, %v1558_v6 }
 0x143   : > { %1236 = vst.msk [vmem:[%s2041_s14 + $0x10] sm:$0xf] %vm1231_vm8, %v1227_v50  ;;  %v1228_v52 = vpack.c.bf16 %v1559_v51, %v1559_v51 }
 0x144   : > { %1239 = vst.msk [vmem:[%s2041_s14 + $0x1c] sm:$0xf] %vm1231_vm8, %v1230_v17 }
 0x145   : > { %1237 = vst.msk [vmem:[%s2041_s14 + $0x14] sm:$0xf] %vm1231_vm8, %v1228_v52 }
 0x146 PF: > { %s12_s11 = sadd.s32 1, %s1682_s11   ;;  %s2075_s9 = smov %s1678_s10 }
 0x147   : > { %p9_p5 = scmp.ge.s32.totalorder %s12_s11, 4   ;;  %s2076_s10 = smov %s2078_s12 }
 0x149   :  { %11 = sbr.rel (!%p9_p5) target bundleno = 2 (0x2), region = 67 }

</bundles_post_ra>
